<compile_context>
chip_gen: v7x
topology: tpu7x:2x2x1
jax: 0.10.0
libtpu: 0.0.40
codegen_flags: <defaults>
</compile_context>

<pallas_src>
import functools

import jax
import jax.numpy as jnp
from jax.experimental import pallas as pl
from jax.experimental.pallas import tpu as pltpu  # noqa: F401  (kept for TPU-specific tuning hooks)


# Merged gate-column order (by gate type): [g | i | f | o].
# Source (PyTorch) gate order inside W_ih / W_hh / bias is [i, f, g, o].
_GATE_SLOT_TO_SRC = (2, 0, 1, 3)


def _sigmoid(x):
    # Exact sigmoid via a single EUP tanh (avoids exp + VPU-divide lowering on the serial path).
    return 0.5 * jnp.tanh(0.5 * x) + 0.5


# ------------------------------ fused wavefront kernel ----------------------------

def _rnn_wavefront_kernel(x_ref, *refs, T, Bp, H, depth_ns, finals_spec, out_lanes):
    """refs = [wih_d, whh_d, b_d for each depth d] + [out_ref].

    Per depth d with n = depth_ns[d] active stacks:
      wih_d : (rows_d, 4*n*H) bf16   rows_d = D_in (depth 0) or n_prev*H (block-diagonal)
      whh_d : (n*H,   4*n*H) bf16    block-diagonal per stack
      b_d   : (1,     4*n*H) f32     combined b_ih + b_hh
    Gate columns grouped by type: [g | i | f | o], each block column-blocked by stack.
    """
    n_depths = len(depth_ns)
    w_refs = refs[:3 * n_depths]
    out_ref = refs[3 * n_depths]

    prev_hs = None     # list (len T) of (Bp, n_prev*H) f32 hidden states of the previous depth
    last_h = []        # last-timestep merged hidden state per depth

    for d, n in enumerate(depth_ns):
        # Hoisted loads: weights read once per depth, never inside the time loop.
        wih = w_refs[3 * d][...]
        whh = w_refs[3 * d + 1][...]
        b = w_refs[3 * d + 2][...]
        nH = n * H

        # Hoisted input projection for all T timesteps: one MXU matmul per depth,
        # off the serial h_t -> h_{t+1} dependence chain.
        if d == 0:
            inp = x_ref[...]                                              # (T*Bp, D_in) bf16
        else:
            inp = jnp.concatenate(prev_hs, axis=0).astype(jnp.bfloat16)   # (T*Bp, n_prev*H)
        gx = jnp.dot(inp, wih, preferred_element_type=jnp.float32) + b    # (T*Bp, 4nH) f32

        h = jnp.zeros((Bp, nH), jnp.float32)
        c = jnp.zeros((Bp, nH), jnp.float32)
        hs = []
        for t in range(T):  # static unroll; T is small, offsets are tile-aligned
            gates = gx[t * Bp:(t + 1) * Bp, :] + jnp.dot(
                h.astype(jnp.bfloat16), whh, preferred_element_type=jnp.float32)
            # Gate-type grouping [g | i | f | o]: tanh only on g, one sigmoid over i/f/o.
            g_g = jnp.tanh(gates[:, :nH])
            ifo = _sigmoid(gates[:, nH:])
            i_g = ifo[:, :nH]
            f_g = ifo[:, nH:2 * nH]
            o_g = ifo[:, 2 * nH:]
            c = f_g * c + i_g * g_g          # f32 cell state
            h = o_g * jnp.tanh(c)            # f32 hidden state (stays f32 between layers)
            hs.append(h)
        prev_hs = hs
        last_h.append(h)

    # Last-timestep hidden of each stack's TOP layer, in rnn_1 | rnn_2 | rnn_3 order.
    finals = [last_h[d][:, col:col + H] for (d, col) in finals_spec]
    cat_w = H * len(finals)
    if out_lanes > cat_w:
        # Pad to a full 128-lane store (unmasked vst); SiLU(0) == 0 so padding stays zero.
        finals.append(jnp.zeros((Bp, out_lanes - cat_w), jnp.float32))
    cat = jnp.concatenate(finals, axis=1)
    out_ref[...] = (cat * _sigmoid(cat)).astype(out_ref.dtype)   # fused SiLU epilogue


# ------------------------------ parameter init --------------------------------

def init_lstm_stack(key, num_layers, input_size, hidden):
    """Deterministic init matching torch.nn.LSTM parameter shapes.

    Returns list of (W_ih^T (D_l, 4H), W_hh^T (H, 4H), bias (1, 4H)) per layer,
    gate order [i, f, g, o], biases combined (b_ih + b_hh).
    """
    bound = 1.0 / jnp.sqrt(jnp.float32(hidden))
    layers = []
    for layer in range(num_layers):
        d_in = input_size if layer == 0 else hidden
        key, k1, k2, k3, k4 = jax.random.split(key, 5)
        w_ih = jax.random.uniform(k1, (4 * hidden, d_in), jnp.float32, -bound, bound)
        w_hh = jax.random.uniform(k2, (4 * hidden, hidden), jnp.float32, -bound, bound)
        b_ih = jax.random.uniform(k3, (4 * hidden,), jnp.float32, -bound, bound)
        b_hh = jax.random.uniform(k4, (4 * hidden,), jnp.float32, -bound, bound)
        layers.append((w_ih.T, w_hh.T, (b_ih + b_hh).reshape(1, 4 * hidden)))
    return layers


# -------------------- host-side wavefront weight merging ----------------------

def _merge_depth_params(stacks, depth, H):
    """Merge all stacks active at `depth` into block-diagonal / gate-grouped matrices."""
    layer_counts = [len(s) for s in stacks]
    active = [k for k, nl in enumerate(layer_counts) if nl > depth]
    n = len(active)
    if depth == 0:
        d_in = stacks[active[0]][0][0].shape[0]          # W_ih^T is (D_in, 4H)
        rows, row_w = d_in, d_in
        row_off = {k: 0 for k in active}                 # every stack reads the same x
    else:
        prev_active = [k for k, nl in enumerate(layer_counts) if nl > depth - 1]
        rows, row_w = len(prev_active) * H, H
        row_off = {k: prev_active.index(k) * H for k in active}

    wih = jnp.zeros((rows, 4 * n * H), jnp.float32)
    whh = jnp.zeros((n * H, 4 * n * H), jnp.float32)
    bias = jnp.zeros((1, 4 * n * H), jnp.float32)
    for pos, k in enumerate(active):
        w_ih_t, w_hh_t, b = stacks[k][depth]
        for slot, gsrc in enumerate(_GATE_SLOT_TO_SRC):   # merged order [g|i|f|o]
            col = slot * n * H + pos * H
            src = slice(gsrc * H, (gsrc + 1) * H)
            wih = wih.at[row_off[k]:row_off[k] + row_w, col:col + H].set(w_ih_t[:, src])
            whh = whh.at[pos * H:(pos + 1) * H, col:col + H].set(w_hh_t[:, src])
            bias = bias.at[:, col:col + H].set(b[:, src])
    return wih.astype(jnp.bfloat16), whh.astype(jnp.bfloat16), bias


# ------------------------------ model forward --------------------------------

def rnn_model_forward(x_btd, stacks):
    """x_btd: (B, T, input_size) batch-first, like the PyTorch module.

    Returns SiLU(concat(last-step outputs of the 1/2/4-layer LSTMs)): (B, 3*rnn_size).
    """
    # TODO(synk): nn.Dropout is identity in eval/inference mode; not applied.
    B, T, D = x_btd.shape
    H = stacks[0][0][1].shape[0]                    # W_hh^T is (H, 4H)
    layer_counts = tuple(len(s) for s in stacks)
    max_depth = max(layer_counts)

    Bp = ((B + 7) // 8) * 8                         # pad batch to full f32 sublanes
    x_tbd = jnp.transpose(x_btd, (1, 0, 2))                      # time-major (T, B, D)
    x_pad = jnp.pad(x_tbd, ((0, 0), (0, Bp - B), (0, 0)))        # (T, Bp, D)
    x_flat = x_pad.reshape(T * Bp, D).astype(jnp.bfloat16)       # MXU operand dtype

    depth_ns = []
    flat_w = []
    for d in range(max_depth):
        active = [k for k, nl in enumerate(layer_counts) if nl > d]
        depth_ns.append(len(active))
        flat_w.extend(_merge_depth_params(stacks, d, H))
    depth_ns = tuple(depth_ns)

    # (depth of top layer, column offset in that depth's merged hidden) per stack,
    # in output concat order rnn_1 | rnn_2 | rnn_3.
    finals_spec = []
    for k, nl in enumerate(layer_counts):
        d = nl - 1
        active = [kk for kk, c in enumerate(layer_counts) if c > d]
        finals_spec.append((d, active.index(k) * H))
    finals_spec = tuple(finals_spec)

    out_lanes = max(128, ((3 * H + 127) // 128) * 128)           # full-vreg epilogue store

    kernel = functools.partial(
        _rnn_wavefront_kernel, T=T, Bp=Bp, H=H,
        depth_ns=depth_ns, finals_spec=finals_spec, out_lanes=out_lanes)

    out_pad = pl.pallas_call(
        kernel,
        out_shape=jax.ShapeDtypeStruct((Bp, out_lanes), jnp.float32),
    )(x_flat, *flat_w)
    return out_pad[:B, :3 * H]


# ----------------------------------- main -------------------------------------

if __name__ == "__main__":
    B, T = 2, 8
    INPUT_SIZE, RNN_SIZE = 16, 32

    root = jax.random.PRNGKey(0)
    k_x, k1, k2, k3 = jax.random.split(root, 4)

    x = jax.random.normal(k_x, (B, T, INPUT_SIZE), jnp.float32)

    stacks = [
        init_lstm_stack(k1, num_layers=1, input_size=INPUT_SIZE, hidden=RNN_SIZE),
        init_lstm_stack(k2, num_layers=2, input_size=INPUT_SIZE, hidden=RNN_SIZE),
        init_lstm_stack(k3, num_layers=4, input_size=INPUT_SIZE, hidden=RNN_SIZE),
    ]

    out = jax.jit(rnn_model_forward)(x, stacks)
    out = jax.block_until_ready(out)

    assert out.shape == (B, 3 * RNN_SIZE), out.shape
    assert out.dtype == jnp.float32
    assert bool(jnp.all(jnp.isfinite(out)))

    print("KERNEL_OK")
</pallas_src>

<mosaic_0001>
module attributes {stable_mosaic.version = 11 : i64} {
  func.func @_rnn_wavefront_kernel(%arg0: memref<64x16xbf16, #tpu.memory_space<vmem>>, %arg1: memref<16x384xbf16, #tpu.memory_space<vmem>>, %arg2: memref<96x384xbf16, #tpu.memory_space<vmem>>, %arg3: memref<1x384xf32, #tpu.memory_space<vmem>>, %arg4: memref<96x256xbf16, #tpu.memory_space<vmem>>, %arg5: memref<64x256xbf16, #tpu.memory_space<vmem>>, %arg6: memref<1x256xf32, #tpu.memory_space<vmem>>, %arg7: memref<64x128xbf16, #tpu.memory_space<vmem>>, %arg8: memref<32x128xbf16, #tpu.memory_space<vmem>>, %arg9: memref<1x128xf32, #tpu.memory_space<vmem>>, %arg10: memref<32x128xbf16, #tpu.memory_space<vmem>>, %arg11: memref<32x128xbf16, #tpu.memory_space<vmem>>, %arg12: memref<1x128xf32, #tpu.memory_space<vmem>>, %arg13: memref<8x128xf32, #tpu.memory_space<vmem>>) attributes {dimension_semantics = [], scalar_prefetch = 0 : i64, scratch_operands = 0 : i64, tpu.core_type = #tpu.core_type<tc>} {
    %c0 = arith.constant 0 : index
    %c0_0 = arith.constant 0 : index
    %0 = vector.load %arg1[%c0, %c0_0] : memref<16x384xbf16, #tpu.memory_space<vmem>>, vector<16x384xbf16>
    %c0_1 = arith.constant 0 : index
    %c0_2 = arith.constant 0 : index
    %1 = vector.load %arg2[%c0_1, %c0_2] : memref<96x384xbf16, #tpu.memory_space<vmem>>, vector<96x384xbf16>
    %c0_3 = arith.constant 0 : index
    %c0_4 = arith.constant 0 : index
    %2 = vector.load %arg3[%c0_3, %c0_4] : memref<1x384xf32, #tpu.memory_space<vmem>>, vector<1x384xf32>
    %c0_5 = arith.constant 0 : index
    %c0_6 = arith.constant 0 : index
    %3 = vector.load %arg0[%c0_5, %c0_6] : memref<64x16xbf16, #tpu.memory_space<vmem>>, vector<64x16xbf16>
    %cst = arith.constant dense<0.000000e+00> : vector<64x384xf32>
    %4 = tpu.matmul %3, %0, %cst {dimension_numbers = #tpu.dot_dimension_numbers<[1], [0], [0], [1], [0, 0, 1, 1], [], []>} : vector<64x16xbf16>, vector<16x384xbf16>, vector<64x384xf32> -> vector<64x384xf32>
    %5 = vector.broadcast %2 : vector<1x384xf32> to vector<64x384xf32>
    %6 = arith.addf %4, %5 : vector<64x384xf32>
    %cst_7 = arith.constant 0.000000e+00 : f32
    %7 = vector.broadcast %cst_7 : f32 to vector<8x96xf32>
    %cst_8 = arith.constant 0.000000e+00 : f32
    %8 = vector.broadcast %cst_8 : f32 to vector<8x96xf32>
    %9 = vector.extract_strided_slice %6 {offsets = [0, 0], sizes = [8, 384], strides = [1, 1]} : vector<64x384xf32> to vector<8x384xf32>
    %10 = arith.truncf %7 : vector<8x96xf32> to vector<8x96xbf16>
    %cst_9 = arith.constant dense<0.000000e+00> : vector<8x384xf32>
    %11 = tpu.matmul %10, %1, %cst_9 {dimension_numbers = #tpu.dot_dimension_numbers<[1], [0], [0], [1], [0, 0, 1, 1], [], []>} : vector<8x96xbf16>, vector<96x384xbf16>, vector<8x384xf32> -> vector<8x384xf32>
    %12 = arith.addf %9, %11 : vector<8x384xf32>
    %13 = vector.extract_strided_slice %12 {offsets = [0, 0], sizes = [8, 96], strides = [1, 1]} : vector<8x384xf32> to vector<8x96xf32>
    %14 = math.tanh %13 : vector<8x96xf32>
    %15 = vector.extract_strided_slice %12 {offsets = [0, 96], sizes = [8, 288], strides = [1, 1]} : vector<8x384xf32> to vector<8x288xf32>
    %cst_10 = arith.constant 5.000000e-01 : f32
    %16 = vector.broadcast %cst_10 : f32 to vector<8x288xf32>
    %17 = arith.mulf %16, %15 : vector<8x288xf32>
    %18 = math.tanh %17 : vector<8x288xf32>
    %cst_11 = arith.constant 5.000000e-01 : f32
    %19 = vector.broadcast %cst_11 : f32 to vector<8x288xf32>
    %20 = arith.mulf %19, %18 : vector<8x288xf32>
    %cst_12 = arith.constant 5.000000e-01 : f32
    %21 = vector.broadcast %cst_12 : f32 to vector<8x288xf32>
    %22 = arith.addf %20, %21 : vector<8x288xf32>
    %23 = vector.extract_strided_slice %22 {offsets = [0, 0], sizes = [8, 96], strides = [1, 1]} : vector<8x288xf32> to vector<8x96xf32>
    %24 = vector.extract_strided_slice %22 {offsets = [0, 96], sizes = [8, 96], strides = [1, 1]} : vector<8x288xf32> to vector<8x96xf32>
    %25 = vector.extract_strided_slice %22 {offsets = [0, 192], sizes = [8, 96], strides = [1, 1]} : vector<8x288xf32> to vector<8x96xf32>
    %26 = arith.mulf %24, %8 : vector<8x96xf32>
    %27 = arith.mulf %23, %14 : vector<8x96xf32>
    %28 = arith.addf %26, %27 : vector<8x96xf32>
    %29 = math.tanh %28 : vector<8x96xf32>
    %30 = arith.mulf %25, %29 : vector<8x96xf32>
    %31 = vector.extract_strided_slice %6 {offsets = [8, 0], sizes = [8, 384], strides = [1, 1]} : vector<64x384xf32> to vector<8x384xf32>
    %32 = arith.truncf %30 : vector<8x96xf32> to vector<8x96xbf16>
    %cst_13 = arith.constant dense<0.000000e+00> : vector<8x384xf32>
    %33 = tpu.matmul %32, %1, %cst_13 {dimension_numbers = #tpu.dot_dimension_numbers<[1], [0], [0], [1], [0, 0, 1, 1], [], []>} : vector<8x96xbf16>, vector<96x384xbf16>, vector<8x384xf32> -> vector<8x384xf32>
    %34 = arith.addf %31, %33 : vector<8x384xf32>
    %35 = vector.extract_strided_slice %34 {offsets = [0, 0], sizes = [8, 96], strides = [1, 1]} : vector<8x384xf32> to vector<8x96xf32>
    %36 = math.tanh %35 : vector<8x96xf32>
    %37 = vector.extract_strided_slice %34 {offsets = [0, 96], sizes = [8, 288], strides = [1, 1]} : vector<8x384xf32> to vector<8x288xf32>
    %cst_14 = arith.constant 5.000000e-01 : f32
    %38 = vector.broadcast %cst_14 : f32 to vector<8x288xf32>
    %39 = arith.mulf %38, %37 : vector<8x288xf32>
    %40 = math.tanh %39 : vector<8x288xf32>
    %cst_15 = arith.constant 5.000000e-01 : f32
    %41 = vector.broadcast %cst_15 : f32 to vector<8x288xf32>
    %42 = arith.mulf %41, %40 : vector<8x288xf32>
    %cst_16 = arith.constant 5.000000e-01 : f32
    %43 = vector.broadcast %cst_16 : f32 to vector<8x288xf32>
    %44 = arith.addf %42, %43 : vector<8x288xf32>
    %45 = vector.extract_strided_slice %44 {offsets = [0, 0], sizes = [8, 96], strides = [1, 1]} : vector<8x288xf32> to vector<8x96xf32>
    %46 = vector.extract_strided_slice %44 {offsets = [0, 96], sizes = [8, 96], strides = [1, 1]} : vector<8x288xf32> to vector<8x96xf32>
    %47 = vector.extract_strided_slice %44 {offsets = [0, 192], sizes = [8, 96], strides = [1, 1]} : vector<8x288xf32> to vector<8x96xf32>
    %48 = arith.mulf %46, %28 : vector<8x96xf32>
    %49 = arith.mulf %45, %36 : vector<8x96xf32>
    %50 = arith.addf %48, %49 : vector<8x96xf32>
    %51 = math.tanh %50 : vector<8x96xf32>
    %52 = arith.mulf %47, %51 : vector<8x96xf32>
    %53 = vector.extract_strided_slice %6 {offsets = [16, 0], sizes = [8, 384], strides = [1, 1]} : vector<64x384xf32> to vector<8x384xf32>
    %54 = arith.truncf %52 : vector<8x96xf32> to vector<8x96xbf16>
    %cst_17 = arith.constant dense<0.000000e+00> : vector<8x384xf32>
    %55 = tpu.matmul %54, %1, %cst_17 {dimension_numbers = #tpu.dot_dimension_numbers<[1], [0], [0], [1], [0, 0, 1, 1], [], []>} : vector<8x96xbf16>, vector<96x384xbf16>, vector<8x384xf32> -> vector<8x384xf32>
    %56 = arith.addf %53, %55 : vector<8x384xf32>
    %57 = vector.extract_strided_slice %56 {offsets = [0, 0], sizes = [8, 96], strides = [1, 1]} : vector<8x384xf32> to vector<8x96xf32>
    %58 = math.tanh %57 : vector<8x96xf32>
    %59 = vector.extract_strided_slice %56 {offsets = [0, 96], sizes = [8, 288], strides = [1, 1]} : vector<8x384xf32> to vector<8x288xf32>
    %cst_18 = arith.constant 5.000000e-01 : f32
    %60 = vector.broadcast %cst_18 : f32 to vector<8x288xf32>
    %61 = arith.mulf %60, %59 : vector<8x288xf32>
    %62 = math.tanh %61 : vector<8x288xf32>
    %cst_19 = arith.constant 5.000000e-01 : f32
    %63 = vector.broadcast %cst_19 : f32 to vector<8x288xf32>
    %64 = arith.mulf %63, %62 : vector<8x288xf32>
    %cst_20 = arith.constant 5.000000e-01 : f32
    %65 = vector.broadcast %cst_20 : f32 to vector<8x288xf32>
    %66 = arith.addf %64, %65 : vector<8x288xf32>
    %67 = vector.extract_strided_slice %66 {offsets = [0, 0], sizes = [8, 96], strides = [1, 1]} : vector<8x288xf32> to vector<8x96xf32>
    %68 = vector.extract_strided_slice %66 {offsets = [0, 96], sizes = [8, 96], strides = [1, 1]} : vector<8x288xf32> to vector<8x96xf32>
    %69 = vector.extract_strided_slice %66 {offsets = [0, 192], sizes = [8, 96], strides = [1, 1]} : vector<8x288xf32> to vector<8x96xf32>
    %70 = arith.mulf %68, %50 : vector<8x96xf32>
    %71 = arith.mulf %67, %58 : vector<8x96xf32>
    %72 = arith.addf %70, %71 : vector<8x96xf32>
    %73 = math.tanh %72 : vector<8x96xf32>
    %74 = arith.mulf %69, %73 : vector<8x96xf32>
    %75 = vector.extract_strided_slice %6 {offsets = [24, 0], sizes = [8, 384], strides = [1, 1]} : vector<64x384xf32> to vector<8x384xf32>
    %76 = arith.truncf %74 : vector<8x96xf32> to vector<8x96xbf16>
    %cst_21 = arith.constant dense<0.000000e+00> : vector<8x384xf32>
    %77 = tpu.matmul %76, %1, %cst_21 {dimension_numbers = #tpu.dot_dimension_numbers<[1], [0], [0], [1], [0, 0, 1, 1], [], []>} : vector<8x96xbf16>, vector<96x384xbf16>, vector<8x384xf32> -> vector<8x384xf32>
    %78 = arith.addf %75, %77 : vector<8x384xf32>
    %79 = vector.extract_strided_slice %78 {offsets = [0, 0], sizes = [8, 96], strides = [1, 1]} : vector<8x384xf32> to vector<8x96xf32>
    %80 = math.tanh %79 : vector<8x96xf32>
    %81 = vector.extract_strided_slice %78 {offsets = [0, 96], sizes = [8, 288], strides = [1, 1]} : vector<8x384xf32> to vector<8x288xf32>
    %cst_22 = arith.constant 5.000000e-01 : f32
    %82 = vector.broadcast %cst_22 : f32 to vector<8x288xf32>
    %83 = arith.mulf %82, %81 : vector<8x288xf32>
    %84 = math.tanh %83 : vector<8x288xf32>
    %cst_23 = arith.constant 5.000000e-01 : f32
    %85 = vector.broadcast %cst_23 : f32 to vector<8x288xf32>
    %86 = arith.mulf %85, %84 : vector<8x288xf32>
    %cst_24 = arith.constant 5.000000e-01 : f32
    %87 = vector.broadcast %cst_24 : f32 to vector<8x288xf32>
    %88 = arith.addf %86, %87 : vector<8x288xf32>
    %89 = vector.extract_strided_slice %88 {offsets = [0, 0], sizes = [8, 96], strides = [1, 1]} : vector<8x288xf32> to vector<8x96xf32>
    %90 = vector.extract_strided_slice %88 {offsets = [0, 96], sizes = [8, 96], strides = [1, 1]} : vector<8x288xf32> to vector<8x96xf32>
    %91 = vector.extract_strided_slice %88 {offsets = [0, 192], sizes = [8, 96], strides = [1, 1]} : vector<8x288xf32> to vector<8x96xf32>
    %92 = arith.mulf %90, %72 : vector<8x96xf32>
    %93 = arith.mulf %89, %80 : vector<8x96xf32>
    %94 = arith.addf %92, %93 : vector<8x96xf32>
    %95 = math.tanh %94 : vector<8x96xf32>
    %96 = arith.mulf %91, %95 : vector<8x96xf32>
    %97 = vector.extract_strided_slice %6 {offsets = [32, 0], sizes = [8, 384], strides = [1, 1]} : vector<64x384xf32> to vector<8x384xf32>
    %98 = arith.truncf %96 : vector<8x96xf32> to vector<8x96xbf16>
    %cst_25 = arith.constant dense<0.000000e+00> : vector<8x384xf32>
    %99 = tpu.matmul %98, %1, %cst_25 {dimension_numbers = #tpu.dot_dimension_numbers<[1], [0], [0], [1], [0, 0, 1, 1], [], []>} : vector<8x96xbf16>, vector<96x384xbf16>, vector<8x384xf32> -> vector<8x384xf32>
    %100 = arith.addf %97, %99 : vector<8x384xf32>
    %101 = vector.extract_strided_slice %100 {offsets = [0, 0], sizes = [8, 96], strides = [1, 1]} : vector<8x384xf32> to vector<8x96xf32>
    %102 = math.tanh %101 : vector<8x96xf32>
    %103 = vector.extract_strided_slice %100 {offsets = [0, 96], sizes = [8, 288], strides = [1, 1]} : vector<8x384xf32> to vector<8x288xf32>
    %cst_26 = arith.constant 5.000000e-01 : f32
    %104 = vector.broadcast %cst_26 : f32 to vector<8x288xf32>
    %105 = arith.mulf %104, %103 : vector<8x288xf32>
    %106 = math.tanh %105 : vector<8x288xf32>
    %cst_27 = arith.constant 5.000000e-01 : f32
    %107 = vector.broadcast %cst_27 : f32 to vector<8x288xf32>
    %108 = arith.mulf %107, %106 : vector<8x288xf32>
    %cst_28 = arith.constant 5.000000e-01 : f32
    %109 = vector.broadcast %cst_28 : f32 to vector<8x288xf32>
    %110 = arith.addf %108, %109 : vector<8x288xf32>
    %111 = vector.extract_strided_slice %110 {offsets = [0, 0], sizes = [8, 96], strides = [1, 1]} : vector<8x288xf32> to vector<8x96xf32>
    %112 = vector.extract_strided_slice %110 {offsets = [0, 96], sizes = [8, 96], strides = [1, 1]} : vector<8x288xf32> to vector<8x96xf32>
    %113 = vector.extract_strided_slice %110 {offsets = [0, 192], sizes = [8, 96], strides = [1, 1]} : vector<8x288xf32> to vector<8x96xf32>
    %114 = arith.mulf %112, %94 : vector<8x96xf32>
    %115 = arith.mulf %111, %102 : vector<8x96xf32>
    %116 = arith.addf %114, %115 : vector<8x96xf32>
    %117 = math.tanh %116 : vector<8x96xf32>
    %118 = arith.mulf %113, %117 : vector<8x96xf32>
    %119 = vector.extract_strided_slice %6 {offsets = [40, 0], sizes = [8, 384], strides = [1, 1]} : vector<64x384xf32> to vector<8x384xf32>
    %120 = arith.truncf %118 : vector<8x96xf32> to vector<8x96xbf16>
    %cst_29 = arith.constant dense<0.000000e+00> : vector<8x384xf32>
    %121 = tpu.matmul %120, %1, %cst_29 {dimension_numbers = #tpu.dot_dimension_numbers<[1], [0], [0], [1], [0, 0, 1, 1], [], []>} : vector<8x96xbf16>, vector<96x384xbf16>, vector<8x384xf32> -> vector<8x384xf32>
    %122 = arith.addf %119, %121 : vector<8x384xf32>
    %123 = vector.extract_strided_slice %122 {offsets = [0, 0], sizes = [8, 96], strides = [1, 1]} : vector<8x384xf32> to vector<8x96xf32>
    %124 = math.tanh %123 : vector<8x96xf32>
    %125 = vector.extract_strided_slice %122 {offsets = [0, 96], sizes = [8, 288], strides = [1, 1]} : vector<8x384xf32> to vector<8x288xf32>
    %cst_30 = arith.constant 5.000000e-01 : f32
    %126 = vector.broadcast %cst_30 : f32 to vector<8x288xf32>
    %127 = arith.mulf %126, %125 : vector<8x288xf32>
    %128 = math.tanh %127 : vector<8x288xf32>
    %cst_31 = arith.constant 5.000000e-01 : f32
    %129 = vector.broadcast %cst_31 : f32 to vector<8x288xf32>
    %130 = arith.mulf %129, %128 : vector<8x288xf32>
    %cst_32 = arith.constant 5.000000e-01 : f32
    %131 = vector.broadcast %cst_32 : f32 to vector<8x288xf32>
    %132 = arith.addf %130, %131 : vector<8x288xf32>
    %133 = vector.extract_strided_slice %132 {offsets = [0, 0], sizes = [8, 96], strides = [1, 1]} : vector<8x288xf32> to vector<8x96xf32>
    %134 = vector.extract_strided_slice %132 {offsets = [0, 96], sizes = [8, 96], strides = [1, 1]} : vector<8x288xf32> to vector<8x96xf32>
    %135 = vector.extract_strided_slice %132 {offsets = [0, 192], sizes = [8, 96], strides = [1, 1]} : vector<8x288xf32> to vector<8x96xf32>
    %136 = arith.mulf %134, %116 : vector<8x96xf32>
    %137 = arith.mulf %133, %124 : vector<8x96xf32>
    %138 = arith.addf %136, %137 : vector<8x96xf32>
    %139 = math.tanh %138 : vector<8x96xf32>
    %140 = arith.mulf %135, %139 : vector<8x96xf32>
    %141 = vector.extract_strided_slice %6 {offsets = [48, 0], sizes = [8, 384], strides = [1, 1]} : vector<64x384xf32> to vector<8x384xf32>
    %142 = arith.truncf %140 : vector<8x96xf32> to vector<8x96xbf16>
    %cst_33 = arith.constant dense<0.000000e+00> : vector<8x384xf32>
    %143 = tpu.matmul %142, %1, %cst_33 {dimension_numbers = #tpu.dot_dimension_numbers<[1], [0], [0], [1], [0, 0, 1, 1], [], []>} : vector<8x96xbf16>, vector<96x384xbf16>, vector<8x384xf32> -> vector<8x384xf32>
    %144 = arith.addf %141, %143 : vector<8x384xf32>
    %145 = vector.extract_strided_slice %144 {offsets = [0, 0], sizes = [8, 96], strides = [1, 1]} : vector<8x384xf32> to vector<8x96xf32>
    %146 = math.tanh %145 : vector<8x96xf32>
    %147 = vector.extract_strided_slice %144 {offsets = [0, 96], sizes = [8, 288], strides = [1, 1]} : vector<8x384xf32> to vector<8x288xf32>
    %cst_34 = arith.constant 5.000000e-01 : f32
    %148 = vector.broadcast %cst_34 : f32 to vector<8x288xf32>
    %149 = arith.mulf %148, %147 : vector<8x288xf32>
    %150 = math.tanh %149 : vector<8x288xf32>
    %cst_35 = arith.constant 5.000000e-01 : f32
    %151 = vector.broadcast %cst_35 : f32 to vector<8x288xf32>
    %152 = arith.mulf %151, %150 : vector<8x288xf32>
    %cst_36 = arith.constant 5.000000e-01 : f32
    %153 = vector.broadcast %cst_36 : f32 to vector<8x288xf32>
    %154 = arith.addf %152, %153 : vector<8x288xf32>
    %155 = vector.extract_strided_slice %154 {offsets = [0, 0], sizes = [8, 96], strides = [1, 1]} : vector<8x288xf32> to vector<8x96xf32>
    %156 = vector.extract_strided_slice %154 {offsets = [0, 96], sizes = [8, 96], strides = [1, 1]} : vector<8x288xf32> to vector<8x96xf32>
    %157 = vector.extract_strided_slice %154 {offsets = [0, 192], sizes = [8, 96], strides = [1, 1]} : vector<8x288xf32> to vector<8x96xf32>
    %158 = arith.mulf %156, %138 : vector<8x96xf32>
    %159 = arith.mulf %155, %146 : vector<8x96xf32>
    %160 = arith.addf %158, %159 : vector<8x96xf32>
    %161 = math.tanh %160 : vector<8x96xf32>
    %162 = arith.mulf %157, %161 : vector<8x96xf32>
    %163 = vector.extract_strided_slice %6 {offsets = [56, 0], sizes = [8, 384], strides = [1, 1]} : vector<64x384xf32> to vector<8x384xf32>
    %164 = arith.truncf %162 : vector<8x96xf32> to vector<8x96xbf16>
    %cst_37 = arith.constant dense<0.000000e+00> : vector<8x384xf32>
    %165 = tpu.matmul %164, %1, %cst_37 {dimension_numbers = #tpu.dot_dimension_numbers<[1], [0], [0], [1], [0, 0, 1, 1], [], []>} : vector<8x96xbf16>, vector<96x384xbf16>, vector<8x384xf32> -> vector<8x384xf32>
    %166 = arith.addf %163, %165 : vector<8x384xf32>
    %167 = vector.extract_strided_slice %166 {offsets = [0, 0], sizes = [8, 96], strides = [1, 1]} : vector<8x384xf32> to vector<8x96xf32>
    %168 = math.tanh %167 : vector<8x96xf32>
    %169 = vector.extract_strided_slice %166 {offsets = [0, 96], sizes = [8, 288], strides = [1, 1]} : vector<8x384xf32> to vector<8x288xf32>
    %cst_38 = arith.constant 5.000000e-01 : f32
    %170 = vector.broadcast %cst_38 : f32 to vector<8x288xf32>
    %171 = arith.mulf %170, %169 : vector<8x288xf32>
    %172 = math.tanh %171 : vector<8x288xf32>
    %cst_39 = arith.constant 5.000000e-01 : f32
    %173 = vector.broadcast %cst_39 : f32 to vector<8x288xf32>
    %174 = arith.mulf %173, %172 : vector<8x288xf32>
    %cst_40 = arith.constant 5.000000e-01 : f32
    %175 = vector.broadcast %cst_40 : f32 to vector<8x288xf32>
    %176 = arith.addf %174, %175 : vector<8x288xf32>
    %177 = vector.extract_strided_slice %176 {offsets = [0, 0], sizes = [8, 96], strides = [1, 1]} : vector<8x288xf32> to vector<8x96xf32>
    %178 = vector.extract_strided_slice %176 {offsets = [0, 96], sizes = [8, 96], strides = [1, 1]} : vector<8x288xf32> to vector<8x96xf32>
    %179 = vector.extract_strided_slice %176 {offsets = [0, 192], sizes = [8, 96], strides = [1, 1]} : vector<8x288xf32> to vector<8x96xf32>
    %180 = arith.mulf %178, %160 : vector<8x96xf32>
    %181 = arith.mulf %177, %168 : vector<8x96xf32>
    %182 = arith.addf %180, %181 : vector<8x96xf32>
    %183 = math.tanh %182 : vector<8x96xf32>
    %184 = arith.mulf %179, %183 : vector<8x96xf32>
    %c0_41 = arith.constant 0 : index
    %c0_42 = arith.constant 0 : index
    %185 = vector.load %arg4[%c0_41, %c0_42] : memref<96x256xbf16, #tpu.memory_space<vmem>>, vector<96x256xbf16>
    %c0_43 = arith.constant 0 : index
    %c0_44 = arith.constant 0 : index
    %186 = vector.load %arg5[%c0_43, %c0_44] : memref<64x256xbf16, #tpu.memory_space<vmem>>, vector<64x256xbf16>
    %c0_45 = arith.constant 0 : index
    %c0_46 = arith.constant 0 : index
    %187 = vector.load %arg6[%c0_45, %c0_46] : memref<1x256xf32, #tpu.memory_space<vmem>>, vector<1x256xf32>
    %188 = tpu.concatenate %30, %52, %74, %96, %118, %140, %162, %184 in 0 : vector<8x96xf32>, vector<8x96xf32>, vector<8x96xf32>, vector<8x96xf32>, vector<8x96xf32>, vector<8x96xf32>, vector<8x96xf32>, vector<8x96xf32> -> vector<64x96xf32>
    %189 = arith.truncf %188 : vector<64x96xf32> to vector<64x96xbf16>
    %cst_47 = arith.constant dense<0.000000e+00> : vector<64x256xf32>
    %190 = tpu.matmul %189, %185, %cst_47 {dimension_numbers = #tpu.dot_dimension_numbers<[1], [0], [0], [1], [0, 0, 1, 1], [], []>} : vector<64x96xbf16>, vector<96x256xbf16>, vector<64x256xf32> -> vector<64x256xf32>
    %191 = vector.broadcast %187 : vector<1x256xf32> to vector<64x256xf32>
    %192 = arith.addf %190, %191 : vector<64x256xf32>
    %cst_48 = arith.constant 0.000000e+00 : f32
    %193 = vector.broadcast %cst_48 : f32 to vector<8x64xf32>
    %cst_49 = arith.constant 0.000000e+00 : f32
    %194 = vector.broadcast %cst_49 : f32 to vector<8x64xf32>
    %195 = vector.extract_strided_slice %192 {offsets = [0, 0], sizes = [8, 256], strides = [1, 1]} : vector<64x256xf32> to vector<8x256xf32>
    %196 = arith.truncf %193 : vector<8x64xf32> to vector<8x64xbf16>
    %cst_50 = arith.constant dense<0.000000e+00> : vector<8x256xf32>
    %197 = tpu.matmul %196, %186, %cst_50 {dimension_numbers = #tpu.dot_dimension_numbers<[1], [0], [0], [1], [0, 0, 1, 1], [], []>} : vector<8x64xbf16>, vector<64x256xbf16>, vector<8x256xf32> -> vector<8x256xf32>
    %198 = arith.addf %195, %197 : vector<8x256xf32>
    %199 = vector.extract_strided_slice %198 {offsets = [0, 0], sizes = [8, 64], strides = [1, 1]} : vector<8x256xf32> to vector<8x64xf32>
    %200 = math.tanh %199 : vector<8x64xf32>
    %201 = vector.extract_strided_slice %198 {offsets = [0, 64], sizes = [8, 192], strides = [1, 1]} : vector<8x256xf32> to vector<8x192xf32>
    %cst_51 = arith.constant 5.000000e-01 : f32
    %202 = vector.broadcast %cst_51 : f32 to vector<8x192xf32>
    %203 = arith.mulf %202, %201 : vector<8x192xf32>
    %204 = math.tanh %203 : vector<8x192xf32>
    %cst_52 = arith.constant 5.000000e-01 : f32
    %205 = vector.broadcast %cst_52 : f32 to vector<8x192xf32>
    %206 = arith.mulf %205, %204 : vector<8x192xf32>
    %cst_53 = arith.constant 5.000000e-01 : f32
    %207 = vector.broadcast %cst_53 : f32 to vector<8x192xf32>
    %208 = arith.addf %206, %207 : vector<8x192xf32>
    %209 = vector.extract_strided_slice %208 {offsets = [0, 0], sizes = [8, 64], strides = [1, 1]} : vector<8x192xf32> to vector<8x64xf32>
    %210 = vector.extract_strided_slice %208 {offsets = [0, 64], sizes = [8, 64], strides = [1, 1]} : vector<8x192xf32> to vector<8x64xf32>
    %211 = vector.extract_strided_slice %208 {offsets = [0, 128], sizes = [8, 64], strides = [1, 1]} : vector<8x192xf32> to vector<8x64xf32>
    %212 = arith.mulf %210, %194 : vector<8x64xf32>
    %213 = arith.mulf %209, %200 : vector<8x64xf32>
    %214 = arith.addf %212, %213 : vector<8x64xf32>
    %215 = math.tanh %214 : vector<8x64xf32>
    %216 = arith.mulf %211, %215 : vector<8x64xf32>
    %217 = vector.extract_strided_slice %192 {offsets = [8, 0], sizes = [8, 256], strides = [1, 1]} : vector<64x256xf32> to vector<8x256xf32>
    %218 = arith.truncf %216 : vector<8x64xf32> to vector<8x64xbf16>
    %cst_54 = arith.constant dense<0.000000e+00> : vector<8x256xf32>
    %219 = tpu.matmul %218, %186, %cst_54 {dimension_numbers = #tpu.dot_dimension_numbers<[1], [0], [0], [1], [0, 0, 1, 1], [], []>} : vector<8x64xbf16>, vector<64x256xbf16>, vector<8x256xf32> -> vector<8x256xf32>
    %220 = arith.addf %217, %219 : vector<8x256xf32>
    %221 = vector.extract_strided_slice %220 {offsets = [0, 0], sizes = [8, 64], strides = [1, 1]} : vector<8x256xf32> to vector<8x64xf32>
    %222 = math.tanh %221 : vector<8x64xf32>
    %223 = vector.extract_strided_slice %220 {offsets = [0, 64], sizes = [8, 192], strides = [1, 1]} : vector<8x256xf32> to vector<8x192xf32>
    %cst_55 = arith.constant 5.000000e-01 : f32
    %224 = vector.broadcast %cst_55 : f32 to vector<8x192xf32>
    %225 = arith.mulf %224, %223 : vector<8x192xf32>
    %226 = math.tanh %225 : vector<8x192xf32>
    %cst_56 = arith.constant 5.000000e-01 : f32
    %227 = vector.broadcast %cst_56 : f32 to vector<8x192xf32>
    %228 = arith.mulf %227, %226 : vector<8x192xf32>
    %cst_57 = arith.constant 5.000000e-01 : f32
    %229 = vector.broadcast %cst_57 : f32 to vector<8x192xf32>
    %230 = arith.addf %228, %229 : vector<8x192xf32>
    %231 = vector.extract_strided_slice %230 {offsets = [0, 0], sizes = [8, 64], strides = [1, 1]} : vector<8x192xf32> to vector<8x64xf32>
    %232 = vector.extract_strided_slice %230 {offsets = [0, 64], sizes = [8, 64], strides = [1, 1]} : vector<8x192xf32> to vector<8x64xf32>
    %233 = vector.extract_strided_slice %230 {offsets = [0, 128], sizes = [8, 64], strides = [1, 1]} : vector<8x192xf32> to vector<8x64xf32>
    %234 = arith.mulf %232, %214 : vector<8x64xf32>
    %235 = arith.mulf %231, %222 : vector<8x64xf32>
    %236 = arith.addf %234, %235 : vector<8x64xf32>
    %237 = math.tanh %236 : vector<8x64xf32>
    %238 = arith.mulf %233, %237 : vector<8x64xf32>
    %239 = vector.extract_strided_slice %192 {offsets = [16, 0], sizes = [8, 256], strides = [1, 1]} : vector<64x256xf32> to vector<8x256xf32>
    %240 = arith.truncf %238 : vector<8x64xf32> to vector<8x64xbf16>
    %cst_58 = arith.constant dense<0.000000e+00> : vector<8x256xf32>
    %241 = tpu.matmul %240, %186, %cst_58 {dimension_numbers = #tpu.dot_dimension_numbers<[1], [0], [0], [1], [0, 0, 1, 1], [], []>} : vector<8x64xbf16>, vector<64x256xbf16>, vector<8x256xf32> -> vector<8x256xf32>
    %242 = arith.addf %239, %241 : vector<8x256xf32>
    %243 = vector.extract_strided_slice %242 {offsets = [0, 0], sizes = [8, 64], strides = [1, 1]} : vector<8x256xf32> to vector<8x64xf32>
    %244 = math.tanh %243 : vector<8x64xf32>
    %245 = vector.extract_strided_slice %242 {offsets = [0, 64], sizes = [8, 192], strides = [1, 1]} : vector<8x256xf32> to vector<8x192xf32>
    %cst_59 = arith.constant 5.000000e-01 : f32
    %246 = vector.broadcast %cst_59 : f32 to vector<8x192xf32>
    %247 = arith.mulf %246, %245 : vector<8x192xf32>
    %248 = math.tanh %247 : vector<8x192xf32>
    %cst_60 = arith.constant 5.000000e-01 : f32
    %249 = vector.broadcast %cst_60 : f32 to vector<8x192xf32>
    %250 = arith.mulf %249, %248 : vector<8x192xf32>
    %cst_61 = arith.constant 5.000000e-01 : f32
    %251 = vector.broadcast %cst_61 : f32 to vector<8x192xf32>
    %252 = arith.addf %250, %251 : vector<8x192xf32>
    %253 = vector.extract_strided_slice %252 {offsets = [0, 0], sizes = [8, 64], strides = [1, 1]} : vector<8x192xf32> to vector<8x64xf32>
    %254 = vector.extract_strided_slice %252 {offsets = [0, 64], sizes = [8, 64], strides = [1, 1]} : vector<8x192xf32> to vector<8x64xf32>
    %255 = vector.extract_strided_slice %252 {offsets = [0, 128], sizes = [8, 64], strides = [1, 1]} : vector<8x192xf32> to vector<8x64xf32>
    %256 = arith.mulf %254, %236 : vector<8x64xf32>
    %257 = arith.mulf %253, %244 : vector<8x64xf32>
    %258 = arith.addf %256, %257 : vector<8x64xf32>
    %259 = math.tanh %258 : vector<8x64xf32>
    %260 = arith.mulf %255, %259 : vector<8x64xf32>
    %261 = vector.extract_strided_slice %192 {offsets = [24, 0], sizes = [8, 256], strides = [1, 1]} : vector<64x256xf32> to vector<8x256xf32>
    %262 = arith.truncf %260 : vector<8x64xf32> to vector<8x64xbf16>
    %cst_62 = arith.constant dense<0.000000e+00> : vector<8x256xf32>
    %263 = tpu.matmul %262, %186, %cst_62 {dimension_numbers = #tpu.dot_dimension_numbers<[1], [0], [0], [1], [0, 0, 1, 1], [], []>} : vector<8x64xbf16>, vector<64x256xbf16>, vector<8x256xf32> -> vector<8x256xf32>
    %264 = arith.addf %261, %263 : vector<8x256xf32>
    %265 = vector.extract_strided_slice %264 {offsets = [0, 0], sizes = [8, 64], strides = [1, 1]} : vector<8x256xf32> to vector<8x64xf32>
    %266 = math.tanh %265 : vector<8x64xf32>
    %267 = vector.extract_strided_slice %264 {offsets = [0, 64], sizes = [8, 192], strides = [1, 1]} : vector<8x256xf32> to vector<8x192xf32>
    %cst_63 = arith.constant 5.000000e-01 : f32
    %268 = vector.broadcast %cst_63 : f32 to vector<8x192xf32>
    %269 = arith.mulf %268, %267 : vector<8x192xf32>
    %270 = math.tanh %269 : vector<8x192xf32>
    %cst_64 = arith.constant 5.000000e-01 : f32
    %271 = vector.broadcast %cst_64 : f32 to vector<8x192xf32>
    %272 = arith.mulf %271, %270 : vector<8x192xf32>
    %cst_65 = arith.constant 5.000000e-01 : f32
    %273 = vector.broadcast %cst_65 : f32 to vector<8x192xf32>
    %274 = arith.addf %272, %273 : vector<8x192xf32>
    %275 = vector.extract_strided_slice %274 {offsets = [0, 0], sizes = [8, 64], strides = [1, 1]} : vector<8x192xf32> to vector<8x64xf32>
    %276 = vector.extract_strided_slice %274 {offsets = [0, 64], sizes = [8, 64], strides = [1, 1]} : vector<8x192xf32> to vector<8x64xf32>
    %277 = vector.extract_strided_slice %274 {offsets = [0, 128], sizes = [8, 64], strides = [1, 1]} : vector<8x192xf32> to vector<8x64xf32>
    %278 = arith.mulf %276, %258 : vector<8x64xf32>
    %279 = arith.mulf %275, %266 : vector<8x64xf32>
    %280 = arith.addf %278, %279 : vector<8x64xf32>
    %281 = math.tanh %280 : vector<8x64xf32>
    %282 = arith.mulf %277, %281 : vector<8x64xf32>
    %283 = vector.extract_strided_slice %192 {offsets = [32, 0], sizes = [8, 256], strides = [1, 1]} : vector<64x256xf32> to vector<8x256xf32>
    %284 = arith.truncf %282 : vector<8x64xf32> to vector<8x64xbf16>
    %cst_66 = arith.constant dense<0.000000e+00> : vector<8x256xf32>
    %285 = tpu.matmul %284, %186, %cst_66 {dimension_numbers = #tpu.dot_dimension_numbers<[1], [0], [0], [1], [0, 0, 1, 1], [], []>} : vector<8x64xbf16>, vector<64x256xbf16>, vector<8x256xf32> -> vector<8x256xf32>
    %286 = arith.addf %283, %285 : vector<8x256xf32>
    %287 = vector.extract_strided_slice %286 {offsets = [0, 0], sizes = [8, 64], strides = [1, 1]} : vector<8x256xf32> to vector<8x64xf32>
    %288 = math.tanh %287 : vector<8x64xf32>
    %289 = vector.extract_strided_slice %286 {offsets = [0, 64], sizes = [8, 192], strides = [1, 1]} : vector<8x256xf32> to vector<8x192xf32>
    %cst_67 = arith.constant 5.000000e-01 : f32
    %290 = vector.broadcast %cst_67 : f32 to vector<8x192xf32>
    %291 = arith.mulf %290, %289 : vector<8x192xf32>
    %292 = math.tanh %291 : vector<8x192xf32>
    %cst_68 = arith.constant 5.000000e-01 : f32
    %293 = vector.broadcast %cst_68 : f32 to vector<8x192xf32>
    %294 = arith.mulf %293, %292 : vector<8x192xf32>
    %cst_69 = arith.constant 5.000000e-01 : f32
    %295 = vector.broadcast %cst_69 : f32 to vector<8x192xf32>
    %296 = arith.addf %294, %295 : vector<8x192xf32>
    %297 = vector.extract_strided_slice %296 {offsets = [0, 0], sizes = [8, 64], strides = [1, 1]} : vector<8x192xf32> to vector<8x64xf32>
    %298 = vector.extract_strided_slice %296 {offsets = [0, 64], sizes = [8, 64], strides = [1, 1]} : vector<8x192xf32> to vector<8x64xf32>
    %299 = vector.extract_strided_slice %296 {offsets = [0, 128], sizes = [8, 64], strides = [1, 1]} : vector<8x192xf32> to vector<8x64xf32>
    %300 = arith.mulf %298, %280 : vector<8x64xf32>
    %301 = arith.mulf %297, %288 : vector<8x64xf32>
    %302 = arith.addf %300, %301 : vector<8x64xf32>
    %303 = math.tanh %302 : vector<8x64xf32>
    %304 = arith.mulf %299, %303 : vector<8x64xf32>
    %305 = vector.extract_strided_slice %192 {offsets = [40, 0], sizes = [8, 256], strides = [1, 1]} : vector<64x256xf32> to vector<8x256xf32>
    %306 = arith.truncf %304 : vector<8x64xf32> to vector<8x64xbf16>
    %cst_70 = arith.constant dense<0.000000e+00> : vector<8x256xf32>
    %307 = tpu.matmul %306, %186, %cst_70 {dimension_numbers = #tpu.dot_dimension_numbers<[1], [0], [0], [1], [0, 0, 1, 1], [], []>} : vector<8x64xbf16>, vector<64x256xbf16>, vector<8x256xf32> -> vector<8x256xf32>
    %308 = arith.addf %305, %307 : vector<8x256xf32>
    %309 = vector.extract_strided_slice %308 {offsets = [0, 0], sizes = [8, 64], strides = [1, 1]} : vector<8x256xf32> to vector<8x64xf32>
    %310 = math.tanh %309 : vector<8x64xf32>
    %311 = vector.extract_strided_slice %308 {offsets = [0, 64], sizes = [8, 192], strides = [1, 1]} : vector<8x256xf32> to vector<8x192xf32>
    %cst_71 = arith.constant 5.000000e-01 : f32
    %312 = vector.broadcast %cst_71 : f32 to vector<8x192xf32>
    %313 = arith.mulf %312, %311 : vector<8x192xf32>
    %314 = math.tanh %313 : vector<8x192xf32>
    %cst_72 = arith.constant 5.000000e-01 : f32
    %315 = vector.broadcast %cst_72 : f32 to vector<8x192xf32>
    %316 = arith.mulf %315, %314 : vector<8x192xf32>
    %cst_73 = arith.constant 5.000000e-01 : f32
    %317 = vector.broadcast %cst_73 : f32 to vector<8x192xf32>
    %318 = arith.addf %316, %317 : vector<8x192xf32>
    %319 = vector.extract_strided_slice %318 {offsets = [0, 0], sizes = [8, 64], strides = [1, 1]} : vector<8x192xf32> to vector<8x64xf32>
    %320 = vector.extract_strided_slice %318 {offsets = [0, 64], sizes = [8, 64], strides = [1, 1]} : vector<8x192xf32> to vector<8x64xf32>
    %321 = vector.extract_strided_slice %318 {offsets = [0, 128], sizes = [8, 64], strides = [1, 1]} : vector<8x192xf32> to vector<8x64xf32>
    %322 = arith.mulf %320, %302 : vector<8x64xf32>
    %323 = arith.mulf %319, %310 : vector<8x64xf32>
    %324 = arith.addf %322, %323 : vector<8x64xf32>
    %325 = math.tanh %324 : vector<8x64xf32>
    %326 = arith.mulf %321, %325 : vector<8x64xf32>
    %327 = vector.extract_strided_slice %192 {offsets = [48, 0], sizes = [8, 256], strides = [1, 1]} : vector<64x256xf32> to vector<8x256xf32>
    %328 = arith.truncf %326 : vector<8x64xf32> to vector<8x64xbf16>
    %cst_74 = arith.constant dense<0.000000e+00> : vector<8x256xf32>
    %329 = tpu.matmul %328, %186, %cst_74 {dimension_numbers = #tpu.dot_dimension_numbers<[1], [0], [0], [1], [0, 0, 1, 1], [], []>} : vector<8x64xbf16>, vector<64x256xbf16>, vector<8x256xf32> -> vector<8x256xf32>
    %330 = arith.addf %327, %329 : vector<8x256xf32>
    %331 = vector.extract_strided_slice %330 {offsets = [0, 0], sizes = [8, 64], strides = [1, 1]} : vector<8x256xf32> to vector<8x64xf32>
    %332 = math.tanh %331 : vector<8x64xf32>
    %333 = vector.extract_strided_slice %330 {offsets = [0, 64], sizes = [8, 192], strides = [1, 1]} : vector<8x256xf32> to vector<8x192xf32>
    %cst_75 = arith.constant 5.000000e-01 : f32
    %334 = vector.broadcast %cst_75 : f32 to vector<8x192xf32>
    %335 = arith.mulf %334, %333 : vector<8x192xf32>
    %336 = math.tanh %335 : vector<8x192xf32>
    %cst_76 = arith.constant 5.000000e-01 : f32
    %337 = vector.broadcast %cst_76 : f32 to vector<8x192xf32>
    %338 = arith.mulf %337, %336 : vector<8x192xf32>
    %cst_77 = arith.constant 5.000000e-01 : f32
    %339 = vector.broadcast %cst_77 : f32 to vector<8x192xf32>
    %340 = arith.addf %338, %339 : vector<8x192xf32>
    %341 = vector.extract_strided_slice %340 {offsets = [0, 0], sizes = [8, 64], strides = [1, 1]} : vector<8x192xf32> to vector<8x64xf32>
    %342 = vector.extract_strided_slice %340 {offsets = [0, 64], sizes = [8, 64], strides = [1, 1]} : vector<8x192xf32> to vector<8x64xf32>
    %343 = vector.extract_strided_slice %340 {offsets = [0, 128], sizes = [8, 64], strides = [1, 1]} : vector<8x192xf32> to vector<8x64xf32>
    %344 = arith.mulf %342, %324 : vector<8x64xf32>
    %345 = arith.mulf %341, %332 : vector<8x64xf32>
    %346 = arith.addf %344, %345 : vector<8x64xf32>
    %347 = math.tanh %346 : vector<8x64xf32>
    %348 = arith.mulf %343, %347 : vector<8x64xf32>
    %349 = vector.extract_strided_slice %192 {offsets = [56, 0], sizes = [8, 256], strides = [1, 1]} : vector<64x256xf32> to vector<8x256xf32>
    %350 = arith.truncf %348 : vector<8x64xf32> to vector<8x64xbf16>
    %cst_78 = arith.constant dense<0.000000e+00> : vector<8x256xf32>
    %351 = tpu.matmul %350, %186, %cst_78 {dimension_numbers = #tpu.dot_dimension_numbers<[1], [0], [0], [1], [0, 0, 1, 1], [], []>} : vector<8x64xbf16>, vector<64x256xbf16>, vector<8x256xf32> -> vector<8x256xf32>
    %352 = arith.addf %349, %351 : vector<8x256xf32>
    %353 = vector.extract_strided_slice %352 {offsets = [0, 0], sizes = [8, 64], strides = [1, 1]} : vector<8x256xf32> to vector<8x64xf32>
    %354 = math.tanh %353 : vector<8x64xf32>
    %355 = vector.extract_strided_slice %352 {offsets = [0, 64], sizes = [8, 192], strides = [1, 1]} : vector<8x256xf32> to vector<8x192xf32>
    %cst_79 = arith.constant 5.000000e-01 : f32
    %356 = vector.broadcast %cst_79 : f32 to vector<8x192xf32>
    %357 = arith.mulf %356, %355 : vector<8x192xf32>
    %358 = math.tanh %357 : vector<8x192xf32>
    %cst_80 = arith.constant 5.000000e-01 : f32
    %359 = vector.broadcast %cst_80 : f32 to vector<8x192xf32>
    %360 = arith.mulf %359, %358 : vector<8x192xf32>
    %cst_81 = arith.constant 5.000000e-01 : f32
    %361 = vector.broadcast %cst_81 : f32 to vector<8x192xf32>
    %362 = arith.addf %360, %361 : vector<8x192xf32>
    %363 = vector.extract_strided_slice %362 {offsets = [0, 0], sizes = [8, 64], strides = [1, 1]} : vector<8x192xf32> to vector<8x64xf32>
    %364 = vector.extract_strided_slice %362 {offsets = [0, 64], sizes = [8, 64], strides = [1, 1]} : vector<8x192xf32> to vector<8x64xf32>
    %365 = vector.extract_strided_slice %362 {offsets = [0, 128], sizes = [8, 64], strides = [1, 1]} : vector<8x192xf32> to vector<8x64xf32>
    %366 = arith.mulf %364, %346 : vector<8x64xf32>
    %367 = arith.mulf %363, %354 : vector<8x64xf32>
    %368 = arith.addf %366, %367 : vector<8x64xf32>
    %369 = math.tanh %368 : vector<8x64xf32>
    %370 = arith.mulf %365, %369 : vector<8x64xf32>
    %c0_82 = arith.constant 0 : index
    %c0_83 = arith.constant 0 : index
    %371 = vector.load %arg7[%c0_82, %c0_83] : memref<64x128xbf16, #tpu.memory_space<vmem>>, vector<64x128xbf16>
    %c0_84 = arith.constant 0 : index
    %c0_85 = arith.constant 0 : index
    %372 = vector.load %arg8[%c0_84, %c0_85] : memref<32x128xbf16, #tpu.memory_space<vmem>>, vector<32x128xbf16>
    %c0_86 = arith.constant 0 : index
    %c0_87 = arith.constant 0 : index
    %373 = vector.load %arg9[%c0_86, %c0_87] : memref<1x128xf32, #tpu.memory_space<vmem>>, vector<1x128xf32>
    %374 = tpu.concatenate %216, %238, %260, %282, %304, %326, %348, %370 in 0 : vector<8x64xf32>, vector<8x64xf32>, vector<8x64xf32>, vector<8x64xf32>, vector<8x64xf32>, vector<8x64xf32>, vector<8x64xf32>, vector<8x64xf32> -> vector<64x64xf32>
    %375 = arith.truncf %374 : vector<64x64xf32> to vector<64x64xbf16>
    %cst_88 = arith.constant dense<0.000000e+00> : vector<64x128xf32>
    %376 = tpu.matmul %375, %371, %cst_88 {dimension_numbers = #tpu.dot_dimension_numbers<[1], [0], [0], [1], [0, 0, 1, 1], [], []>} : vector<64x64xbf16>, vector<64x128xbf16>, vector<64x128xf32> -> vector<64x128xf32>
    %377 = vector.broadcast %373 : vector<1x128xf32> to vector<64x128xf32>
    %378 = arith.addf %376, %377 : vector<64x128xf32>
    %cst_89 = arith.constant 0.000000e+00 : f32
    %379 = vector.broadcast %cst_89 : f32 to vector<8x32xf32>
    %cst_90 = arith.constant 0.000000e+00 : f32
    %380 = vector.broadcast %cst_90 : f32 to vector<8x32xf32>
    %381 = vector.extract_strided_slice %378 {offsets = [0, 0], sizes = [8, 128], strides = [1, 1]} : vector<64x128xf32> to vector<8x128xf32>
    %382 = arith.truncf %379 : vector<8x32xf32> to vector<8x32xbf16>
    %cst_91 = arith.constant dense<0.000000e+00> : vector<8x128xf32>
    %383 = tpu.matmul %382, %372, %cst_91 {dimension_numbers = #tpu.dot_dimension_numbers<[1], [0], [0], [1], [0, 0, 1, 1], [], []>} : vector<8x32xbf16>, vector<32x128xbf16>, vector<8x128xf32> -> vector<8x128xf32>
    %384 = arith.addf %381, %383 : vector<8x128xf32>
    %385 = vector.extract_strided_slice %384 {offsets = [0, 0], sizes = [8, 32], strides = [1, 1]} : vector<8x128xf32> to vector<8x32xf32>
    %386 = math.tanh %385 : vector<8x32xf32>
    %387 = vector.extract_strided_slice %384 {offsets = [0, 32], sizes = [8, 96], strides = [1, 1]} : vector<8x128xf32> to vector<8x96xf32>
    %cst_92 = arith.constant 5.000000e-01 : f32
    %388 = vector.broadcast %cst_92 : f32 to vector<8x96xf32>
    %389 = arith.mulf %388, %387 : vector<8x96xf32>
    %390 = math.tanh %389 : vector<8x96xf32>
    %cst_93 = arith.constant 5.000000e-01 : f32
    %391 = vector.broadcast %cst_93 : f32 to vector<8x96xf32>
    %392 = arith.mulf %391, %390 : vector<8x96xf32>
    %cst_94 = arith.constant 5.000000e-01 : f32
    %393 = vector.broadcast %cst_94 : f32 to vector<8x96xf32>
    %394 = arith.addf %392, %393 : vector<8x96xf32>
    %395 = vector.extract_strided_slice %394 {offsets = [0, 0], sizes = [8, 32], strides = [1, 1]} : vector<8x96xf32> to vector<8x32xf32>
    %396 = vector.extract_strided_slice %394 {offsets = [0, 32], sizes = [8, 32], strides = [1, 1]} : vector<8x96xf32> to vector<8x32xf32>
    %397 = vector.extract_strided_slice %394 {offsets = [0, 64], sizes = [8, 32], strides = [1, 1]} : vector<8x96xf32> to vector<8x32xf32>
    %398 = arith.mulf %396, %380 : vector<8x32xf32>
    %399 = arith.mulf %395, %386 : vector<8x32xf32>
    %400 = arith.addf %398, %399 : vector<8x32xf32>
    %401 = math.tanh %400 : vector<8x32xf32>
    %402 = arith.mulf %397, %401 : vector<8x32xf32>
    %403 = vector.extract_strided_slice %378 {offsets = [8, 0], sizes = [8, 128], strides = [1, 1]} : vector<64x128xf32> to vector<8x128xf32>
    %404 = arith.truncf %402 : vector<8x32xf32> to vector<8x32xbf16>
    %cst_95 = arith.constant dense<0.000000e+00> : vector<8x128xf32>
    %405 = tpu.matmul %404, %372, %cst_95 {dimension_numbers = #tpu.dot_dimension_numbers<[1], [0], [0], [1], [0, 0, 1, 1], [], []>} : vector<8x32xbf16>, vector<32x128xbf16>, vector<8x128xf32> -> vector<8x128xf32>
    %406 = arith.addf %403, %405 : vector<8x128xf32>
    %407 = vector.extract_strided_slice %406 {offsets = [0, 0], sizes = [8, 32], strides = [1, 1]} : vector<8x128xf32> to vector<8x32xf32>
    %408 = math.tanh %407 : vector<8x32xf32>
    %409 = vector.extract_strided_slice %406 {offsets = [0, 32], sizes = [8, 96], strides = [1, 1]} : vector<8x128xf32> to vector<8x96xf32>
    %cst_96 = arith.constant 5.000000e-01 : f32
    %410 = vector.broadcast %cst_96 : f32 to vector<8x96xf32>
    %411 = arith.mulf %410, %409 : vector<8x96xf32>
    %412 = math.tanh %411 : vector<8x96xf32>
    %cst_97 = arith.constant 5.000000e-01 : f32
    %413 = vector.broadcast %cst_97 : f32 to vector<8x96xf32>
    %414 = arith.mulf %413, %412 : vector<8x96xf32>
    %cst_98 = arith.constant 5.000000e-01 : f32
    %415 = vector.broadcast %cst_98 : f32 to vector<8x96xf32>
    %416 = arith.addf %414, %415 : vector<8x96xf32>
    %417 = vector.extract_strided_slice %416 {offsets = [0, 0], sizes = [8, 32], strides = [1, 1]} : vector<8x96xf32> to vector<8x32xf32>
    %418 = vector.extract_strided_slice %416 {offsets = [0, 32], sizes = [8, 32], strides = [1, 1]} : vector<8x96xf32> to vector<8x32xf32>
    %419 = vector.extract_strided_slice %416 {offsets = [0, 64], sizes = [8, 32], strides = [1, 1]} : vector<8x96xf32> to vector<8x32xf32>
    %420 = arith.mulf %418, %400 : vector<8x32xf32>
    %421 = arith.mulf %417, %408 : vector<8x32xf32>
    %422 = arith.addf %420, %421 : vector<8x32xf32>
    %423 = math.tanh %422 : vector<8x32xf32>
    %424 = arith.mulf %419, %423 : vector<8x32xf32>
    %425 = vector.extract_strided_slice %378 {offsets = [16, 0], sizes = [8, 128], strides = [1, 1]} : vector<64x128xf32> to vector<8x128xf32>
    %426 = arith.truncf %424 : vector<8x32xf32> to vector<8x32xbf16>
    %cst_99 = arith.constant dense<0.000000e+00> : vector<8x128xf32>
    %427 = tpu.matmul %426, %372, %cst_99 {dimension_numbers = #tpu.dot_dimension_numbers<[1], [0], [0], [1], [0, 0, 1, 1], [], []>} : vector<8x32xbf16>, vector<32x128xbf16>, vector<8x128xf32> -> vector<8x128xf32>
    %428 = arith.addf %425, %427 : vector<8x128xf32>
    %429 = vector.extract_strided_slice %428 {offsets = [0, 0], sizes = [8, 32], strides = [1, 1]} : vector<8x128xf32> to vector<8x32xf32>
    %430 = math.tanh %429 : vector<8x32xf32>
    %431 = vector.extract_strided_slice %428 {offsets = [0, 32], sizes = [8, 96], strides = [1, 1]} : vector<8x128xf32> to vector<8x96xf32>
    %cst_100 = arith.constant 5.000000e-01 : f32
    %432 = vector.broadcast %cst_100 : f32 to vector<8x96xf32>
    %433 = arith.mulf %432, %431 : vector<8x96xf32>
    %434 = math.tanh %433 : vector<8x96xf32>
    %cst_101 = arith.constant 5.000000e-01 : f32
    %435 = vector.broadcast %cst_101 : f32 to vector<8x96xf32>
    %436 = arith.mulf %435, %434 : vector<8x96xf32>
    %cst_102 = arith.constant 5.000000e-01 : f32
    %437 = vector.broadcast %cst_102 : f32 to vector<8x96xf32>
    %438 = arith.addf %436, %437 : vector<8x96xf32>
    %439 = vector.extract_strided_slice %438 {offsets = [0, 0], sizes = [8, 32], strides = [1, 1]} : vector<8x96xf32> to vector<8x32xf32>
    %440 = vector.extract_strided_slice %438 {offsets = [0, 32], sizes = [8, 32], strides = [1, 1]} : vector<8x96xf32> to vector<8x32xf32>
    %441 = vector.extract_strided_slice %438 {offsets = [0, 64], sizes = [8, 32], strides = [1, 1]} : vector<8x96xf32> to vector<8x32xf32>
    %442 = arith.mulf %440, %422 : vector<8x32xf32>
    %443 = arith.mulf %439, %430 : vector<8x32xf32>
    %444 = arith.addf %442, %443 : vector<8x32xf32>
    %445 = math.tanh %444 : vector<8x32xf32>
    %446 = arith.mulf %441, %445 : vector<8x32xf32>
    %447 = vector.extract_strided_slice %378 {offsets = [24, 0], sizes = [8, 128], strides = [1, 1]} : vector<64x128xf32> to vector<8x128xf32>
    %448 = arith.truncf %446 : vector<8x32xf32> to vector<8x32xbf16>
    %cst_103 = arith.constant dense<0.000000e+00> : vector<8x128xf32>
    %449 = tpu.matmul %448, %372, %cst_103 {dimension_numbers = #tpu.dot_dimension_numbers<[1], [0], [0], [1], [0, 0, 1, 1], [], []>} : vector<8x32xbf16>, vector<32x128xbf16>, vector<8x128xf32> -> vector<8x128xf32>
    %450 = arith.addf %447, %449 : vector<8x128xf32>
    %451 = vector.extract_strided_slice %450 {offsets = [0, 0], sizes = [8, 32], strides = [1, 1]} : vector<8x128xf32> to vector<8x32xf32>
    %452 = math.tanh %451 : vector<8x32xf32>
    %453 = vector.extract_strided_slice %450 {offsets = [0, 32], sizes = [8, 96], strides = [1, 1]} : vector<8x128xf32> to vector<8x96xf32>
    %cst_104 = arith.constant 5.000000e-01 : f32
    %454 = vector.broadcast %cst_104 : f32 to vector<8x96xf32>
    %455 = arith.mulf %454, %453 : vector<8x96xf32>
    %456 = math.tanh %455 : vector<8x96xf32>
    %cst_105 = arith.constant 5.000000e-01 : f32
    %457 = vector.broadcast %cst_105 : f32 to vector<8x96xf32>
    %458 = arith.mulf %457, %456 : vector<8x96xf32>
    %cst_106 = arith.constant 5.000000e-01 : f32
    %459 = vector.broadcast %cst_106 : f32 to vector<8x96xf32>
    %460 = arith.addf %458, %459 : vector<8x96xf32>
    %461 = vector.extract_strided_slice %460 {offsets = [0, 0], sizes = [8, 32], strides = [1, 1]} : vector<8x96xf32> to vector<8x32xf32>
    %462 = vector.extract_strided_slice %460 {offsets = [0, 32], sizes = [8, 32], strides = [1, 1]} : vector<8x96xf32> to vector<8x32xf32>
    %463 = vector.extract_strided_slice %460 {offsets = [0, 64], sizes = [8, 32], strides = [1, 1]} : vector<8x96xf32> to vector<8x32xf32>
    %464 = arith.mulf %462, %444 : vector<8x32xf32>
    %465 = arith.mulf %461, %452 : vector<8x32xf32>
    %466 = arith.addf %464, %465 : vector<8x32xf32>
    %467 = math.tanh %466 : vector<8x32xf32>
    %468 = arith.mulf %463, %467 : vector<8x32xf32>
    %469 = vector.extract_strided_slice %378 {offsets = [32, 0], sizes = [8, 128], strides = [1, 1]} : vector<64x128xf32> to vector<8x128xf32>
    %470 = arith.truncf %468 : vector<8x32xf32> to vector<8x32xbf16>
    %cst_107 = arith.constant dense<0.000000e+00> : vector<8x128xf32>
    %471 = tpu.matmul %470, %372, %cst_107 {dimension_numbers = #tpu.dot_dimension_numbers<[1], [0], [0], [1], [0, 0, 1, 1], [], []>} : vector<8x32xbf16>, vector<32x128xbf16>, vector<8x128xf32> -> vector<8x128xf32>
    %472 = arith.addf %469, %471 : vector<8x128xf32>
    %473 = vector.extract_strided_slice %472 {offsets = [0, 0], sizes = [8, 32], strides = [1, 1]} : vector<8x128xf32> to vector<8x32xf32>
    %474 = math.tanh %473 : vector<8x32xf32>
    %475 = vector.extract_strided_slice %472 {offsets = [0, 32], sizes = [8, 96], strides = [1, 1]} : vector<8x128xf32> to vector<8x96xf32>
    %cst_108 = arith.constant 5.000000e-01 : f32
    %476 = vector.broadcast %cst_108 : f32 to vector<8x96xf32>
    %477 = arith.mulf %476, %475 : vector<8x96xf32>
    %478 = math.tanh %477 : vector<8x96xf32>
    %cst_109 = arith.constant 5.000000e-01 : f32
    %479 = vector.broadcast %cst_109 : f32 to vector<8x96xf32>
    %480 = arith.mulf %479, %478 : vector<8x96xf32>
    %cst_110 = arith.constant 5.000000e-01 : f32
    %481 = vector.broadcast %cst_110 : f32 to vector<8x96xf32>
    %482 = arith.addf %480, %481 : vector<8x96xf32>
    %483 = vector.extract_strided_slice %482 {offsets = [0, 0], sizes = [8, 32], strides = [1, 1]} : vector<8x96xf32> to vector<8x32xf32>
    %484 = vector.extract_strided_slice %482 {offsets = [0, 32], sizes = [8, 32], strides = [1, 1]} : vector<8x96xf32> to vector<8x32xf32>
    %485 = vector.extract_strided_slice %482 {offsets = [0, 64], sizes = [8, 32], strides = [1, 1]} : vector<8x96xf32> to vector<8x32xf32>
    %486 = arith.mulf %484, %466 : vector<8x32xf32>
    %487 = arith.mulf %483, %474 : vector<8x32xf32>
    %488 = arith.addf %486, %487 : vector<8x32xf32>
    %489 = math.tanh %488 : vector<8x32xf32>
    %490 = arith.mulf %485, %489 : vector<8x32xf32>
    %491 = vector.extract_strided_slice %378 {offsets = [40, 0], sizes = [8, 128], strides = [1, 1]} : vector<64x128xf32> to vector<8x128xf32>
    %492 = arith.truncf %490 : vector<8x32xf32> to vector<8x32xbf16>
    %cst_111 = arith.constant dense<0.000000e+00> : vector<8x128xf32>
    %493 = tpu.matmul %492, %372, %cst_111 {dimension_numbers = #tpu.dot_dimension_numbers<[1], [0], [0], [1], [0, 0, 1, 1], [], []>} : vector<8x32xbf16>, vector<32x128xbf16>, vector<8x128xf32> -> vector<8x128xf32>
    %494 = arith.addf %491, %493 : vector<8x128xf32>
    %495 = vector.extract_strided_slice %494 {offsets = [0, 0], sizes = [8, 32], strides = [1, 1]} : vector<8x128xf32> to vector<8x32xf32>
    %496 = math.tanh %495 : vector<8x32xf32>
    %497 = vector.extract_strided_slice %494 {offsets = [0, 32], sizes = [8, 96], strides = [1, 1]} : vector<8x128xf32> to vector<8x96xf32>
    %cst_112 = arith.constant 5.000000e-01 : f32
    %498 = vector.broadcast %cst_112 : f32 to vector<8x96xf32>
    %499 = arith.mulf %498, %497 : vector<8x96xf32>
    %500 = math.tanh %499 : vector<8x96xf32>
    %cst_113 = arith.constant 5.000000e-01 : f32
    %501 = vector.broadcast %cst_113 : f32 to vector<8x96xf32>
    %502 = arith.mulf %501, %500 : vector<8x96xf32>
    %cst_114 = arith.constant 5.000000e-01 : f32
    %503 = vector.broadcast %cst_114 : f32 to vector<8x96xf32>
    %504 = arith.addf %502, %503 : vector<8x96xf32>
    %505 = vector.extract_strided_slice %504 {offsets = [0, 0], sizes = [8, 32], strides = [1, 1]} : vector<8x96xf32> to vector<8x32xf32>
    %506 = vector.extract_strided_slice %504 {offsets = [0, 32], sizes = [8, 32], strides = [1, 1]} : vector<8x96xf32> to vector<8x32xf32>
    %507 = vector.extract_strided_slice %504 {offsets = [0, 64], sizes = [8, 32], strides = [1, 1]} : vector<8x96xf32> to vector<8x32xf32>
    %508 = arith.mulf %506, %488 : vector<8x32xf32>
    %509 = arith.mulf %505, %496 : vector<8x32xf32>
    %510 = arith.addf %508, %509 : vector<8x32xf32>
    %511 = math.tanh %510 : vector<8x32xf32>
    %512 = arith.mulf %507, %511 : vector<8x32xf32>
    %513 = vector.extract_strided_slice %378 {offsets = [48, 0], sizes = [8, 128], strides = [1, 1]} : vector<64x128xf32> to vector<8x128xf32>
    %514 = arith.truncf %512 : vector<8x32xf32> to vector<8x32xbf16>
    %cst_115 = arith.constant dense<0.000000e+00> : vector<8x128xf32>
    %515 = tpu.matmul %514, %372, %cst_115 {dimension_numbers = #tpu.dot_dimension_numbers<[1], [0], [0], [1], [0, 0, 1, 1], [], []>} : vector<8x32xbf16>, vector<32x128xbf16>, vector<8x128xf32> -> vector<8x128xf32>
    %516 = arith.addf %513, %515 : vector<8x128xf32>
    %517 = vector.extract_strided_slice %516 {offsets = [0, 0], sizes = [8, 32], strides = [1, 1]} : vector<8x128xf32> to vector<8x32xf32>
    %518 = math.tanh %517 : vector<8x32xf32>
    %519 = vector.extract_strided_slice %516 {offsets = [0, 32], sizes = [8, 96], strides = [1, 1]} : vector<8x128xf32> to vector<8x96xf32>
    %cst_116 = arith.constant 5.000000e-01 : f32
    %520 = vector.broadcast %cst_116 : f32 to vector<8x96xf32>
    %521 = arith.mulf %520, %519 : vector<8x96xf32>
    %522 = math.tanh %521 : vector<8x96xf32>
    %cst_117 = arith.constant 5.000000e-01 : f32
    %523 = vector.broadcast %cst_117 : f32 to vector<8x96xf32>
    %524 = arith.mulf %523, %522 : vector<8x96xf32>
    %cst_118 = arith.constant 5.000000e-01 : f32
    %525 = vector.broadcast %cst_118 : f32 to vector<8x96xf32>
    %526 = arith.addf %524, %525 : vector<8x96xf32>
    %527 = vector.extract_strided_slice %526 {offsets = [0, 0], sizes = [8, 32], strides = [1, 1]} : vector<8x96xf32> to vector<8x32xf32>
    %528 = vector.extract_strided_slice %526 {offsets = [0, 32], sizes = [8, 32], strides = [1, 1]} : vector<8x96xf32> to vector<8x32xf32>
    %529 = vector.extract_strided_slice %526 {offsets = [0, 64], sizes = [8, 32], strides = [1, 1]} : vector<8x96xf32> to vector<8x32xf32>
    %530 = arith.mulf %528, %510 : vector<8x32xf32>
    %531 = arith.mulf %527, %518 : vector<8x32xf32>
    %532 = arith.addf %530, %531 : vector<8x32xf32>
    %533 = math.tanh %532 : vector<8x32xf32>
    %534 = arith.mulf %529, %533 : vector<8x32xf32>
    %535 = vector.extract_strided_slice %378 {offsets = [56, 0], sizes = [8, 128], strides = [1, 1]} : vector<64x128xf32> to vector<8x128xf32>
    %536 = arith.truncf %534 : vector<8x32xf32> to vector<8x32xbf16>
    %cst_119 = arith.constant dense<0.000000e+00> : vector<8x128xf32>
    %537 = tpu.matmul %536, %372, %cst_119 {dimension_numbers = #tpu.dot_dimension_numbers<[1], [0], [0], [1], [0, 0, 1, 1], [], []>} : vector<8x32xbf16>, vector<32x128xbf16>, vector<8x128xf32> -> vector<8x128xf32>
    %538 = arith.addf %535, %537 : vector<8x128xf32>
    %539 = vector.extract_strided_slice %538 {offsets = [0, 0], sizes = [8, 32], strides = [1, 1]} : vector<8x128xf32> to vector<8x32xf32>
    %540 = math.tanh %539 : vector<8x32xf32>
    %541 = vector.extract_strided_slice %538 {offsets = [0, 32], sizes = [8, 96], strides = [1, 1]} : vector<8x128xf32> to vector<8x96xf32>
    %cst_120 = arith.constant 5.000000e-01 : f32
    %542 = vector.broadcast %cst_120 : f32 to vector<8x96xf32>
    %543 = arith.mulf %542, %541 : vector<8x96xf32>
    %544 = math.tanh %543 : vector<8x96xf32>
    %cst_121 = arith.constant 5.000000e-01 : f32
    %545 = vector.broadcast %cst_121 : f32 to vector<8x96xf32>
    %546 = arith.mulf %545, %544 : vector<8x96xf32>
    %cst_122 = arith.constant 5.000000e-01 : f32
    %547 = vector.broadcast %cst_122 : f32 to vector<8x96xf32>
    %548 = arith.addf %546, %547 : vector<8x96xf32>
    %549 = vector.extract_strided_slice %548 {offsets = [0, 0], sizes = [8, 32], strides = [1, 1]} : vector<8x96xf32> to vector<8x32xf32>
    %550 = vector.extract_strided_slice %548 {offsets = [0, 32], sizes = [8, 32], strides = [1, 1]} : vector<8x96xf32> to vector<8x32xf32>
    %551 = vector.extract_strided_slice %548 {offsets = [0, 64], sizes = [8, 32], strides = [1, 1]} : vector<8x96xf32> to vector<8x32xf32>
    %552 = arith.mulf %550, %532 : vector<8x32xf32>
    %553 = arith.mulf %549, %540 : vector<8x32xf32>
    %554 = arith.addf %552, %553 : vector<8x32xf32>
    %555 = math.tanh %554 : vector<8x32xf32>
    %556 = arith.mulf %551, %555 : vector<8x32xf32>
    %c0_123 = arith.constant 0 : index
    %c0_124 = arith.constant 0 : index
    %557 = vector.load %arg10[%c0_123, %c0_124] : memref<32x128xbf16, #tpu.memory_space<vmem>>, vector<32x128xbf16>
    %c0_125 = arith.constant 0 : index
    %c0_126 = arith.constant 0 : index
    %558 = vector.load %arg11[%c0_125, %c0_126] : memref<32x128xbf16, #tpu.memory_space<vmem>>, vector<32x128xbf16>
    %c0_127 = arith.constant 0 : index
    %c0_128 = arith.constant 0 : index
    %559 = vector.load %arg12[%c0_127, %c0_128] : memref<1x128xf32, #tpu.memory_space<vmem>>, vector<1x128xf32>
    %560 = tpu.concatenate %402, %424, %446, %468, %490, %512, %534, %556 in 0 : vector<8x32xf32>, vector<8x32xf32>, vector<8x32xf32>, vector<8x32xf32>, vector<8x32xf32>, vector<8x32xf32>, vector<8x32xf32>, vector<8x32xf32> -> vector<64x32xf32>
    %561 = arith.truncf %560 : vector<64x32xf32> to vector<64x32xbf16>
    %cst_129 = arith.constant dense<0.000000e+00> : vector<64x128xf32>
    %562 = tpu.matmul %561, %557, %cst_129 {dimension_numbers = #tpu.dot_dimension_numbers<[1], [0], [0], [1], [0, 0, 1, 1], [], []>} : vector<64x32xbf16>, vector<32x128xbf16>, vector<64x128xf32> -> vector<64x128xf32>
    %563 = vector.broadcast %559 : vector<1x128xf32> to vector<64x128xf32>
    %564 = arith.addf %562, %563 : vector<64x128xf32>
    %cst_130 = arith.constant 0.000000e+00 : f32
    %565 = vector.broadcast %cst_130 : f32 to vector<8x32xf32>
    %cst_131 = arith.constant 0.000000e+00 : f32
    %566 = vector.broadcast %cst_131 : f32 to vector<8x32xf32>
    %567 = vector.extract_strided_slice %564 {offsets = [0, 0], sizes = [8, 128], strides = [1, 1]} : vector<64x128xf32> to vector<8x128xf32>
    %568 = arith.truncf %565 : vector<8x32xf32> to vector<8x32xbf16>
    %cst_132 = arith.constant dense<0.000000e+00> : vector<8x128xf32>
    %569 = tpu.matmul %568, %558, %cst_132 {dimension_numbers = #tpu.dot_dimension_numbers<[1], [0], [0], [1], [0, 0, 1, 1], [], []>} : vector<8x32xbf16>, vector<32x128xbf16>, vector<8x128xf32> -> vector<8x128xf32>
    %570 = arith.addf %567, %569 : vector<8x128xf32>
    %571 = vector.extract_strided_slice %570 {offsets = [0, 0], sizes = [8, 32], strides = [1, 1]} : vector<8x128xf32> to vector<8x32xf32>
    %572 = math.tanh %571 : vector<8x32xf32>
    %573 = vector.extract_strided_slice %570 {offsets = [0, 32], sizes = [8, 96], strides = [1, 1]} : vector<8x128xf32> to vector<8x96xf32>
    %cst_133 = arith.constant 5.000000e-01 : f32
    %574 = vector.broadcast %cst_133 : f32 to vector<8x96xf32>
    %575 = arith.mulf %574, %573 : vector<8x96xf32>
    %576 = math.tanh %575 : vector<8x96xf32>
    %cst_134 = arith.constant 5.000000e-01 : f32
    %577 = vector.broadcast %cst_134 : f32 to vector<8x96xf32>
    %578 = arith.mulf %577, %576 : vector<8x96xf32>
    %cst_135 = arith.constant 5.000000e-01 : f32
    %579 = vector.broadcast %cst_135 : f32 to vector<8x96xf32>
    %580 = arith.addf %578, %579 : vector<8x96xf32>
    %581 = vector.extract_strided_slice %580 {offsets = [0, 0], sizes = [8, 32], strides = [1, 1]} : vector<8x96xf32> to vector<8x32xf32>
    %582 = vector.extract_strided_slice %580 {offsets = [0, 32], sizes = [8, 32], strides = [1, 1]} : vector<8x96xf32> to vector<8x32xf32>
    %583 = vector.extract_strided_slice %580 {offsets = [0, 64], sizes = [8, 32], strides = [1, 1]} : vector<8x96xf32> to vector<8x32xf32>
    %584 = arith.mulf %582, %566 : vector<8x32xf32>
    %585 = arith.mulf %581, %572 : vector<8x32xf32>
    %586 = arith.addf %584, %585 : vector<8x32xf32>
    %587 = math.tanh %586 : vector<8x32xf32>
    %588 = arith.mulf %583, %587 : vector<8x32xf32>
    %589 = vector.extract_strided_slice %564 {offsets = [8, 0], sizes = [8, 128], strides = [1, 1]} : vector<64x128xf32> to vector<8x128xf32>
    %590 = arith.truncf %588 : vector<8x32xf32> to vector<8x32xbf16>
    %cst_136 = arith.constant dense<0.000000e+00> : vector<8x128xf32>
    %591 = tpu.matmul %590, %558, %cst_136 {dimension_numbers = #tpu.dot_dimension_numbers<[1], [0], [0], [1], [0, 0, 1, 1], [], []>} : vector<8x32xbf16>, vector<32x128xbf16>, vector<8x128xf32> -> vector<8x128xf32>
    %592 = arith.addf %589, %591 : vector<8x128xf32>
    %593 = vector.extract_strided_slice %592 {offsets = [0, 0], sizes = [8, 32], strides = [1, 1]} : vector<8x128xf32> to vector<8x32xf32>
    %594 = math.tanh %593 : vector<8x32xf32>
    %595 = vector.extract_strided_slice %592 {offsets = [0, 32], sizes = [8, 96], strides = [1, 1]} : vector<8x128xf32> to vector<8x96xf32>
    %cst_137 = arith.constant 5.000000e-01 : f32
    %596 = vector.broadcast %cst_137 : f32 to vector<8x96xf32>
    %597 = arith.mulf %596, %595 : vector<8x96xf32>
    %598 = math.tanh %597 : vector<8x96xf32>
    %cst_138 = arith.constant 5.000000e-01 : f32
    %599 = vector.broadcast %cst_138 : f32 to vector<8x96xf32>
    %600 = arith.mulf %599, %598 : vector<8x96xf32>
    %cst_139 = arith.constant 5.000000e-01 : f32
    %601 = vector.broadcast %cst_139 : f32 to vector<8x96xf32>
    %602 = arith.addf %600, %601 : vector<8x96xf32>
    %603 = vector.extract_strided_slice %602 {offsets = [0, 0], sizes = [8, 32], strides = [1, 1]} : vector<8x96xf32> to vector<8x32xf32>
    %604 = vector.extract_strided_slice %602 {offsets = [0, 32], sizes = [8, 32], strides = [1, 1]} : vector<8x96xf32> to vector<8x32xf32>
    %605 = vector.extract_strided_slice %602 {offsets = [0, 64], sizes = [8, 32], strides = [1, 1]} : vector<8x96xf32> to vector<8x32xf32>
    %606 = arith.mulf %604, %586 : vector<8x32xf32>
    %607 = arith.mulf %603, %594 : vector<8x32xf32>
    %608 = arith.addf %606, %607 : vector<8x32xf32>
    %609 = math.tanh %608 : vector<8x32xf32>
    %610 = arith.mulf %605, %609 : vector<8x32xf32>
    %611 = vector.extract_strided_slice %564 {offsets = [16, 0], sizes = [8, 128], strides = [1, 1]} : vector<64x128xf32> to vector<8x128xf32>
    %612 = arith.truncf %610 : vector<8x32xf32> to vector<8x32xbf16>
    %cst_140 = arith.constant dense<0.000000e+00> : vector<8x128xf32>
    %613 = tpu.matmul %612, %558, %cst_140 {dimension_numbers = #tpu.dot_dimension_numbers<[1], [0], [0], [1], [0, 0, 1, 1], [], []>} : vector<8x32xbf16>, vector<32x128xbf16>, vector<8x128xf32> -> vector<8x128xf32>
    %614 = arith.addf %611, %613 : vector<8x128xf32>
    %615 = vector.extract_strided_slice %614 {offsets = [0, 0], sizes = [8, 32], strides = [1, 1]} : vector<8x128xf32> to vector<8x32xf32>
    %616 = math.tanh %615 : vector<8x32xf32>
    %617 = vector.extract_strided_slice %614 {offsets = [0, 32], sizes = [8, 96], strides = [1, 1]} : vector<8x128xf32> to vector<8x96xf32>
    %cst_141 = arith.constant 5.000000e-01 : f32
    %618 = vector.broadcast %cst_141 : f32 to vector<8x96xf32>
    %619 = arith.mulf %618, %617 : vector<8x96xf32>
    %620 = math.tanh %619 : vector<8x96xf32>
    %cst_142 = arith.constant 5.000000e-01 : f32
    %621 = vector.broadcast %cst_142 : f32 to vector<8x96xf32>
    %622 = arith.mulf %621, %620 : vector<8x96xf32>
    %cst_143 = arith.constant 5.000000e-01 : f32
    %623 = vector.broadcast %cst_143 : f32 to vector<8x96xf32>
    %624 = arith.addf %622, %623 : vector<8x96xf32>
    %625 = vector.extract_strided_slice %624 {offsets = [0, 0], sizes = [8, 32], strides = [1, 1]} : vector<8x96xf32> to vector<8x32xf32>
    %626 = vector.extract_strided_slice %624 {offsets = [0, 32], sizes = [8, 32], strides = [1, 1]} : vector<8x96xf32> to vector<8x32xf32>
    %627 = vector.extract_strided_slice %624 {offsets = [0, 64], sizes = [8, 32], strides = [1, 1]} : vector<8x96xf32> to vector<8x32xf32>
    %628 = arith.mulf %626, %608 : vector<8x32xf32>
    %629 = arith.mulf %625, %616 : vector<8x32xf32>
    %630 = arith.addf %628, %629 : vector<8x32xf32>
    %631 = math.tanh %630 : vector<8x32xf32>
    %632 = arith.mulf %627, %631 : vector<8x32xf32>
    %633 = vector.extract_strided_slice %564 {offsets = [24, 0], sizes = [8, 128], strides = [1, 1]} : vector<64x128xf32> to vector<8x128xf32>
    %634 = arith.truncf %632 : vector<8x32xf32> to vector<8x32xbf16>
    %cst_144 = arith.constant dense<0.000000e+00> : vector<8x128xf32>
    %635 = tpu.matmul %634, %558, %cst_144 {dimension_numbers = #tpu.dot_dimension_numbers<[1], [0], [0], [1], [0, 0, 1, 1], [], []>} : vector<8x32xbf16>, vector<32x128xbf16>, vector<8x128xf32> -> vector<8x128xf32>
    %636 = arith.addf %633, %635 : vector<8x128xf32>
    %637 = vector.extract_strided_slice %636 {offsets = [0, 0], sizes = [8, 32], strides = [1, 1]} : vector<8x128xf32> to vector<8x32xf32>
    %638 = math.tanh %637 : vector<8x32xf32>
    %639 = vector.extract_strided_slice %636 {offsets = [0, 32], sizes = [8, 96], strides = [1, 1]} : vector<8x128xf32> to vector<8x96xf32>
    %cst_145 = arith.constant 5.000000e-01 : f32
    %640 = vector.broadcast %cst_145 : f32 to vector<8x96xf32>
    %641 = arith.mulf %640, %639 : vector<8x96xf32>
    %642 = math.tanh %641 : vector<8x96xf32>
    %cst_146 = arith.constant 5.000000e-01 : f32
    %643 = vector.broadcast %cst_146 : f32 to vector<8x96xf32>
    %644 = arith.mulf %643, %642 : vector<8x96xf32>
    %cst_147 = arith.constant 5.000000e-01 : f32
    %645 = vector.broadcast %cst_147 : f32 to vector<8x96xf32>
    %646 = arith.addf %644, %645 : vector<8x96xf32>
    %647 = vector.extract_strided_slice %646 {offsets = [0, 0], sizes = [8, 32], strides = [1, 1]} : vector<8x96xf32> to vector<8x32xf32>
    %648 = vector.extract_strided_slice %646 {offsets = [0, 32], sizes = [8, 32], strides = [1, 1]} : vector<8x96xf32> to vector<8x32xf32>
    %649 = vector.extract_strided_slice %646 {offsets = [0, 64], sizes = [8, 32], strides = [1, 1]} : vector<8x96xf32> to vector<8x32xf32>
    %650 = arith.mulf %648, %630 : vector<8x32xf32>
    %651 = arith.mulf %647, %638 : vector<8x32xf32>
    %652 = arith.addf %650, %651 : vector<8x32xf32>
    %653 = math.tanh %652 : vector<8x32xf32>
    %654 = arith.mulf %649, %653 : vector<8x32xf32>
    %655 = vector.extract_strided_slice %564 {offsets = [32, 0], sizes = [8, 128], strides = [1, 1]} : vector<64x128xf32> to vector<8x128xf32>
    %656 = arith.truncf %654 : vector<8x32xf32> to vector<8x32xbf16>
    %cst_148 = arith.constant dense<0.000000e+00> : vector<8x128xf32>
    %657 = tpu.matmul %656, %558, %cst_148 {dimension_numbers = #tpu.dot_dimension_numbers<[1], [0], [0], [1], [0, 0, 1, 1], [], []>} : vector<8x32xbf16>, vector<32x128xbf16>, vector<8x128xf32> -> vector<8x128xf32>
    %658 = arith.addf %655, %657 : vector<8x128xf32>
    %659 = vector.extract_strided_slice %658 {offsets = [0, 0], sizes = [8, 32], strides = [1, 1]} : vector<8x128xf32> to vector<8x32xf32>
    %660 = math.tanh %659 : vector<8x32xf32>
    %661 = vector.extract_strided_slice %658 {offsets = [0, 32], sizes = [8, 96], strides = [1, 1]} : vector<8x128xf32> to vector<8x96xf32>
    %cst_149 = arith.constant 5.000000e-01 : f32
    %662 = vector.broadcast %cst_149 : f32 to vector<8x96xf32>
    %663 = arith.mulf %662, %661 : vector<8x96xf32>
    %664 = math.tanh %663 : vector<8x96xf32>
    %cst_150 = arith.constant 5.000000e-01 : f32
    %665 = vector.broadcast %cst_150 : f32 to vector<8x96xf32>
    %666 = arith.mulf %665, %664 : vector<8x96xf32>
    %cst_151 = arith.constant 5.000000e-01 : f32
    %667 = vector.broadcast %cst_151 : f32 to vector<8x96xf32>
    %668 = arith.addf %666, %667 : vector<8x96xf32>
    %669 = vector.extract_strided_slice %668 {offsets = [0, 0], sizes = [8, 32], strides = [1, 1]} : vector<8x96xf32> to vector<8x32xf32>
    %670 = vector.extract_strided_slice %668 {offsets = [0, 32], sizes = [8, 32], strides = [1, 1]} : vector<8x96xf32> to vector<8x32xf32>
    %671 = vector.extract_strided_slice %668 {offsets = [0, 64], sizes = [8, 32], strides = [1, 1]} : vector<8x96xf32> to vector<8x32xf32>
    %672 = arith.mulf %670, %652 : vector<8x32xf32>
    %673 = arith.mulf %669, %660 : vector<8x32xf32>
    %674 = arith.addf %672, %673 : vector<8x32xf32>
    %675 = math.tanh %674 : vector<8x32xf32>
    %676 = arith.mulf %671, %675 : vector<8x32xf32>
    %677 = vector.extract_strided_slice %564 {offsets = [40, 0], sizes = [8, 128], strides = [1, 1]} : vector<64x128xf32> to vector<8x128xf32>
    %678 = arith.truncf %676 : vector<8x32xf32> to vector<8x32xbf16>
    %cst_152 = arith.constant dense<0.000000e+00> : vector<8x128xf32>
    %679 = tpu.matmul %678, %558, %cst_152 {dimension_numbers = #tpu.dot_dimension_numbers<[1], [0], [0], [1], [0, 0, 1, 1], [], []>} : vector<8x32xbf16>, vector<32x128xbf16>, vector<8x128xf32> -> vector<8x128xf32>
    %680 = arith.addf %677, %679 : vector<8x128xf32>
    %681 = vector.extract_strided_slice %680 {offsets = [0, 0], sizes = [8, 32], strides = [1, 1]} : vector<8x128xf32> to vector<8x32xf32>
    %682 = math.tanh %681 : vector<8x32xf32>
    %683 = vector.extract_strided_slice %680 {offsets = [0, 32], sizes = [8, 96], strides = [1, 1]} : vector<8x128xf32> to vector<8x96xf32>
    %cst_153 = arith.constant 5.000000e-01 : f32
    %684 = vector.broadcast %cst_153 : f32 to vector<8x96xf32>
    %685 = arith.mulf %684, %683 : vector<8x96xf32>
    %686 = math.tanh %685 : vector<8x96xf32>
    %cst_154 = arith.constant 5.000000e-01 : f32
    %687 = vector.broadcast %cst_154 : f32 to vector<8x96xf32>
    %688 = arith.mulf %687, %686 : vector<8x96xf32>
    %cst_155 = arith.constant 5.000000e-01 : f32
    %689 = vector.broadcast %cst_155 : f32 to vector<8x96xf32>
    %690 = arith.addf %688, %689 : vector<8x96xf32>
    %691 = vector.extract_strided_slice %690 {offsets = [0, 0], sizes = [8, 32], strides = [1, 1]} : vector<8x96xf32> to vector<8x32xf32>
    %692 = vector.extract_strided_slice %690 {offsets = [0, 32], sizes = [8, 32], strides = [1, 1]} : vector<8x96xf32> to vector<8x32xf32>
    %693 = vector.extract_strided_slice %690 {offsets = [0, 64], sizes = [8, 32], strides = [1, 1]} : vector<8x96xf32> to vector<8x32xf32>
    %694 = arith.mulf %692, %674 : vector<8x32xf32>
    %695 = arith.mulf %691, %682 : vector<8x32xf32>
    %696 = arith.addf %694, %695 : vector<8x32xf32>
    %697 = math.tanh %696 : vector<8x32xf32>
    %698 = arith.mulf %693, %697 : vector<8x32xf32>
    %699 = vector.extract_strided_slice %564 {offsets = [48, 0], sizes = [8, 128], strides = [1, 1]} : vector<64x128xf32> to vector<8x128xf32>
    %700 = arith.truncf %698 : vector<8x32xf32> to vector<8x32xbf16>
    %cst_156 = arith.constant dense<0.000000e+00> : vector<8x128xf32>
    %701 = tpu.matmul %700, %558, %cst_156 {dimension_numbers = #tpu.dot_dimension_numbers<[1], [0], [0], [1], [0, 0, 1, 1], [], []>} : vector<8x32xbf16>, vector<32x128xbf16>, vector<8x128xf32> -> vector<8x128xf32>
    %702 = arith.addf %699, %701 : vector<8x128xf32>
    %703 = vector.extract_strided_slice %702 {offsets = [0, 0], sizes = [8, 32], strides = [1, 1]} : vector<8x128xf32> to vector<8x32xf32>
    %704 = math.tanh %703 : vector<8x32xf32>
    %705 = vector.extract_strided_slice %702 {offsets = [0, 32], sizes = [8, 96], strides = [1, 1]} : vector<8x128xf32> to vector<8x96xf32>
    %cst_157 = arith.constant 5.000000e-01 : f32
    %706 = vector.broadcast %cst_157 : f32 to vector<8x96xf32>
    %707 = arith.mulf %706, %705 : vector<8x96xf32>
    %708 = math.tanh %707 : vector<8x96xf32>
    %cst_158 = arith.constant 5.000000e-01 : f32
    %709 = vector.broadcast %cst_158 : f32 to vector<8x96xf32>
    %710 = arith.mulf %709, %708 : vector<8x96xf32>
    %cst_159 = arith.constant 5.000000e-01 : f32
    %711 = vector.broadcast %cst_159 : f32 to vector<8x96xf32>
    %712 = arith.addf %710, %711 : vector<8x96xf32>
    %713 = vector.extract_strided_slice %712 {offsets = [0, 0], sizes = [8, 32], strides = [1, 1]} : vector<8x96xf32> to vector<8x32xf32>
    %714 = vector.extract_strided_slice %712 {offsets = [0, 32], sizes = [8, 32], strides = [1, 1]} : vector<8x96xf32> to vector<8x32xf32>
    %715 = vector.extract_strided_slice %712 {offsets = [0, 64], sizes = [8, 32], strides = [1, 1]} : vector<8x96xf32> to vector<8x32xf32>
    %716 = arith.mulf %714, %696 : vector<8x32xf32>
    %717 = arith.mulf %713, %704 : vector<8x32xf32>
    %718 = arith.addf %716, %717 : vector<8x32xf32>
    %719 = math.tanh %718 : vector<8x32xf32>
    %720 = arith.mulf %715, %719 : vector<8x32xf32>
    %721 = vector.extract_strided_slice %564 {offsets = [56, 0], sizes = [8, 128], strides = [1, 1]} : vector<64x128xf32> to vector<8x128xf32>
    %722 = arith.truncf %720 : vector<8x32xf32> to vector<8x32xbf16>
    %cst_160 = arith.constant dense<0.000000e+00> : vector<8x128xf32>
    %723 = tpu.matmul %722, %558, %cst_160 {dimension_numbers = #tpu.dot_dimension_numbers<[1], [0], [0], [1], [0, 0, 1, 1], [], []>} : vector<8x32xbf16>, vector<32x128xbf16>, vector<8x128xf32> -> vector<8x128xf32>
    %724 = arith.addf %721, %723 : vector<8x128xf32>
    %725 = vector.extract_strided_slice %724 {offsets = [0, 0], sizes = [8, 32], strides = [1, 1]} : vector<8x128xf32> to vector<8x32xf32>
    %726 = math.tanh %725 : vector<8x32xf32>
    %727 = vector.extract_strided_slice %724 {offsets = [0, 32], sizes = [8, 96], strides = [1, 1]} : vector<8x128xf32> to vector<8x96xf32>
    %cst_161 = arith.constant 5.000000e-01 : f32
    %728 = vector.broadcast %cst_161 : f32 to vector<8x96xf32>
    %729 = arith.mulf %728, %727 : vector<8x96xf32>
    %730 = math.tanh %729 : vector<8x96xf32>
    %cst_162 = arith.constant 5.000000e-01 : f32
    %731 = vector.broadcast %cst_162 : f32 to vector<8x96xf32>
    %732 = arith.mulf %731, %730 : vector<8x96xf32>
    %cst_163 = arith.constant 5.000000e-01 : f32
    %733 = vector.broadcast %cst_163 : f32 to vector<8x96xf32>
    %734 = arith.addf %732, %733 : vector<8x96xf32>
    %735 = vector.extract_strided_slice %734 {offsets = [0, 0], sizes = [8, 32], strides = [1, 1]} : vector<8x96xf32> to vector<8x32xf32>
    %736 = vector.extract_strided_slice %734 {offsets = [0, 32], sizes = [8, 32], strides = [1, 1]} : vector<8x96xf32> to vector<8x32xf32>
    %737 = vector.extract_strided_slice %734 {offsets = [0, 64], sizes = [8, 32], strides = [1, 1]} : vector<8x96xf32> to vector<8x32xf32>
    %738 = arith.mulf %736, %718 : vector<8x32xf32>
    %739 = arith.mulf %735, %726 : vector<8x32xf32>
    %740 = arith.addf %738, %739 : vector<8x32xf32>
    %741 = math.tanh %740 : vector<8x32xf32>
    %742 = arith.mulf %737, %741 : vector<8x32xf32>
    %743 = vector.extract_strided_slice %184 {offsets = [0, 0], sizes = [8, 32], strides = [1, 1]} : vector<8x96xf32> to vector<8x32xf32>
    %744 = vector.extract_strided_slice %370 {offsets = [0, 0], sizes = [8, 32], strides = [1, 1]} : vector<8x64xf32> to vector<8x32xf32>
    %cst_164 = arith.constant 0.000000e+00 : f32
    %745 = vector.broadcast %cst_164 : f32 to vector<8x32xf32>
    %746 = tpu.concatenate %743, %744, %742, %745 in 1 : vector<8x32xf32>, vector<8x32xf32>, vector<8x32xf32>, vector<8x32xf32> -> vector<8x128xf32>
    %cst_165 = arith.constant 5.000000e-01 : f32
    %747 = vector.broadcast %cst_165 : f32 to vector<8x128xf32>
    %748 = arith.mulf %747, %746 : vector<8x128xf32>
    %749 = math.tanh %748 : vector<8x128xf32>
    %cst_166 = arith.constant 5.000000e-01 : f32
    %750 = vector.broadcast %cst_166 : f32 to vector<8x128xf32>
    %751 = arith.mulf %750, %749 : vector<8x128xf32>
    %cst_167 = arith.constant 5.000000e-01 : f32
    %752 = vector.broadcast %cst_167 : f32 to vector<8x128xf32>
    %753 = arith.addf %751, %752 : vector<8x128xf32>
    %754 = arith.mulf %746, %753 : vector<8x128xf32>
    %c0_168 = arith.constant 0 : index
    %c0_169 = arith.constant 0 : index
    %755 = vector.load %arg13[%c0_168, %c0_169] : memref<8x128xf32, #tpu.memory_space<vmem>>, vector<8x128xf32>
    tpu.vector_store %arg13[%c0_168, %c0_169], %754 {strides = array<i32>} : memref<8x128xf32, #tpu.memory_space<vmem>>, vector<8x128xf32>,
    return
  }
}

</mosaic_0001>

<bundles_post_ra>
// kernel: rnn_model_forward.1
= control target key start
LH: loop header
LB: loop body
LE: loop exit
PB: predicated region body
PF: predicated region fallthrough
CT: control target
= control target key end

     0   :  { %v4584_v1 = vmov 0   ;;  %vm134_vm0 = vcmask 130048   ;;  %v4585_v8 = vmov 0.0   ;;  %vm4586_vm1 = vmmov 0   ;;  %s4589_s30 = smov 32   ;;  %s5979_s1 = inlined_call_operand.vmem [shape: bf16[16,384], index: 1, kind: input, shape index: {}]   ;;  %s5980_s0 = inlined_call_operand.vmem [shape: bf16[64,16], index: 0, kind: input, shape index: {}]   ;;  %s5981_s2 = inlined_call_operand.vmem [shape: bf16[96,384], index: 2, kind: input, shape index: {}]   ;;  %s5982_s3 = inlined_call_operand.vmem [shape: f32[1,384], index: 3, kind: input, shape index: {}]   ;;  %s5983_s4 = inlined_call_operand.vmem [shape: bf16[96,256], index: 4, kind: input, shape index: {}]   ;;  %s5984_s5 = inlined_call_operand.vmem [shape: bf16[64,256], index: 5, kind: input, shape index: {}]   ;;  %s5985_s6 = inlined_call_operand.vmem [shape: f32[1,256], index: 6, kind: input, shape index: {}]   ;;  %s5986_s7 = inlined_call_operand.vmem [shape: bf16[64,128], index: 7, kind: input, shape index: {}]   ;;  %s5987_s8 = inlined_call_operand.vmem [shape: bf16[32,128], index: 8, kind: input, shape index: {}]   ;;  %s5988_s9 = inlined_call_operand.vmem [shape: f32[1,128], index: 9, kind: input, shape index: {}]   ;;  %s5989_s10 = inlined_call_operand.vmem [shape: bf16[32,128], index: 10, kind: input, shape index: {}]   ;;  %s5990_s11 = inlined_call_operand.vmem [shape: bf16[32,128], index: 11, kind: input, shape index: {}]   ;;  %s5991_s12 = inlined_call_operand.vmem [shape: f32[1,128], index: 12, kind: input, shape index: {}]   ;;  %s5992_s13 = inlined_call_operand.vmem [shape: f32[8,128], index: 13, kind: output, shape index: {}]  }
   0x1   :  { %v4236_v0 = vld [vmem:[%s5979_s1 + $0x4] ss:$12 sps:$4 sm:$0xff]   ;;  %179 = vmatprep.mubr.bf16.mxu0 %v4584_v1  ;;  %v4238_v2 = vld [vmem:[%s5979_s1 + $0x8] ss:$12 sps:$4 sm:$0xff]   ;;  %v4239_v3 = vld [vmem:[%s5979_s1] ss:$12 sps:$4 sm:$0xff]   ;;  %v83_v27 = vlaneseq }
   0x2   :  { %147 = vmatprep.subr.bf16.mxu0 %v4236_v0  ;;  %3936 = vmatprep.subr.bf16.mxu1 %v4238_v2  ;;  %v4240_v4 = vld [vmem:[%s5980_s0] sm:$0xff]   ;;  %v4241_v5 = vld [vmem:[%s5980_s0 + $0x8] sm:$0xff]   ;;  %v4252_v13 = vld [vmem:[%s5980_s0 + $0x10] sm:$0xff]   ;;  %vm381_vm2 = vcmask 785408   ;;  %vm1683_vm3 = vcmask 523264   ;;  %vm2435_vm4 = vcmask 261120  }
   0x3   :  { %148 = vmatpush1.bf16.msra.mxu0 %v4239_v3  ;;  %3937 = vmatpush3.bf16.msra.mxu1 %v4238_v2  ;;  %v4680_v6 = vld [vmem:[%s5981_s2 + $0x4] ss:$12 sps:$4 sm:$0xff]   ;;  %v4685_v7 = vld [vmem:[%s5981_s2] ss:$12 sps:$4 sm:$0xff]   ;;  %v4691_v9 = vld [vmem:[%s5981_s2 + $0x1c] ss:$12 sps:$4 sm:$0xff]  }
   0x4   :  { %3938 = vmatprep.mubr.msk.bf16.mxu1 %vm134_vm0, %v4240_v4  ;;  %3946 = vmatprep.subr.bf16.mxu0 %v4585_v8  ;;  %v4698_v10 = vld [vmem:[%s5981_s2 + $0x18] ss:$12 sps:$4 sm:$0xff]   ;;  %v4705_v11 = vld [vmem:[%s5981_s2 + $0x34] ss:$12 sps:$4 sm:$0xff]   ;;  %v4721_v14 = vld [vmem:[%s5981_s2 + $0x30] ss:$12 sps:$4 sm:$0xff]  }
   0x5   :  { %385 = vmatprep.subr.bf16.mxu1 %v4680_v6  ;;  %v4711_v12 = vld [vmem:[%s5981_s2 + $0x8] ss:$12 sps:$4 sm:$0xff]   ;;  %v4255_v15 = vld [vmem:[%s5980_s0 + $0x18] sm:$0xff]   ;;  %v4732_v16 = vld [vmem:[%s5981_s2 + $0x20] ss:$12 sps:$4 sm:$0xff]   ;;  %v4841_v28 = vshrl.u32 %v83_v27, 7 }
   0x6   :  { %3708 = vmatmul.mubr.msk.bf16.vlgmr.msra.gmra.mrb[0].mxu0 %vm134_vm0, %v4240_v4  ;;  %3939 = vmatmul.mubr.msk.bf16.vlgmr.msra.gmra.mrb[0].mxu1 %vm134_vm0, %v4241_v5  ;;  %v4738_v17 = vld [vmem:[%s5981_s2 + $0x4c] ss:$12 sps:$4 sm:$0xff]   ;;  %v4753_v19 = vld [vmem:[%s5981_s2 + $0x48] ss:$12 sps:$4 sm:$0xff]   ;;  %v4760_v20 = vld [vmem:[%s5981_s2 + $0x64] ss:$12 sps:$4 sm:$0xff]  }
   0x7   :  { %189 = vmatprep.mubr.bf16.mxu0 %v4584_v1  ;;  %386 = vmatpush1.bf16.msra.mxu1 %v4685_v7  ;;  %v4747_v18 = vld [vmem:[%s5981_s2 + $0x38] ss:$12 sps:$4 sm:$0xff]   ;;  %v4767_v21 = vld [vmem:[%s5981_s2 + $0x50] ss:$12 sps:$4 sm:$0xff]   ;;  %v4773_v22 = vld [vmem:[%s5981_s2 + $0x60] ss:$12 sps:$4 sm:$0xff]  }
   0x8   :  { %387 = vmatprep.subr.bf16.mxu1 %v4691_v9  ;;  %3947 = vmatpush3.bf16.msra.mxu0 %v4711_v12  ;;  %v4780_v23 = vld [vmem:[%s5981_s2 + $0x7c] ss:$12 sps:$4 sm:$0xff]   ;;  %v4794_v25 = vld [vmem:[%s5981_s2 + $0x78] ss:$12 sps:$4 sm:$0xff]   ;;  %v4802_v26 = vld [vmem:[%s5981_s2 + $0x80] ss:$12 sps:$4 sm:$0xff]  }
   0x9   :  { %3942 = vmatprep.mubr.msk.bf16.mxu1 %vm134_vm0, %v4252_v13  ;;  %3948 = vmatprep.subr.bf16.mxu0 %v4585_v8  ;;  %v4788_v24 = vld [vmem:[%s5981_s2 + $0x68] ss:$12 sps:$4 sm:$0xff]   ;;  %v93_v29 = vsub.s32 2, %v4841_v28  ;;  %v73_v30 = vld [vmem:[%s5982_s3] sm:$0x7]  ;;  %v85_v31 = vsub.s32 0, %v4841_v28 }
   0xa   :  { %v5993_v32 = vsub.s32 1, %v4841_v28  ;;  %s4587_s3 = smov 96  }
   0xb   :  { %388 = vmatpush1.bf16.msra.mxu1 %v4698_v10  ;;  %v94_v33 = vrot.slane %v73_v30, %v93_v29  ;;  %v86_v34 = vrot.slane %v73_v30, %v85_v31 }
   0xc   :  { %389 = vmatprep.subr.bf16.mxu1 %v4705_v11  ;;  %3949 = vmatpush3.bf16.msra.mxu0 %v4732_v16  ;;  %v90_v37 = vrot.slane %v73_v30, %v5993_v32 }
   0xd   :  { %3950 = vmatprep.subr.bf16.mxu0 %v4585_v8 }
   0xe   :  { %3709 = vmatmul.mubr.msk.bf16.gmra.mrb[4].mxu0 %vm134_vm0, %v4241_v5  ;;  %3943 = vmatmul.mubr.msk.bf16.gmra.mrb[4].mxu1 %vm134_vm0, %v4255_v15 }
   0xf   :  { %199 = vmatprep.mubr.bf16.mxu0 %v4584_v1  ;;  %390 = vmatpush1.bf16.msra.mxu1 %v4721_v14 }
  0x10   :  { %391 = vmatprep.subr.bf16.mxu1 %v4738_v17  ;;  %417 = vmatprep.mubr.bf16.mxu1 %v4584_v1 }
  0x11   :  { %3951 = vmatpush3.bf16.msra.mxu0 %v4747_v18 }
  0x12   :  { %3952 = vmatprep.subr.bf16.mxu0 %v4585_v8 }
  0x13   :  { %392 = vmatpush1.bf16.msra.mxu1 %v4753_v19 }
  0x14   :  { %393 = vmatprep.subr.bf16.mxu1 %v4760_v20 }
  0x15   :  { %3953 = vmatpush3.bf16.msra.mxu0 %v4767_v21 }
  0x16   :  { %3710 = vmatmul.mubr.msk.bf16.gmra.mrb[8].mxu0 %vm134_vm0, %v4252_v13  ;;  %3954 = vmatprep.subr.bf16.mxu0 %v4585_v8 }
  0x17   :  { %209 = vmatprep.mubr.bf16.mxu0 %v4584_v1  ;;  %394 = vmatpush1.bf16.msra.mxu1 %v4773_v22 }
  0x18   :  { %395 = vmatprep.subr.bf16.mxu1 %v4780_v23 }
  0x19   :  { %3955 = vmatpush3.bf16.msra.mxu0 %v4788_v24 }
  0x1a   :  { %3956 = vmatprep.subr.bf16.mxu0 %v4585_v8 }
  0x1b   :  { %396 = vmatpush1.bf16.msra.mxu1 %v4794_v25 }
  0x1c   :  { %519 = vmatprep.subr.bf16.mxu1 %v4680_v6 }
  0x1d   :  { %3957 = vmatpush3.bf16.msra.mxu0 %v4802_v26 }
  0x1e   :  { %3711 = vmatmul.mubr.msk.bf16.gmra.mrb[12].mxu0 %vm134_vm0, %v4255_v15  ;;  %418 = vmatmul.mubr.bf16.vlgmr.msra.gmra.mrb[8].mxu1 %v4584_v1 }
  0x1f   :  { %3958 = vmatprep.mubr.msk.bf16.mxu0 %vm4586_vm1, %v4585_v8  ;;  %3962 = vmatprep.subr.bf16.mxu0 %v4585_v8 }
  0x20   :  { %520 = vmatpush1.bf16.msra.mxu1 %v4685_v7  ;;  %551 = vmatprep.mubr.bf16.mxu1 %v4584_v1 }
  0x21   :  { %521 = vmatprep.subr.bf16.mxu1 %v4691_v9 }
  0x24   :  { %522 = vmatpush1.bf16.msra.mxu1 %v4698_v10 }
  0x25   :  { %523 = vmatprep.subr.bf16.mxu1 %v4705_v11 }
  0x26   :  { %3959 = vmatmul.mubr.bf16.vlgmr.msra.gmra.mrb[16].mxu0 %v4584_v1 }
  0x27   :  { %3963 = vmatpush3.bf16.msra.mxu0 %v4711_v12  ;;  %3974 = vmatprep.mubr.msk.bf16.mxu0 %vm4586_vm1, %v4585_v8 }
  0x28   :  { %3964 = vmatprep.subr.bf16.mxu0 %v4585_v8  ;;  %524 = vmatpush1.bf16.msra.mxu1 %v4721_v14 }
  0x29   :  { %525 = vmatprep.subr.bf16.mxu1 %v4738_v17 }
  0x2b   :  { %3965 = vmatpush3.bf16.msra.mxu0 %v4732_v16 }
  0x2c   :  { %3966 = vmatprep.subr.bf16.mxu0 %v4585_v8  ;;  %526 = vmatpush1.bf16.msra.mxu1 %v4753_v19 }
  0x2d   :  { %527 = vmatprep.subr.bf16.mxu1 %v4760_v20 }
  0x2f   :  { %3967 = vmatpush3.bf16.msra.mxu0 %v4747_v18 }
  0x30   :  { %3968 = vmatprep.subr.bf16.mxu0 %v4585_v8  ;;  %528 = vmatpush1.bf16.msra.mxu1 %v4773_v22 }
  0x31   :  { %529 = vmatprep.subr.bf16.mxu1 %v4780_v23 }
  0x33   :  { %3969 = vmatpush3.bf16.msra.mxu0 %v4767_v21 }
  0x34   :  { %3970 = vmatprep.subr.bf16.mxu0 %v4585_v8  ;;  %530 = vmatpush1.bf16.msra.mxu1 %v4794_v25 }
  0x35   :  { %653 = vmatprep.subr.bf16.mxu1 %v4680_v6 }
  0x37   :  { %3971 = vmatpush3.bf16.msra.mxu0 %v4788_v24 }
  0x38   :  { %3972 = vmatprep.subr.bf16.mxu0 %v4585_v8 }
  0x3b   :  { %3973 = vmatpush3.bf16.msra.mxu0 %v4802_v26 }
  0x3c   :  { %3978 = vmatprep.subr.bf16.mxu0 %v4585_v8 }
  0xd9   :  { %v3940_v35 = vpop.f32.mrb[0].mxu1  ;;  %v181_v36 = vpop.f32.mrb[0].mxu0 }
  0xda   :  { %v4853_v38 = vadd.f32 %v3940_v35, %v94_v33  ;;  %v254_v39 = vpop.f32.mrb[1].mxu1  ;;  %v183_v40 = vpop.f32.mrb[1].mxu0  ;;  %v182_v30 = vadd.f32 %v181_v36, %v86_v34 }
  0xdb   :  { %v3941_v41 = vpop.f32.mrb[2].mxu1  ;;  %v185_v42 = vpop.f32.mrb[2].mxu0  ;;  %v184_v35 = vadd.f32 %v183_v40, %v90_v37  ;;  %v255_v36 = vadd.f32 %v254_v39, %v94_v33 }
  0xdc   :  { %v4855_v43 = vadd.f32 %v3941_v41, %v94_v33  ;;  %v257_v44 = vpop.f32.mrb[3].mxu1  ;;  %v4857_v45 = vadd.f32 %v185_v42, %v86_v34  ;;  %v187_v46 = vpop.f32.mrb[3].mxu0 }
  0xdd   :  { %v4859_v47 = vadd.f32 %v257_v44, %v94_v33  ;;  %v4861_v48 = vadd.f32 %v187_v46, %v90_v37 }
  0xe1   :  { %v3944_v49 = vpop.f32.mrb[4].mxu1  ;;  %v191_v50 = vpop.f32.mrb[4].mxu0 }
  0xe2   :  { %v4863_v51 = vadd.f32 %v3944_v49, %v94_v33  ;;  %v270_v52 = vpop.f32.mrb[5].mxu1  ;;  %v4865_v53 = vadd.f32 %v191_v50, %v86_v34  ;;  %v193_v54 = vpop.f32.mrb[5].mxu0 }
  0xe3   :  { %v4867_v55 = vadd.f32 %v270_v52, %v94_v33  ;;  %v3945_v56 = vpop.f32.mrb[6].mxu1  ;;  %v4869_v57 = vadd.f32 %v193_v54, %v90_v37  ;;  %v195_v58 = vpop.f32.mrb[6].mxu0 }
  0xe4   :  { %v4871_v59 = vadd.f32 %v3945_v56, %v94_v33  ;;  %v273_v60 = vpop.f32.mrb[7].mxu1  ;;  %v4873_v61 = vadd.f32 %v195_v58, %v86_v34  ;;  %v197_v62 = vpop.f32.mrb[7].mxu0 }
  0xe5   :  { %v4875_v63 = vadd.f32 %v273_v60, %v94_v33  ;;  %v4877_v0 = vadd.f32 %v197_v62, %v90_v37 }
  0xe9   :  { %v201_v2 = vpop.f32.mrb[8].mxu0 }
  0xea   :  { %v4879_v3 = vadd.f32 %v201_v2, %v86_v34  ;;  %v203_v4 = vpop.f32.mrb[9].mxu0 }
  0xeb   :  { %v4881_v5 = vadd.f32 %v203_v4, %v90_v37  ;;  %v205_v13 = vpop.f32.mrb[10].mxu0 }
  0xec   :  { %v4883_v15 = vadd.f32 %v205_v13, %v86_v34  ;;  %v207_v27 = vpop.f32.mrb[11].mxu0 }
  0xed   :  { %v4885_v29 = vadd.f32 %v207_v27, %v90_v37 }
  0xf1   :  { %v211_v41 = vpop.f32.mrb[12].mxu0  ;;  %v419_v42 = vpop.f32.mrb[8].mxu1 }
  0xf2   :  { %v4887_v44 = vadd.f32 %v211_v41, %v86_v34  ;;  %v213_v46 = vpop.f32.mrb[13].mxu0  ;;  %v466_v49 = vadd.f32 %v419_v42, %v182_v30  ;;  %v421_v50 = vpop.f32.mrb[9].mxu1 }
  0xf3   :  { %v4889_v52 = vadd.f32 %v213_v46, %v90_v37  ;;  %v215_v54 = vpop.f32.mrb[14].mxu0  ;;  %v467_v56 = vadd.f32 %v421_v50, %v184_v35  ;;  %v423_v58 = vpop.f32.mrb[10].mxu1 }
  0xf4   :  { %v4891_v60 = vadd.f32 %v215_v54, %v86_v34  ;;  %v217_v62 = vpop.f32.mrb[15].mxu0  ;;  %4308 = vtanh.f32 %v466_v49  ;;  %v424_v2 = vpop.f32.mrb[11].mxu1  ;;  %v470_v42 = vmul.f32 0.5, %v466_v49 }
  0xf5   :  { %v4893_v4 = vadd.f32 %v217_v62, %v90_v37  ;;  %v471_v35 = vmul.f32 0.5, %v467_v56 }
  0xf6   :  { %4310 = vtanh.f32 %v470_v42 }
  0xf7   :  { %4312 = vtanh.f32 %v471_v35 }
  0xf9   :  { %v460_v40 = vpop.f32.mrb[16].mxu0 }
  0xfa   :  { %v468_v13 = vadd.f32 %v460_v40, %v255_v36  ;;  %v3960_v27 = vpop.f32.mrb[17].mxu0 }
  0xfb   :  { %v463_v41 = vpop.f32.mrb[18].mxu0 }
  0xfc   :  { %v3961_v32 = vpop.f32.mrb[19].mxu0 }
  0xfd   :  { %v472_v32 = vmul.f32 0.5, %v468_v13 }
  0xfe   :  { %v4309_v30 = vpop.eup %4308 }
  0xff   :  { %485 = vrot.lane.b32.xlu0 %v4309_v30, %s4587_s3  ;;  %4314 = vtanh.f32 %v472_v32 }
 0x100   :  { %v4311_v34 = vpop.eup %4310 }
 0x101   :  { %v4313_v46 = vpop.eup %4312  ;;  %v476_v50 = vmul.f32 0.5, %v4311_v34 }
 0x102   :  { %v477_v54 = vmul.f32 0.5, %v4313_v46 }
 0x103   :  { %v479_v37 = vadd.f32 0.5, %v476_v50 }
 0x104   :  { %v480_v58 = vadd.f32 0.5, %v477_v54 }
 0x106   :  { %v482_v27 = vmul.f32 0.0, %v480_v58 }
 0x109   :  { %v4315_v2 = vpop.eup %4314 }
 0x10a   :  { %v478_v49 = vmul.f32 0.5, %v4315_v2 }
 0x10c   :  { %v481_v56 = vadd.f32 0.5, %v478_v49 }
 0x10e   :  { %v483_v36 = vmul.f32 0.0, %v481_v56 }
 0x171   :  { %v486_v33 = vpop.permute.xlu0 %485 }
 0x172   :  { %v488_v39 = vmul.f32 %v486_v33, %v479_v37  ;;  %v489_v62 = vmul.f32 %v486_v33, %v480_v58 }
 0x174   :  { %494 = vrot.lane.b32.xlu1 %v489_v62, %s4587_s3  ;;  %492 = vrot.lane.b32.xlu0 %v488_v39, %s4587_s3 }
 0x1e6   :  { %v495_v40 = vpop.permute.xlu1 %494  ;;  %v493_v41 = vpop.permute.xlu0 %492 }
 0x1e7   :  { %v4898_v30 = vadd.f32 %v495_v40, %v483_v36  ;;  %v496_v42 = vsel %vm381_vm2, %v493_v41, %v495_v40 }
 0x1e8   :  { %v4901_v35 = vadd.f32 %v496_v42, %v482_v27 }
 0x1e9   :  { %4316 = vtanh.f32 %v4898_v30 }
 0x1ea   :  { %4318 = vtanh.f32 %v4901_v35 }
 0x1f3   :  { %v4317_v13 = vpop.eup %4316 }
 0x1f4   :  { %v4319_v34 = vpop.eup %4318  ;;  %507 = vrot.lane.b32.xlu0 %v4317_v13, %s4587_s3 }
 0x1f5   :  { %505 = vrot.lane.b32.xlu1 %v4319_v34, %s4587_s3 }
 0x266   :  { %v508_v46 = vpop.permute.xlu0 %507 }
 0x267   :  { %v506_v50 = vpop.permute.xlu1 %505 }
 0x268   :  { %v509_v54 = vsel %vm381_vm2, %v506_v50, %v508_v46 }
 0x269   :  { %v4908_v37 = vmul.f32 %v509_v54, %v481_v56 }
 0x26b   :  { %v512_v58 = vpack.c.bf16 %v4908_v37, %v4908_v37 }
 0x26d   :  { %514 = vrot.lane.b32.xlu1 %v512_v58, %s4587_s3 }
 0x2df   :  { %v515_v33 = vpop.permute.xlu1 %514 }
 0x2e0   :  { %3734 = vmatmul.mubr.msk.bf16.vlgmr.msra.gmra.mrb[12].mxu1 %vm381_vm2, %v515_v33  ;;  %3975 = vmatmul.mubr.msk.bf16.vlgmr.msra.gmra.mrb[20].mxu0 %vm381_vm2, %v515_v33 }
 0x2e1   :  { %654 = vmatpush1.bf16.msra.mxu1 %v4685_v7  ;;  %3979 = vmatpush3.bf16.msra.mxu0 %v4711_v12 }
 0x2e2   :  { %655 = vmatprep.subr.bf16.mxu1 %v4691_v9  ;;  %3980 = vmatprep.subr.bf16.mxu0 %v4585_v8 }
 0x2e3   :  { %685 = vmatprep.mubr.bf16.mxu1 %v4584_v1  ;;  %3990 = vmatprep.mubr.msk.bf16.mxu0 %vm4586_vm1, %v4585_v8 }
 0x2e5   :  { %656 = vmatpush1.bf16.msra.mxu1 %v4698_v10  ;;  %3981 = vmatpush3.bf16.msra.mxu0 %v4732_v16 }
 0x2e6   :  { %657 = vmatprep.subr.bf16.mxu1 %v4705_v11  ;;  %3982 = vmatprep.subr.bf16.mxu0 %v4585_v8 }
 0x2e9   :  { %658 = vmatpush1.bf16.msra.mxu1 %v4721_v14  ;;  %3983 = vmatpush3.bf16.msra.mxu0 %v4747_v18 }
 0x2ea   :  { %659 = vmatprep.subr.bf16.mxu1 %v4738_v17  ;;  %3984 = vmatprep.subr.bf16.mxu0 %v4585_v8 }
 0x2ed   :  { %660 = vmatpush1.bf16.msra.mxu1 %v4753_v19  ;;  %3985 = vmatpush3.bf16.msra.mxu0 %v4767_v21 }
 0x2ee   :  { %661 = vmatprep.subr.bf16.mxu1 %v4760_v20  ;;  %3986 = vmatprep.subr.bf16.mxu0 %v4585_v8 }
 0x2f1   :  { %662 = vmatpush1.bf16.msra.mxu1 %v4773_v22  ;;  %3987 = vmatpush3.bf16.msra.mxu0 %v4788_v24 }
 0x2f2   :  { %663 = vmatprep.subr.bf16.mxu1 %v4780_v23  ;;  %3988 = vmatprep.subr.bf16.mxu0 %v4585_v8 }
 0x2f5   :  { %664 = vmatpush1.bf16.msra.mxu1 %v4794_v25  ;;  %3989 = vmatpush3.bf16.msra.mxu0 %v4802_v26 }
 0x2f6   :  { %787 = vmatprep.subr.bf16.mxu1 %v4680_v6  ;;  %3994 = vmatprep.subr.bf16.mxu0 %v4585_v8 }
 0x3b3   :  { %v553_v39 = vpop.f32.mrb[12].mxu1  ;;  %v594_v62 = vpop.f32.mrb[20].mxu0 }
 0x3b4   :  { %v600_v32 = vadd.f32 %v553_v39, %v4857_v45  ;;  %v602_v2 = vadd.f32 %v594_v62, %v4859_v47  ;;  %v555_v49 = vpop.f32.mrb[13].mxu1  ;;  %v3976_v56 = vpop.f32.mrb[21].mxu0 }
 0x3b5   :  { %v601_v36 = vadd.f32 %v555_v49, %v4861_v48  ;;  %v557_v40 = vpop.f32.mrb[14].mxu1  ;;  %v597_v27 = vpop.f32.mrb[22].mxu0 }
 0x3b6   :  { %4320 = vtanh.f32 %v600_v32  ;;  %v558_v41 = vpop.f32.mrb[15].mxu1  ;;  %v3977_v42 = vpop.f32.mrb[23].mxu0  ;;  %v604_v34 = vmul.f32 0.5, %v600_v32  ;;  %v606_v49 = vmul.f32 0.5, %v602_v2 }
 0x3b7   :  { %v605_v46 = vmul.f32 0.5, %v601_v36 }
 0x3b8   :  { %4322 = vtanh.f32 %v604_v34 }
 0x3b9   :  { %4324 = vtanh.f32 %v605_v46 }
 0x3ba   :  { %4326 = vtanh.f32 %v606_v49 }
 0x3c0   :  { %v4321_v13 = vpop.eup %4320 }
 0x3c1   :  { %619 = vrot.lane.b32.xlu0 %v4321_v13, %s4587_s3 }
 0x3c2   :  { %v4323_v50 = vpop.eup %4322 }
 0x3c3   :  { %v4325_v45 = vpop.eup %4324  ;;  %v610_v54 = vmul.f32 0.5, %v4323_v50 }
 0x3c4   :  { %v611_v47 = vmul.f32 0.5, %v4325_v45  ;;  %v4327_v56 = vpop.eup %4326 }
 0x3c5   :  { %v613_v33 = vadd.f32 0.5, %v610_v54  ;;  %v612_v32 = vmul.f32 0.5, %v4327_v56 }
 0x3c6   :  { %v614_v58 = vadd.f32 0.5, %v611_v47 }
 0x3c7   :  { %v615_v36 = vadd.f32 0.5, %v612_v32 }
 0x3c8   :  { %v616_v42 = vmul.f32 %v614_v58, %v4901_v35 }
 0x3c9   :  { %v617_v40 = vmul.f32 %v615_v36, %v4898_v30 }
 0x433   :  { %v620_v39 = vpop.permute.xlu0 %619 }
 0x434   :  { %v622_v48 = vmul.f32 %v620_v39, %v613_v33  ;;  %v623_v62 = vmul.f32 %v620_v39, %v614_v58 }
 0x436   :  { %626 = vrot.lane.b32.xlu1 %v622_v48, %s4587_s3  ;;  %628 = vrot.lane.b32.xlu0 %v623_v62, %s4587_s3 }
 0x4a8   :  { %v627_v27 = vpop.permute.xlu1 %626  ;;  %v629_v41 = vpop.permute.xlu0 %628 }
 0x4a9   :  { %v630_v13 = vsel %vm381_vm2, %v627_v27, %v629_v41  ;;  %v4951_v34 = vadd.f32 %v629_v41, %v617_v40 }
 0x4aa   :  { %v4953_v46 = vadd.f32 %v630_v13, %v616_v42 }
 0x4ab   :  { %4328 = vtanh.f32 %v4951_v34 }
 0x4ac   :  { %4330 = vtanh.f32 %v4953_v46 }
 0x4b5   :  { %v4329_v2 = vpop.eup %4328 }
 0x4b6   :  { %v4331_v50 = vpop.eup %4330  ;;  %641 = vrot.lane.b32.xlu0 %v4329_v2, %s4587_s3 }
 0x4b7   :  { %639 = vrot.lane.b32.xlu1 %v4331_v50, %s4587_s3 }
 0x528   :  { %v642_v30 = vpop.permute.xlu0 %641 }
 0x529   :  { %v640_v45 = vpop.permute.xlu1 %639 }
 0x52a   :  { %v643_v35 = vsel %vm381_vm2, %v640_v45, %v642_v30 }
 0x52b   :  { %v4960_v54 = vmul.f32 %v643_v35, %v615_v36 }
 0x52d   :  { %v646_v47 = vpack.c.bf16 %v4960_v54, %v4960_v54 }
 0x52f   :  { %648 = vrot.lane.b32.xlu1 %v646_v47, %s4587_s3 }
 0x5a1   :  { %v649_v58 = vpop.permute.xlu1 %648 }
 0x5a2   :  { %3736 = vmatmul.mubr.msk.bf16.vlgmr.msra.gmra.mrb[16].mxu1 %vm381_vm2, %v649_v58  ;;  %3991 = vmatmul.mubr.msk.bf16.vlgmr.msra.gmra.mrb[24].mxu0 %vm381_vm2, %v649_v58 }
 0x5a3   :  { %788 = vmatpush1.bf16.msra.mxu1 %v4685_v7  ;;  %3995 = vmatpush3.bf16.msra.mxu0 %v4711_v12 }
 0x5a4   :  { %789 = vmatprep.subr.bf16.mxu1 %v4691_v9  ;;  %3996 = vmatprep.subr.bf16.mxu0 %v4585_v8 }
 0x5a5   :  { %819 = vmatprep.mubr.bf16.mxu1 %v4584_v1  ;;  %4006 = vmatprep.mubr.msk.bf16.mxu0 %vm4586_vm1, %v4585_v8 }
 0x5a7   :  { %790 = vmatpush1.bf16.msra.mxu1 %v4698_v10  ;;  %3997 = vmatpush3.bf16.msra.mxu0 %v4732_v16 }
 0x5a8   :  { %791 = vmatprep.subr.bf16.mxu1 %v4705_v11  ;;  %3998 = vmatprep.subr.bf16.mxu0 %v4585_v8 }
 0x5ab   :  { %792 = vmatpush1.bf16.msra.mxu1 %v4721_v14  ;;  %3999 = vmatpush3.bf16.msra.mxu0 %v4747_v18 }
 0x5ac   :  { %793 = vmatprep.subr.bf16.mxu1 %v4738_v17  ;;  %4000 = vmatprep.subr.bf16.mxu0 %v4585_v8 }
 0x5af   :  { %794 = vmatpush1.bf16.msra.mxu1 %v4753_v19  ;;  %4001 = vmatpush3.bf16.msra.mxu0 %v4767_v21 }
 0x5b0   :  { %795 = vmatprep.subr.bf16.mxu1 %v4760_v20  ;;  %4002 = vmatprep.subr.bf16.mxu0 %v4585_v8 }
 0x5b3   :  { %796 = vmatpush1.bf16.msra.mxu1 %v4773_v22  ;;  %4003 = vmatpush3.bf16.msra.mxu0 %v4788_v24 }
 0x5b4   :  { %797 = vmatprep.subr.bf16.mxu1 %v4780_v23  ;;  %4004 = vmatprep.subr.bf16.mxu0 %v4585_v8 }
 0x5b7   :  { %798 = vmatpush1.bf16.msra.mxu1 %v4794_v25  ;;  %4005 = vmatpush3.bf16.msra.mxu0 %v4802_v26 }
 0x5b8   :  { %921 = vmatprep.subr.bf16.mxu1 %v4680_v6  ;;  %4010 = vmatprep.subr.bf16.mxu0 %v4585_v8 }
 0x675   :  { %v687_v33 = vpop.f32.mrb[16].mxu1  ;;  %v728_v39 = vpop.f32.mrb[24].mxu0 }
 0x676   :  { %v734_v48 = vadd.f32 %v687_v33, %v4865_v53  ;;  %v736_v62 = vadd.f32 %v728_v39, %v4853_v38  ;;  %v689_v49 = vpop.f32.mrb[17].mxu1  ;;  %v3992_v56 = vpop.f32.mrb[25].mxu0 }
 0x677   :  { %v735_v32 = vadd.f32 %v689_v49, %v4869_v57  ;;  %v691_v36 = vpop.f32.mrb[18].mxu1  ;;  %v731_v40 = vpop.f32.mrb[26].mxu0 }
 0x678   :  { %4332 = vtanh.f32 %v734_v48  ;;  %v692_v27 = vpop.f32.mrb[19].mxu1  ;;  %v3993_v41 = vpop.f32.mrb[27].mxu0  ;;  %v738_v13 = vmul.f32 0.5, %v734_v48  ;;  %v740_v33 = vmul.f32 0.5, %v736_v62 }
 0x679   :  { %v739_v2 = vmul.f32 0.5, %v735_v32 }
 0x67a   :  { %4334 = vtanh.f32 %v738_v13 }
 0x67b   :  { %4336 = vtanh.f32 %v739_v2 }
 0x67c   :  { %4338 = vtanh.f32 %v740_v33 }
 0x682   :  { %v4333_v42 = vpop.eup %4332 }
 0x683   :  { %753 = vrot.lane.b32.xlu0 %v4333_v42, %s4587_s3 }
 0x684   :  { %v4335_v50 = vpop.eup %4334 }
 0x685   :  { %v4337_v53 = vpop.eup %4336  ;;  %v744_v30 = vmul.f32 0.5, %v4335_v50 }
 0x686   :  { %v745_v38 = vmul.f32 0.5, %v4337_v53  ;;  %v4339_v39 = vpop.eup %4338 }
 0x687   :  { %v747_v35 = vadd.f32 0.5, %v744_v30  ;;  %v746_v48 = vmul.f32 0.5, %v4339_v39 }
 0x688   :  { %v748_v45 = vadd.f32 0.5, %v745_v38 }
 0x689   :  { %v749_v49 = vadd.f32 0.5, %v746_v48 }
 0x68a   :  { %v750_v40 = vmul.f32 %v748_v45, %v4953_v46 }
 0x68b   :  { %v751_v56 = vmul.f32 %v749_v49, %v4951_v34 }
 0x6f5   :  { %v754_v47 = vpop.permute.xlu0 %753 }
 0x6f6   :  { %v756_v57 = vmul.f32 %v754_v47, %v747_v35  ;;  %v757_v58 = vmul.f32 %v754_v47, %v748_v45 }
 0x6f8   :  { %760 = vrot.lane.b32.xlu1 %v756_v57, %s4587_s3  ;;  %762 = vrot.lane.b32.xlu0 %v757_v58, %s4587_s3 }
 0x76a   :  { %v761_v32 = vpop.permute.xlu1 %760  ;;  %v763_v36 = vpop.permute.xlu0 %762 }
 0x76b   :  { %v764_v27 = vsel %vm381_vm2, %v761_v32, %v763_v36  ;;  %v5003_v41 = vadd.f32 %v763_v36, %v751_v56 }
 0x76c   :  { %v5005_v42 = vadd.f32 %v764_v27, %v750_v40 }
 0x76d   :  { %4340 = vtanh.f32 %v5003_v41 }
 0x76e   :  { %4342 = vtanh.f32 %v5005_v42 }
 0x777   :  { %v4341_v62 = vpop.eup %4340 }
 0x778   :  { %v4343_v13 = vpop.eup %4342  ;;  %775 = vrot.lane.b32.xlu0 %v4341_v62, %s4587_s3 }
 0x779   :  { %773 = vrot.lane.b32.xlu1 %v4343_v13, %s4587_s3 }
 0x7ea   :  { %v776_v34 = vpop.permute.xlu0 %775 }
 0x7eb   :  { %v774_v2 = vpop.permute.xlu1 %773 }
 0x7ec   :  { %v777_v46 = vsel %vm381_vm2, %v774_v2, %v776_v34 }
 0x7ed   :  { %v5012_v50 = vmul.f32 %v777_v46, %v749_v49 }
 0x7ef   :  { %v780_v53 = vpack.c.bf16 %v5012_v50, %v5012_v50 }
 0x7f1   :  { %782 = vrot.lane.b32.xlu1 %v780_v53, %s4587_s3 }
 0x863   :  { %v783_v30 = vpop.permute.xlu1 %782 }
 0x864   :  { %3738 = vmatmul.mubr.msk.bf16.vlgmr.msra.gmra.mrb[20].mxu1 %vm381_vm2, %v783_v30  ;;  %4007 = vmatmul.mubr.msk.bf16.vlgmr.msra.gmra.mrb[28].mxu0 %vm381_vm2, %v783_v30 }
 0x865   :  { %922 = vmatpush1.bf16.msra.mxu1 %v4685_v7  ;;  %4011 = vmatpush3.bf16.msra.mxu0 %v4711_v12 }
 0x866   :  { %923 = vmatprep.subr.bf16.mxu1 %v4691_v9  ;;  %4012 = vmatprep.subr.bf16.mxu0 %v4585_v8 }
 0x867   :  { %953 = vmatprep.mubr.bf16.mxu1 %v4584_v1  ;;  %4022 = vmatprep.mubr.msk.bf16.mxu0 %vm4586_vm1, %v4585_v8 }
 0x869   :  { %924 = vmatpush1.bf16.msra.mxu1 %v4698_v10  ;;  %4013 = vmatpush3.bf16.msra.mxu0 %v4732_v16 }
 0x86a   :  { %925 = vmatprep.subr.bf16.mxu1 %v4705_v11  ;;  %4014 = vmatprep.subr.bf16.mxu0 %v4585_v8 }
 0x86d   :  { %926 = vmatpush1.bf16.msra.mxu1 %v4721_v14  ;;  %4015 = vmatpush3.bf16.msra.mxu0 %v4747_v18 }
 0x86e   :  { %927 = vmatprep.subr.bf16.mxu1 %v4738_v17  ;;  %4016 = vmatprep.subr.bf16.mxu0 %v4585_v8 }
 0x871   :  { %928 = vmatpush1.bf16.msra.mxu1 %v4753_v19  ;;  %4017 = vmatpush3.bf16.msra.mxu0 %v4767_v21 }
 0x872   :  { %929 = vmatprep.subr.bf16.mxu1 %v4760_v20  ;;  %4018 = vmatprep.subr.bf16.mxu0 %v4585_v8 }
 0x875   :  { %930 = vmatpush1.bf16.msra.mxu1 %v4773_v22  ;;  %4019 = vmatpush3.bf16.msra.mxu0 %v4788_v24 }
 0x876   :  { %931 = vmatprep.subr.bf16.mxu1 %v4780_v23  ;;  %4020 = vmatprep.subr.bf16.mxu0 %v4585_v8 }
 0x879   :  { %932 = vmatpush1.bf16.msra.mxu1 %v4794_v25  ;;  %4021 = vmatpush3.bf16.msra.mxu0 %v4802_v26 }
 0x87a   :  { %1055 = vmatprep.subr.bf16.mxu1 %v4680_v6  ;;  %4026 = vmatprep.subr.bf16.mxu0 %v4585_v8 }
 0x937   :  { %v821_v38 = vpop.f32.mrb[20].mxu1  ;;  %v862_v45 = vpop.f32.mrb[28].mxu0 }
 0x938   :  { %v868_v35 = vadd.f32 %v821_v38, %v4873_v61  ;;  %v870_v47 = vadd.f32 %v862_v45, %v4855_v43  ;;  %v823_v57 = vpop.f32.mrb[21].mxu1  ;;  %v4008_v58 = vpop.f32.mrb[29].mxu0 }
 0x939   :  { %v869_v33 = vadd.f32 %v823_v57, %v4877_v0  ;;  %v825_v39 = vpop.f32.mrb[22].mxu1  ;;  %v865_v48 = vpop.f32.mrb[30].mxu0 }
 0x93a   :  { %4344 = vtanh.f32 %v868_v35  ;;  %v826_v49 = vpop.f32.mrb[23].mxu1  ;;  %v4009_v56 = vpop.f32.mrb[31].mxu0  ;;  %v872_v36 = vmul.f32 0.5, %v868_v35  ;;  %v874_v53 = vmul.f32 0.5, %v870_v47 }
 0x93b   :  { %v873_v40 = vmul.f32 0.5, %v869_v33 }
 0x93c   :  { %4346 = vtanh.f32 %v872_v36 }
 0x93d   :  { %4348 = vtanh.f32 %v873_v40 }
 0x93e   :  { %4350 = vtanh.f32 %v874_v53 }
 0x944   :  { %v4345_v32 = vpop.eup %4344 }
 0x945   :  { %887 = vrot.lane.b32.xlu0 %v4345_v32, %s4587_s3 }
 0x946   :  { %v4347_v27 = vpop.eup %4346 }
 0x947   :  { %v4349_v61 = vpop.eup %4348  ;;  %v878_v62 = vmul.f32 0.5, %v4347_v27 }
 0x948   :  { %v879_v43 = vmul.f32 0.5, %v4349_v61  ;;  %v4351_v30 = vpop.eup %4350 }
 0x949   :  { %v881_v34 = vadd.f32 0.5, %v878_v62  ;;  %v880_v38 = vmul.f32 0.5, %v4351_v30 }
 0x94a   :  { %v882_v13 = vadd.f32 0.5, %v879_v43 }
 0x94b   :  { %v883_v45 = vadd.f32 0.5, %v880_v38 }
 0x94c   :  { %v884_v33 = vmul.f32 %v882_v13, %v5005_v42 }
 0x94d   :  { %v885_v35 = vmul.f32 %v883_v45, %v5003_v41 }
 0x9b7   :  { %v888_v2 = vpop.permute.xlu0 %887 }
 0x9b8   :  { %v890_v0 = vmul.f32 %v888_v2, %v881_v34  ;;  %v891_v46 = vmul.f32 %v888_v2, %v882_v13 }
 0x9ba   :  { %894 = vrot.lane.b32.xlu1 %v890_v0, %s4587_s3  ;;  %896 = vrot.lane.b32.xlu0 %v891_v46, %s4587_s3 }
 0xa2c   :  { %v895_v57 = vpop.permute.xlu1 %894  ;;  %v897_v58 = vpop.permute.xlu0 %896 }
 0xa2d   :  { %v898_v39 = vsel %vm381_vm2, %v895_v57, %v897_v58  ;;  %v5055_v48 = vadd.f32 %v897_v58, %v885_v35 }
 0xa2e   :  { %v5057_v49 = vadd.f32 %v898_v39, %v884_v33 }
 0xa2f   :  { %4352 = vtanh.f32 %v5055_v48 }
 0xa30   :  { %4354 = vtanh.f32 %v5057_v49 }
 0xa39   :  { %v4353_v47 = vpop.eup %4352 }
 0xa3a   :  { %v4355_v56 = vpop.eup %4354  ;;  %909 = vrot.lane.b32.xlu0 %v4353_v47, %s4587_s3 }
 0xa3b   :  { %907 = vrot.lane.b32.xlu1 %v4355_v56, %s4587_s3 }
 0xaac   :  { %v910_v41 = vpop.permute.xlu0 %909 }
 0xaad   :  { %v908_v32 = vpop.permute.xlu1 %907 }
 0xaae   :  { %v911_v42 = vsel %vm381_vm2, %v908_v32, %v910_v41 }
 0xaaf   :  { %v5064_v36 = vmul.f32 %v911_v42, %v883_v45 }
 0xab1   :  { %v914_v40 = vpack.c.bf16 %v5064_v36, %v5064_v36 }
 0xab3   :  { %916 = vrot.lane.b32.xlu1 %v914_v40, %s4587_s3 }
 0xb25   :  { %v917_v27 = vpop.permute.xlu1 %916 }
 0xb26   :  { %3740 = vmatmul.mubr.msk.bf16.vlgmr.msra.gmra.mrb[24].mxu1 %vm381_vm2, %v917_v27  ;;  %4023 = vmatmul.mubr.msk.bf16.vlgmr.msra.gmra.mrb[32].mxu0 %vm381_vm2, %v917_v27 }
 0xb27   :  { %1056 = vmatpush1.bf16.msra.mxu1 %v4685_v7  ;;  %4027 = vmatpush3.bf16.msra.mxu0 %v4711_v12 }
 0xb28   :  { %1057 = vmatprep.subr.bf16.mxu1 %v4691_v9  ;;  %4028 = vmatprep.subr.bf16.mxu0 %v4585_v8 }
 0xb29   :  { %1087 = vmatprep.mubr.bf16.mxu1 %v4584_v1  ;;  %4038 = vmatprep.mubr.msk.bf16.mxu0 %vm4586_vm1, %v4585_v8 }
 0xb2b   :  { %1058 = vmatpush1.bf16.msra.mxu1 %v4698_v10  ;;  %4029 = vmatpush3.bf16.msra.mxu0 %v4732_v16 }
 0xb2c   :  { %1059 = vmatprep.subr.bf16.mxu1 %v4705_v11  ;;  %4030 = vmatprep.subr.bf16.mxu0 %v4585_v8 }
 0xb2f   :  { %1060 = vmatpush1.bf16.msra.mxu1 %v4721_v14  ;;  %4031 = vmatpush3.bf16.msra.mxu0 %v4747_v18 }
 0xb30   :  { %1061 = vmatprep.subr.bf16.mxu1 %v4738_v17  ;;  %4032 = vmatprep.subr.bf16.mxu0 %v4585_v8 }
 0xb33   :  { %1062 = vmatpush1.bf16.msra.mxu1 %v4753_v19  ;;  %4033 = vmatpush3.bf16.msra.mxu0 %v4767_v21 }
 0xb34   :  { %1063 = vmatprep.subr.bf16.mxu1 %v4760_v20  ;;  %4034 = vmatprep.subr.bf16.mxu0 %v4585_v8 }
 0xb37   :  { %1064 = vmatpush1.bf16.msra.mxu1 %v4773_v22  ;;  %4035 = vmatpush3.bf16.msra.mxu0 %v4788_v24 }
 0xb38   :  { %1065 = vmatprep.subr.bf16.mxu1 %v4780_v23  ;;  %4036 = vmatprep.subr.bf16.mxu0 %v4585_v8 }
 0xb3b   :  { %1066 = vmatpush1.bf16.msra.mxu1 %v4794_v25  ;;  %4037 = vmatpush3.bf16.msra.mxu0 %v4802_v26 }
 0xb3c   :  { %1189 = vmatprep.subr.bf16.mxu1 %v4680_v6  ;;  %4042 = vmatprep.subr.bf16.mxu0 %v4585_v8 }
 0xbf9   :  { %v955_v7 = vpop.f32.mrb[24].mxu1  ;;  %v996_v9 = vpop.f32.mrb[32].mxu0 }
 0xbfa   :  { %v1002_v10 = vadd.f32 %v955_v7, %v4879_v3  ;;  %v1004_v11 = vadd.f32 %v996_v9, %v4867_v55  ;;  %v957_v12 = vpop.f32.mrb[25].mxu1  ;;  %v4024_v14 = vpop.f32.mrb[33].mxu0  ;;  %v5126_v7 = vld [vmem:[%s5981_s2] ss:$12 sps:$4 sm:$0xff]   ;;  %v5132_v9 = vld [vmem:[%s5981_s2 + $0x8] ss:$12 sps:$4 sm:$0xff]  }
 0xbfb   :  { %v1003_v16 = vadd.f32 %v957_v12, %v4881_v5  ;;  %v959_v17 = vpop.f32.mrb[26].mxu1  ;;  %v999_v18 = vpop.f32.mrb[34].mxu0  ;;  %v5154_v12 = vld [vmem:[%s5981_s2 + $0x20] ss:$12 sps:$4 sm:$0xff]  }
 0xbfc   :  { %4356 = vtanh.f32 %v1002_v10  ;;  %v960_v19 = vpop.f32.mrb[27].mxu1  ;;  %v4025_v20 = vpop.f32.mrb[35].mxu0  ;;  %v1006_v6 = vmul.f32 0.5, %v1002_v10  ;;  %v1008_v46 = vmul.f32 0.5, %v1004_v11  ;;  %v5138_v10 = vld [vmem:[%s5981_s2 + $0x1c] ss:$12 sps:$4 sm:$0xff]  }
 0xbfd   :  { %v1007_v61 = vmul.f32 0.5, %v1003_v16  ;;  %v5148_v11 = vld [vmem:[%s5981_s2 + $0x18] ss:$12 sps:$4 sm:$0xff]   ;;  %v5160_v14 = vld [vmem:[%s5981_s2 + $0x34] ss:$12 sps:$4 sm:$0xff]  }
 0xbfe   :  { %4358 = vtanh.f32 %v1006_v6  ;;  %v5167_v16 = vld [vmem:[%s5981_s2 + $0x30] ss:$12 sps:$4 sm:$0xff]   ;;  %v5173_v17 = vld [vmem:[%s5981_s2 + $0x38] ss:$12 sps:$4 sm:$0xff]   ;;  %v5186_v19 = vld [vmem:[%s5981_s2 + $0x48] ss:$12 sps:$4 sm:$0xff]  }
 0xbff   :  { %4360 = vtanh.f32 %v1007_v61  ;;  %v5179_v18 = vld [vmem:[%s5981_s2 + $0x4c] ss:$12 sps:$4 sm:$0xff]   ;;  %v5193_v20 = vld [vmem:[%s5981_s2 + $0x64] ss:$12 sps:$4 sm:$0xff]  }
 0xc00   :  { %4362 = vtanh.f32 %v1008_v46 }
 0xc06   :  { %v4357_v22 = vpop.eup %4356 }
 0xc07   :  { %1021 = vrot.lane.b32.xlu0 %v4357_v22, %s4587_s3  ;;  %v5200_v22 = vld [vmem:[%s5981_s2 + $0x60] ss:$12 sps:$4 sm:$0xff]  }
 0xc08   :  { %v4359_v62 = vpop.eup %4358 }
 0xc09   :  { %v4361_v3 = vpop.eup %4360  ;;  %v1012_v43 = vmul.f32 0.5, %v4359_v62 }
 0xc0a   :  { %v1013_v55 = vmul.f32 0.5, %v4361_v3  ;;  %v4363_v53 = vpop.eup %4362 }
 0xc0b   :  { %v1015_v34 = vadd.f32 0.5, %v1012_v43  ;;  %v1014_v30 = vmul.f32 0.5, %v4363_v53 }
 0xc0c   :  { %v1016_v13 = vadd.f32 0.5, %v1013_v55 }
 0xc0d   :  { %v1017_v38 = vadd.f32 0.5, %v1014_v30 }
 0xc0e   :  { %v1018_v58 = vmul.f32 %v1016_v13, %v5057_v49 }
 0xc0f   :  { %v1019_v45 = vmul.f32 %v1017_v38, %v5055_v48 }
 0xc79   :  { %v1022_v2 = vpop.permute.xlu0 %1021 }
 0xc7a   :  { %v1024_v5 = vmul.f32 %v1022_v2, %v1015_v34  ;;  %v1025_v0 = vmul.f32 %v1022_v2, %v1016_v13 }
 0xc7c   :  { %1028 = vrot.lane.b32.xlu1 %v1024_v5, %s4587_s3  ;;  %1030 = vrot.lane.b32.xlu0 %v1025_v0, %s4587_s3 }
 0xcee   :  { %v1029_v35 = vpop.permute.xlu1 %1028  ;;  %v1031_v57 = vpop.permute.xlu0 %1030 }
 0xcef   :  { %v1032_v33 = vsel %vm381_vm2, %v1029_v35, %v1031_v57  ;;  %v5107_v39 = vadd.f32 %v1031_v57, %v1019_v45 }
 0xcf0   :  { %v5109_v47 = vadd.f32 %v1032_v33, %v1018_v58 }
 0xcf1   :  { %4364 = vtanh.f32 %v5107_v39 }
 0xcf2   :  { %4366 = vtanh.f32 %v5109_v47 }
 0xcfb   :  { %v4365_v56 = vpop.eup %4364 }
 0xcfc   :  { %v4367_v41 = vpop.eup %4366  ;;  %1043 = vrot.lane.b32.xlu0 %v4365_v56, %s4587_s3 }
 0xcfd   :  { %1041 = vrot.lane.b32.xlu1 %v4367_v41, %s4587_s3 }
 0xd6e   :  { %v1044_v48 = vpop.permute.xlu0 %1043 }
 0xd6f   :  { %v1042_v32 = vpop.permute.xlu1 %1041 }
 0xd70   :  { %v1045_v49 = vsel %vm381_vm2, %v1042_v32, %v1044_v48 }
 0xd71   :  { %v5116_v42 = vmul.f32 %v1045_v49, %v1017_v38 }
 0xd73   :  { %v1048_v40 = vpack.c.bf16 %v5116_v42, %v5116_v42 }
 0xd75   :  { %1050 = vrot.lane.b32.xlu1 %v1048_v40, %s4587_s3 }
 0xde7   :  { %v1051_v27 = vpop.permute.xlu1 %1050 }
 0xde8   :  { %3742 = vmatmul.mubr.msk.bf16.vlgmr.msra.gmra.mrb[28].mxu1 %vm381_vm2, %v1051_v27  ;;  %4039 = vmatmul.mubr.msk.bf16.vlgmr.msra.gmra.mrb[36].mxu0 %vm381_vm2, %v1051_v27 }
 0xde9   :  { %1190 = vmatpush1.bf16.msra.mxu1 %v5126_v7  ;;  %4043 = vmatpush3.bf16.msra.mxu0 %v5132_v9 }
 0xdea   :  { %1191 = vmatprep.subr.bf16.mxu1 %v5138_v10  ;;  %4044 = vmatprep.subr.bf16.mxu0 %v4585_v8 }
 0xdeb   :  { %1221 = vmatprep.mubr.bf16.mxu1 %v4584_v1  ;;  %4054 = vmatprep.mubr.msk.bf16.mxu0 %vm4586_vm1, %v4585_v8 }
 0xded   :  { %1192 = vmatpush1.bf16.msra.mxu1 %v5148_v11  ;;  %4045 = vmatpush3.bf16.msra.mxu0 %v5154_v12 }
 0xdee   :  { %1193 = vmatprep.subr.bf16.mxu1 %v5160_v14  ;;  %4046 = vmatprep.subr.bf16.mxu0 %v4585_v8 }
 0xdf1   :  { %1194 = vmatpush1.bf16.msra.mxu1 %v5167_v16  ;;  %4047 = vmatpush3.bf16.msra.mxu0 %v5173_v17 }
 0xdf2   :  { %1195 = vmatprep.subr.bf16.mxu1 %v5179_v18  ;;  %4048 = vmatprep.subr.bf16.mxu0 %v4585_v8 }
 0xdf5   :  { %1196 = vmatpush1.bf16.msra.mxu1 %v5186_v19  ;;  %4049 = vmatpush3.bf16.msra.mxu0 %v4767_v21  ;;  %v4578_v21 = vld [vmem:[%s5981_s2 + $0x4] ss:$12 sps:$4 sm:$0xff]  }
 0xdf6   :  { %1197 = vmatprep.subr.bf16.mxu1 %v5193_v20  ;;  %4050 = vmatprep.subr.bf16.mxu0 %v4585_v8 }
 0xdf9   :  { %1198 = vmatpush1.bf16.msra.mxu1 %v5200_v22  ;;  %4051 = vmatpush3.bf16.msra.mxu0 %v4788_v24 }
 0xdfa   :  { %1199 = vmatprep.subr.bf16.mxu1 %v4780_v23  ;;  %4052 = vmatprep.subr.bf16.mxu0 %v4585_v8 }
 0xdfd   :  { %1200 = vmatpush1.bf16.msra.mxu1 %v4794_v25  ;;  %4053 = vmatpush3.bf16.msra.mxu0 %v4802_v26 }
 0xdfe   :  { %1323 = vmatprep.subr.bf16.mxu1 %v4578_v21  ;;  %4058 = vmatprep.subr.bf16.mxu0 %v4585_v8 }
 0xebb   :  { %v1089_v6 = vpop.f32.mrb[28].mxu1  ;;  %v1130_v61 = vpop.f32.mrb[36].mxu0 }
 0xebc   :  { %v1136_v62 = vadd.f32 %v1089_v6, %v4883_v15  ;;  %v1138_v24 = vadd.f32 %v1130_v61, %v4875_v63  ;;  %v1091_v23 = vpop.f32.mrb[29].mxu1  ;;  %v4040_v3 = vpop.f32.mrb[37].mxu0 }
 0xebd   :  { %v1137_v43 = vadd.f32 %v1091_v23, %v4885_v29  ;;  %v1093_v25 = vpop.f32.mrb[30].mxu1  ;;  %v1133_v55 = vpop.f32.mrb[38].mxu0 }
 0xebe   :  { %4368 = vtanh.f32 %v1136_v62  ;;  %v1094_v26 = vpop.f32.mrb[31].mxu1  ;;  %v4041_v13 = vpop.f32.mrb[39].mxu0  ;;  %v1140_v2 = vmul.f32 0.5, %v1136_v62  ;;  %v1142_v35 = vmul.f32 0.5, %v1138_v24 }
 0xebf   :  { %v1141_v5 = vmul.f32 0.5, %v1137_v43 }
 0xec0   :  { %4370 = vtanh.f32 %v1140_v2 }
 0xec1   :  { %4372 = vtanh.f32 %v1141_v5 }
 0xec2   :  { %4374 = vtanh.f32 %v1142_v35 }
 0xec8   :  { %v4369_v34 = vpop.eup %4368 }
 0xec9   :  { %1155 = vrot.lane.b32.xlu0 %v4369_v34, %s4587_s3 }
 0xeca   :  { %v4371_v0 = vpop.eup %4370 }
 0xecb   :  { %v4373_v15 = vpop.eup %4372  ;;  %v1146_v46 = vmul.f32 0.5, %v4371_v0 }
 0xecc   :  { %v1147_v63 = vmul.f32 0.5, %v4373_v15  ;;  %v4375_v57 = vpop.eup %4374 }
 0xecd   :  { %v1149_v30 = vadd.f32 0.5, %v1146_v46  ;;  %v1148_v58 = vmul.f32 0.5, %v4375_v57 }
 0xece   :  { %v1150_v53 = vadd.f32 0.5, %v1147_v63 }
 0xecf   :  { %v1151_v33 = vadd.f32 0.5, %v1148_v58 }
 0xed0   :  { %v1152_v32 = vmul.f32 %v1150_v53, %v5109_v47 }
 0xed1   :  { %v1153_v56 = vmul.f32 %v1151_v33, %v5107_v39 }
 0xf3b   :  { %v1156_v38 = vpop.permute.xlu0 %1155 }
 0xf3c   :  { %v1158_v29 = vmul.f32 %v1156_v38, %v1149_v30  ;;  %v1159_v45 = vmul.f32 %v1156_v38, %v1150_v53 }
 0xf3e   :  { %1162 = vrot.lane.b32.xlu1 %v1158_v29, %s4587_s3  ;;  %1164 = vrot.lane.b32.xlu0 %v1159_v45, %s4587_s3 }
 0xfb0   :  { %v1163_v41 = vpop.permute.xlu1 %1162  ;;  %v1165_v48 = vpop.permute.xlu0 %1164 }
 0xfb1   :  { %v1166_v49 = vsel %vm381_vm2, %v1163_v41, %v1165_v48  ;;  %v5221_v40 = vadd.f32 %v1165_v48, %v1153_v56  ;;  %v4270_v48 = vld [vmem:[%s5983_s4 + $0x4] ss:$8 sps:$4 sm:$0xff]  }
 0xfb2   :  { %v5223_v27 = vadd.f32 %v1166_v49, %v1152_v32 }
 0xfb3   :  { %4376 = vtanh.f32 %v5221_v40 }
 0xfb4   :  { %4378 = vtanh.f32 %v5223_v27 }
 0xfbd   :  { %v4377_v21 = vpop.eup %4376 }
 0xfbe   :  { %v4379_v6 = vpop.eup %4378  ;;  %1177 = vrot.lane.b32.xlu0 %v4377_v21, %s4587_s3 }
 0xfbf   :  { %1175 = vrot.lane.b32.xlu1 %v4379_v6, %s4587_s3 }
0x1030   :  { %v1178_v39 = vpop.permute.xlu0 %1177 }
0x1031   :  { %v1176_v61 = vpop.permute.xlu1 %1175 }
0x1032   :  { %v1179_v47 = vsel %vm381_vm2, %v1176_v61, %v1178_v39 }
0x1033   :  { %v5230_v62 = vmul.f32 %v1179_v47, %v1151_v33 }
0x1035   :  { %v1182_v24 = vpack.c.bf16 %v5230_v62, %v5230_v62 }
0x1037   :  { %1184 = vrot.lane.b32.xlu1 %v1182_v24, %s4587_s3  ;;  %v4273_v24 = vld [vmem:[%s5983_s4 + $0x14] ss:$8 sps:$4 sm:$0xff]  }
0x10a9   :  { %v1185_v23 = vpop.permute.xlu1 %1184 }
0x10aa   :  { %3744 = vmatmul.mubr.msk.bf16.vlgmr.msra.gmra.mrb[32].mxu1 %vm381_vm2, %v1185_v23  ;;  %4055 = vmatmul.mubr.msk.bf16.vlgmr.msra.gmra.mrb[40].mxu0 %vm381_vm2, %v1185_v23  ;;  %v5321_v23 = vld [vmem:[%s5984_s5 + $0x14] ss:$8 sps:$4 sm:$0xff]  }
0x10ab   :  { %1324 = vmatpush1.bf16.msra.mxu1 %v5126_v7  ;;  %4059 = vmatpush3.bf16.msra.mxu0 %v5132_v9  ;;  %v4579_v7 = vld [vmem:[%s5981_s2 + $0x50] ss:$12 sps:$4 sm:$0xff]   ;;  %v4580_v9 = vld [vmem:[%s5981_s2 + $0x68] ss:$12 sps:$4 sm:$0xff]  }
0x10ac   :  { %1325 = vmatprep.subr.bf16.mxu1 %v5138_v10  ;;  %4060 = vmatprep.subr.bf16.mxu0 %v4585_v8  ;;  %v4581_v10 = vld [vmem:[%s5981_s2 + $0x7c] ss:$12 sps:$4 sm:$0xff]  }
0x10ad   :  { %1355 = vmatprep.mubr.bf16.mxu1 %v4584_v1  ;;  %4070 = vmatprep.mubr.msk.bf16.mxu0 %vm4586_vm1, %v4585_v8 }
0x10af   :  { %1326 = vmatpush1.bf16.msra.mxu1 %v5148_v11  ;;  %4061 = vmatpush3.bf16.msra.mxu0 %v5154_v12  ;;  %v4582_v11 = vld [vmem:[%s5981_s2 + $0x78] ss:$12 sps:$4 sm:$0xff]   ;;  %v4583_v12 = vld [vmem:[%s5981_s2 + $0x80] ss:$12 sps:$4 sm:$0xff]  }
0x10b0   :  { %1327 = vmatprep.subr.bf16.mxu1 %v5160_v14  ;;  %4062 = vmatprep.subr.bf16.mxu0 %v4585_v8 }
0x10b3   :  { %1328 = vmatpush1.bf16.msra.mxu1 %v5167_v16  ;;  %4063 = vmatpush3.bf16.msra.mxu0 %v5173_v17 }
0x10b4   :  { %1329 = vmatprep.subr.bf16.mxu1 %v5179_v18  ;;  %4064 = vmatprep.subr.bf16.mxu0 %v4585_v8 }
0x10b7   :  { %1330 = vmatpush1.bf16.msra.mxu1 %v5186_v19  ;;  %4065 = vmatpush3.bf16.msra.mxu0 %v4579_v7 }
0x10b8   :  { %1331 = vmatprep.subr.bf16.mxu1 %v5193_v20  ;;  %4066 = vmatprep.subr.bf16.mxu0 %v4585_v8 }
0x10bb   :  { %1332 = vmatpush1.bf16.msra.mxu1 %v5200_v22  ;;  %4067 = vmatpush3.bf16.msra.mxu0 %v4580_v9  ;;  %v4271_v9 = vld [vmem:[%s5983_s4 + $0x10] ss:$8 sps:$4 sm:$0xff]  }
0x10bc   :  { %1333 = vmatprep.subr.bf16.mxu1 %v4581_v10  ;;  %4068 = vmatprep.subr.bf16.mxu0 %v4585_v8  ;;  %v5332_v10 = vld [vmem:[%s5984_s5 + $0x10] ss:$8 sps:$4 sm:$0xff]  }
0x10bf   :  { %1334 = vmatpush1.bf16.msra.mxu1 %v4582_v11  ;;  %4069 = vmatpush3.bf16.msra.mxu0 %v4583_v12  ;;  %v4278_v11 = vld [vmem:[%s5983_s4 + $0x24] ss:$8 sps:$4 sm:$0xff]  }
0x10c0   :  { %1570 = vmatprep.subr.bf16.mxu1 %v4270_v48  ;;  %v5341_v12 = vld [vmem:[%s5984_s5 + $0x24] ss:$8 sps:$4 sm:$0xff]  }
0x117d   :  { %v1223_v14 = vpop.f32.mrb[32].mxu1  ;;  %v1264_v16 = vpop.f32.mrb[40].mxu0 }
0x117e   :  { %v1270_v17 = vadd.f32 %v1223_v14, %v4887_v44  ;;  %v1272_v18 = vadd.f32 %v1264_v16, %v4863_v51  ;;  %v1225_v19 = vpop.f32.mrb[33].mxu1  ;;  %v4056_v20 = vpop.f32.mrb[41].mxu0  ;;  %v4276_v14 = vld [vmem:[%s5983_s4 + $0x20] ss:$8 sps:$4 sm:$0xff]  }
0x117f   :  { %v1271_v22 = vadd.f32 %v1225_v19, %v4889_v52  ;;  %v1227_v3 = vpop.f32.mrb[34].mxu1  ;;  %v1267_v43 = vpop.f32.mrb[42].mxu0  ;;  %v5352_v16 = vld [vmem:[%s5984_s5 + $0x20] ss:$8 sps:$4 sm:$0xff]   ;;  %v4282_v19 = vld [vmem:[%s5983_s4 + $0x30] ss:$8 sps:$4 sm:$0xff]  }
0x1180   :  { %4380 = vtanh.f32 %v1270_v17  ;;  %v1228_v25 = vpop.f32.mrb[35].mxu1  ;;  %v4057_v55 = vpop.f32.mrb[43].mxu0  ;;  %v1274_v13 = vmul.f32 0.5, %v1270_v17  ;;  %v1276_v53 = vmul.f32 0.5, %v1272_v18  ;;  %v4284_v17 = vld [vmem:[%s5983_s4 + $0x34] ss:$8 sps:$4 sm:$0xff]  }
0x1181   :  { %v1275_v34 = vmul.f32 0.5, %v1271_v22  ;;  %v5361_v18 = vld [vmem:[%s5984_s5 + $0x34] ss:$8 sps:$4 sm:$0xff]   ;;  %v5370_v20 = vld [vmem:[%s5984_s5 + $0x30] ss:$8 sps:$4 sm:$0xff]  }
0x1182   :  { %4382 = vtanh.f32 %v1274_v13  ;;  %v4290_v22 = vld [vmem:[%s5983_s4 + $0x44] ss:$8 sps:$4 sm:$0xff]   ;;  %v4288_v3 = vld [vmem:[%s5983_s4 + $0x40] ss:$8 sps:$4 sm:$0xff]   ;;  %v4296_v43 = vld [vmem:[%s5983_s4 + $0x54] ss:$8 sps:$4 sm:$0xff]  }
0x1183   :  { %4384 = vtanh.f32 %v1275_v34  ;;  %v4294_v25 = vld [vmem:[%s5983_s4 + $0x50] ss:$8 sps:$4 sm:$0xff]  }
0x1184   :  { %4386 = vtanh.f32 %v1276_v53 }
0x118a   :  { %v4381_v26 = vpop.eup %4380 }
0x118b   :  { %1289 = vrot.lane.b32.xlu0 %v4381_v26, %s4587_s3 }
0x118c   :  { %v4383_v2 = vpop.eup %4382 }
0x118d   :  { %v4385_v44 = vpop.eup %4384  ;;  %v1280_v5 = vmul.f32 0.5, %v4383_v2 }
0x118e   :  { %v1281_v51 = vmul.f32 0.5, %v4385_v44  ;;  %v4387_v30 = vpop.eup %4386 }
0x118f   :  { %v1283_v15 = vadd.f32 0.5, %v1280_v5  ;;  %v1282_v38 = vmul.f32 0.5, %v4387_v30  ;;  %v1470_v30 = vld [vmem:[%s5985_s6] sm:$0x3]  ;;  %s4588_s6 = smov 64  }
0x1190   :  { %v1284_v0 = vadd.f32 0.5, %v1281_v51 }
0x1191   :  { %v1285_v29 = vadd.f32 0.5, %v1282_v38 }
0x1192   :  { %v1286_v58 = vmul.f32 %v1284_v0, %v5223_v27  ;;  %v5298_v27 = vld [vmem:[%s5984_s5 + $0x4] ss:$8 sps:$4 sm:$0xff]  }
0x1193   :  { %v1287_v45 = vmul.f32 %v1285_v29, %v5221_v40  ;;  %v1471_v40 = vpack.c.bf16 %v4960_v54, %v4908_v37  ;;  %1686 = vmatprep.subr.bf16.mxu0 %v5298_v27  ;;  %v4268_v37 = vld [vmem:[%s5983_s4] ss:$8 sps:$4 sm:$0xff]  }
0x1194   :  { %v5313_v54 = vld [vmem:[%s5984_s5] ss:$8 sps:$4 sm:$0xff]  }
0x11fd   :  { %v1290_v46 = vpop.permute.xlu0 %1289 }
0x11fe   :  { %v1292_v52 = vmul.f32 %v1290_v46, %v1283_v15  ;;  %v1293_v63 = vmul.f32 %v1290_v46, %v1284_v0 }
0x1200   :  { %1296 = vrot.lane.b32.xlu1 %v1292_v52, %s4587_s3  ;;  %1298 = vrot.lane.b32.xlu0 %v1293_v63, %s4587_s3 }
0x1272   :  { %v1297_v35 = vpop.permute.xlu1 %1296  ;;  %v1299_v57 = vpop.permute.xlu0 %1298 }
0x1273   :  { %v1300_v33 = vsel %vm381_vm2, %v1297_v35, %v1299_v57  ;;  %v5281_v56 = vadd.f32 %v1299_v57, %v1287_v45 }
0x1274   :  { %v5283_v41 = vadd.f32 %v1300_v33, %v1286_v58 }
0x1275   :  { %4388 = vtanh.f32 %v5281_v56 }
0x1276   :  { %4390 = vtanh.f32 %v5283_v41 }
0x127f   :  { %v4389_v32 = vpop.eup %4388 }
0x1280   :  { %v4391_v49 = vpop.eup %4390  ;;  %1311 = vrot.lane.b32.xlu0 %v4389_v32, %s4587_s3 }
0x1281   :  { %1309 = vrot.lane.b32.xlu1 %v4391_v49, %s4587_s3 }
0x1284   :  { %1490 = vrot.lane.b32.xlu0 %v1471_v40, %s4587_s3 }
0x12f2   :  { %v1312_v21 = vpop.permute.xlu0 %1311 }
0x12f3   :  { %v1310_v6 = vpop.permute.xlu1 %1309 }
0x12f4   :  { %v1313_v39 = vsel %vm381_vm2, %v1310_v6, %v1312_v21 }
0x12f5   :  { %v5302_v61 = vmul.f32 %v1313_v39, %v1285_v29  ;;  %v5994_v29 = vsub.s32 1, %v4841_v28 }
0x12f6   :  { %v1491_v55 = vpop.permute.xlu0 %1490 }
0x12f7   :  { %v1316_v47 = vpack.c.bf16 %v5302_v61, %v5302_v61 }
0x12f9   :  { %1318 = vrot.lane.b32.xlu1 %v1316_v47, %s4587_s3 }
0x136b   :  { %v1319_v7 = vpop.permute.xlu1 %1318 }
0x136c   :  { %3746 = vmatmul.mubr.msk.bf16.vlgmr.msra.gmra.mrb[36].mxu1 %vm381_vm2, %v1319_v7  ;;  %4071 = vmatmul.mubr.msk.bf16.vlgmr.msra.gmra.mrb[44].mxu0 %vm381_vm2, %v1319_v7 }
0x136d   :  { %1571 = vmatpush1.bf16.msra.mxu1 %v4268_v37  ;;  %1687 = vmatpush1.bf16.msra.mxu0 %v5313_v54 }
0x136e   :  { %1572 = vmatprep.subr.bf16.mxu1 %v4273_v24  ;;  %1688 = vmatprep.subr.bf16.mxu0 %v5321_v23 }
0x136f   :  { %1718 = vmatprep.mubr.bf16.mxu0 %v4584_v1  ;;  %1602 = vmatprep.mubr.bf16.mxu1 %v4584_v1 }
0x1371   :  { %1573 = vmatpush1.bf16.msra.mxu1 %v4271_v9  ;;  %1689 = vmatpush1.bf16.msra.mxu0 %v5332_v10 }
0x1372   :  { %1574 = vmatprep.subr.bf16.mxu1 %v4278_v11  ;;  %1690 = vmatprep.subr.bf16.mxu0 %v5341_v12 }
0x1375   :  { %1575 = vmatpush1.bf16.msra.mxu1 %v4276_v14  ;;  %1691 = vmatpush1.bf16.msra.mxu0 %v5352_v16 }
0x1376   :  { %1576 = vmatprep.subr.bf16.mxu1 %v4284_v17  ;;  %1692 = vmatprep.subr.bf16.mxu0 %v5361_v18 }
0x1379   :  { %1577 = vmatpush1.bf16.msra.mxu1 %v4282_v19  ;;  %1693 = vmatpush1.bf16.msra.mxu0 %v5370_v20 }
0x137a   :  { %1578 = vmatprep.subr.bf16.mxu1 %v4290_v22  ;;  %1762 = vmatprep.subr.bf16.mxu0 %v5298_v27 }
0x137c   :  { %1719 = vmatmul.mubr.bf16.vlgmr.msra.gmra.mrb[48].mxu0 %v4584_v1 }
0x137d   :  { %1579 = vmatpush1.bf16.msra.mxu1 %v4288_v3  ;;  %1763 = vmatpush1.bf16.msra.mxu0 %v5313_v54 }
0x137e   :  { %1580 = vmatprep.subr.bf16.mxu1 %v4296_v43  ;;  %1764 = vmatprep.subr.bf16.mxu0 %v5321_v23 }
0x137f   :  { %1794 = vmatprep.mubr.bf16.mxu0 %v4584_v1 }
0x1381   :  { %1581 = vmatpush1.bf16.msra.mxu1 %v4294_v25  ;;  %1765 = vmatpush1.bf16.msra.mxu0 %v5332_v10 }
0x1382   :  { %1766 = vmatprep.subr.bf16.mxu0 %v5341_v12  ;;  %1914 = vmatprep.subr.bf16.mxu1 %v5298_v27 }
0x1384   :  { %3760 = vmatmul.mubr.msk.bf16.vlgmr.msra.gmra.mrb[40].mxu1 %vm381_vm2, %v1491_v55 }
0x1385   :  { %1767 = vmatpush1.bf16.msra.mxu0 %v5352_v16  ;;  %1612 = vmatprep.mubr.bf16.mxu1 %v4584_v1 }
0x1386   :  { %1768 = vmatprep.subr.bf16.mxu0 %v5361_v18  ;;  %1915 = vmatpush1.bf16.msra.mxu1 %v5313_v54 }
0x1387   :  { %1916 = vmatprep.subr.bf16.mxu1 %v5321_v23 }
0x1389   :  { %1769 = vmatpush1.bf16.msra.mxu0 %v5370_v20 }
0x138a   :  { %1838 = vmatprep.subr.bf16.mxu0 %v5298_v27  ;;  %1917 = vmatpush1.bf16.msra.mxu1 %v5332_v10 }
0x138b   :  { %1918 = vmatprep.subr.bf16.mxu1 %v5341_v12 }
0x138e   :  { %1919 = vmatpush1.bf16.msra.mxu1 %v5352_v16 }
0x138f   :  { %1920 = vmatprep.subr.bf16.mxu1 %v5361_v18 }
0x1392   :  { %1921 = vmatpush1.bf16.msra.mxu1 %v5370_v20 }
0x1393   :  { %2066 = vmatprep.subr.bf16.mxu1 %v5298_v27 }
0x143f   :  { %v1357_v26 = vpop.f32.mrb[36].mxu1  ;;  %v1398_v13 = vpop.f32.mrb[44].mxu0 }
0x1440   :  { %v5409_v34 = vadd.f32 %v1357_v26, %v4891_v60  ;;  %v5412_v2 = vadd.f32 %v1398_v13, %v4871_v59  ;;  %v1359_v44 = vpop.f32.mrb[37].mxu1  ;;  %v4072_v5 = vpop.f32.mrb[45].mxu0  ;;  %v5422_v59 = vrot.slane %v1470_v30, %v85_v31 }
0x1441   :  { %v5415_v51 = vadd.f32 %v1359_v44, %v4893_v4  ;;  %v1361_v0 = vpop.f32.mrb[38].mxu1  ;;  %v1401_v15 = vpop.f32.mrb[46].mxu0  ;;  %v5426_v4 = vrot.slane %v1470_v30, %v5994_v29 }
0x1442   :  { %v1362_v46 = vpop.f32.mrb[39].mxu1  ;;  %v4073_v52 = vpop.f32.mrb[47].mxu0 }
0x144f   :  { %v1720_v63 = vpop.f32.mrb[48].mxu0 }
0x1450   :  { %v1722_v53 = vpop.f32.mrb[49].mxu0 }
0x1451   :  { %v1724_v60 = vpop.f32.mrb[50].mxu0 }
0x1452   :  { %v1725_v38 = vpop.f32.mrb[51].mxu0 }
0x1457   :  { %v1604_v45 = vpop.f32.mrb[40].mxu1 }
0x1458   :  { %v1605_v35 = vadd.f32 %v1604_v45, %v5422_v59  ;;  %v1606_v57 = vpop.f32.mrb[41].mxu1  ;;  %v1472_v45 = vpack.c.bf16 %v5064_v36, %v5012_v50 }
0x1459   :  { %v1607_v58 = vadd.f32 %v1606_v57, %v5426_v4  ;;  %v1608_v33 = vpop.f32.mrb[42].mxu1 }
0x145a   :  { %v1727_v48 = vadd.f32 %v1720_v63, %v1605_v35  ;;  %v1610_v32 = vpop.f32.mrb[43].mxu1  ;;  %v1609_v55 = vadd.f32 %v1608_v33, %v5422_v59 }
0x145b   :  { %v1728_v49 = vadd.f32 %v1722_v53, %v1607_v58  ;;  %v1611_v26 = vadd.f32 %v1610_v32, %v5426_v4  ;;  %v1408_v58 = vmul.f32 0.5, %v5409_v34 }
0x145c   :  { %4392 = vtanh.f32 %v1727_v48  ;;  %v1730_v31 = vmul.f32 0.5, %v1727_v48 }
0x145d   :  { %v1731_v37 = vmul.f32 0.5, %v1728_v49 }
0x145e   :  { %4394 = vtanh.f32 %v1730_v31 }
0x145f   :  { %4396 = vtanh.f32 %v1731_v37 }
0x1466   :  { %v4393_v40 = vpop.eup %4392 }
0x1467   :  { %1740 = vrot.lane.b32.xlu1 %v4393_v40, %s4588_s6 }
0x1468   :  { %v4395_v28 = vpop.eup %4394 }
0x1469   :  { %v1734_v21 = vmul.f32 0.5, %v4395_v28  ;;  %v4397_v24 = vpop.eup %4396 }
0x146a   :  { %v1735_v7 = vmul.f32 0.5, %v4397_v24 }
0x146b   :  { %v1736_v6 = vadd.f32 0.5, %v1734_v21 }
0x146c   :  { %v1737_v9 = vadd.f32 0.5, %v1735_v7 }
0x146e   :  { %v1738_v11 = vmul.f32 0.0, %v1737_v9 }
0x14d9   :  { %v1741_v39 = vpop.permute.xlu1 %1740 }
0x14da   :  { %v1743_v47 = vmul.f32 %v1741_v39, %v1736_v6 }
0x14dc   :  { %1745 = vrot.lane.b32.xlu0 %v1743_v47, %s4588_s6 }
0x154e   :  { %v1746_v14 = vpop.permute.xlu0 %1745 }
0x154f   :  { %v1748_v17 = vadd.f32 %v1746_v14, %v1738_v11 }
0x1551   :  { %4398 = vtanh.f32 %v1748_v17 }
0x155b   :  { %v4399_v19 = vpop.eup %4398 }
0x155c   :  { %1751 = vrot.lane.b32.xlu1 %v4399_v19, %s4588_s6  ;;  %v1409_v19 = vmul.f32 0.5, %v5415_v51  ;;  %v1410_v51 = vmul.f32 0.5, %v5412_v2 }
0x15ce   :  { %v1752_v22 = vpop.permute.xlu1 %1751 }
0x15cf   :  { %v5433_v3 = vmul.f32 %v1752_v22, %v1737_v9 }
0x15d1   :  { %v1755_v43 = vpack.c.bf16 %v5433_v3, %v5433_v3 }
0x15d3   :  { %1757 = vrot.lane.b32.xlu0 %v1755_v43, %s4588_s6 }
0x1645   :  { %v1758_v25 = vpop.permute.xlu0 %1757 }
0x1646   :  { %3772 = vmatmul.mubr.msk.bf16.vlgmr.msra.gmra.mrb[52].mxu0 %vm1683_vm3, %v1758_v25 }
0x1647   :  { %1839 = vmatpush1.bf16.msra.mxu0 %v5313_v54  ;;  %1870 = vmatprep.mubr.bf16.mxu0 %v4584_v1 }
0x1648   :  { %1840 = vmatprep.subr.bf16.mxu0 %v5321_v23 }
0x164b   :  { %1841 = vmatpush1.bf16.msra.mxu0 %v5332_v10 }
0x164c   :  { %1842 = vmatprep.subr.bf16.mxu0 %v5341_v12 }
0x164f   :  { %1843 = vmatpush1.bf16.msra.mxu0 %v5352_v16 }
0x1650   :  { %1844 = vmatprep.subr.bf16.mxu0 %v5361_v18 }
0x1653   :  { %1845 = vmatpush1.bf16.msra.mxu0 %v5370_v20 }
0x1654   :  { %1990 = vmatprep.subr.bf16.mxu0 %v5298_v27 }
0x1719   :  { %v1796_v13 = vpop.f32.mrb[52].mxu0 }
0x171a   :  { %v1803_v44 = vadd.f32 %v1796_v13, %v1609_v55  ;;  %v1798_v5 = vpop.f32.mrb[53].mxu0 }
0x171b   :  { %v1804_v0 = vadd.f32 %v1798_v5, %v1611_v26  ;;  %v1800_v15 = vpop.f32.mrb[54].mxu0 }
0x171c   :  { %4400 = vtanh.f32 %v1803_v44  ;;  %v1801_v46 = vpop.f32.mrb[55].mxu0  ;;  %v1806_v63 = vmul.f32 0.5, %v1803_v44 }
0x171d   :  { %v1807_v57 = vmul.f32 0.5, %v1804_v0 }
0x171e   :  { %4402 = vtanh.f32 %v1806_v63 }
0x171f   :  { %4404 = vtanh.f32 %v5409_v34 }
0x1720   :  { %4406 = vtanh.f32 %v1807_v57 }
0x1721   :  { %4408 = vtanh.f32 %v1408_v58 }
0x1726   :  { %v4401_v52 = vpop.eup %4400 }
0x1727   :  { %1816 = vrot.lane.b32.xlu1 %v4401_v52, %s4588_s6 }
0x1728   :  { %v4403_v53 = vpop.eup %4402 }
0x1729   :  { %v1810_v30 = vmul.f32 0.5, %v4403_v53  ;;  %v4405_v35 = vpop.eup %4404 }
0x172a   :  { %v4407_v33 = vpop.eup %4406 }
0x172b   :  { %v1812_v60 = vadd.f32 0.5, %v1810_v30  ;;  %v1811_v48 = vmul.f32 0.5, %v4407_v33  ;;  %v4409_v40 = vpop.eup %4408 }
0x172c   :  { %v1414_v21 = vmul.f32 0.5, %v4409_v40 }
0x172d   :  { %v1813_v32 = vadd.f32 0.5, %v1811_v48 }
0x172e   :  { %v1417_v36 = vadd.f32 0.5, %v1414_v21 }
0x172f   :  { %v1814_v49 = vmul.f32 %v1813_v32, %v1748_v17 }
0x1799   :  { %v1817_v38 = vpop.permute.xlu1 %1816 }
0x179a   :  { %v1819_v29 = vmul.f32 %v1817_v38, %v1812_v60 }
0x179c   :  { %1821 = vrot.lane.b32.xlu0 %v1819_v29, %s4588_s6 }
0x17a0   :  { %1492 = vrot.lane.b32.xlu0 %v1472_v45, %s4587_s3 }
0x17a4   :  { %1423 = vrot.lane.b32.xlu0 %v4405_v35, %s4587_s3 }
0x180e   :  { %v1822_v31 = vpop.permute.xlu0 %1821 }
0x180f   :  { %v5458_v28 = vadd.f32 %v1822_v31, %v1814_v49 }
0x1811   :  { %4410 = vtanh.f32 %v5458_v28 }
0x1812   :  { %v1493_v50 = vpop.permute.xlu0 %1492  ;;  %4412 = vtanh.f32 %v1409_v19 }
0x1813   :  { %3761 = vmatmul.mubr.msk.bf16.gmra.mrb[44].mxu1 %vm381_vm2, %v1493_v50 }
0x1814   :  { %1622 = vmatprep.mubr.bf16.mxu1 %v4584_v1 }
0x1816   :  { %v1424_v6 = vpop.permute.xlu0 %1423 }
0x1817   :  { %v1426_v34 = vmul.f32 %v1424_v6, %v1417_v36  ;;  %v1473_v36 = vpack.c.bf16 %v5230_v62, %v5116_v42 }
0x1819   :  { %1430 = vrot.lane.b32.xlu0 %v1426_v34, %s4587_s3 }
0x181b   :  { %v4411_v39 = vpop.eup %4410 }
0x181c   :  { %1827 = vrot.lane.b32.xlu1 %v4411_v39, %s4588_s6  ;;  %v4413_v0 = vpop.eup %4412 }
0x181d   :  { %v1415_v15 = vmul.f32 0.5, %v4413_v0 }
0x181f   :  { %v1418_v52 = vadd.f32 0.5, %v1415_v15 }
0x1821   :  { %v1427_v63 = vmul.f32 %v1424_v6, %v1418_v52 }
0x188b   :  { %v1431_v48 = vpop.permute.xlu0 %1430 }
0x188e   :  { %v1828_v47 = vpop.permute.xlu1 %1827 }
0x188f   :  { %v5465_v37 = vmul.f32 %v1828_v47, %v1813_v32  ;;  %v1420_v32 = vmul.f32 %v1418_v52, %v5283_v41 }
0x1891   :  { %v1831_v24 = vpack.c.bf16 %v5465_v37, %v5465_v37 }
0x1893   :  { %1833 = vrot.lane.b32.xlu1 %v1831_v24, %s4588_s6 }
0x18e6   :  { %v1614_v7 = vpop.f32.mrb[44].mxu1 }
0x18e7   :  { %v1616_v9 = vpop.f32.mrb[45].mxu1  ;;  %v1615_v22 = vadd.f32 %v1614_v7, %v5422_v59 }
0x18e8   :  { %v5470_v11 = vpop.f32.mrb[46].mxu1  ;;  %v1617_v43 = vadd.f32 %v1616_v9, %v5426_v4 }
0x18e9   :  { %v5472_v14 = vpop.f32.mrb[47].mxu1 }
0x1905   :  { %v1834_v17 = vpop.permute.xlu1 %1833 }
0x1906   :  { %3773 = vmatmul.mubr.msk.bf16.vlgmr.msra.gmra.mrb[56].mxu0 %vm1683_vm3, %v1834_v17 }
0x1907   :  { %1991 = vmatpush1.bf16.msra.mxu0 %v5313_v54  ;;  %2022 = vmatprep.mubr.bf16.mxu0 %v4584_v1 }
0x1908   :  { %1992 = vmatprep.subr.bf16.mxu0 %v5321_v23 }
0x190b   :  { %1993 = vmatpush1.bf16.msra.mxu0 %v5332_v10 }
0x190c   :  { %1994 = vmatprep.subr.bf16.mxu0 %v5341_v12 }
0x190f   :  { %1995 = vmatpush1.bf16.msra.mxu0 %v5352_v16 }
0x1910   :  { %1996 = vmatprep.subr.bf16.mxu0 %v5361_v18 }
0x1913   :  { %1997 = vmatpush1.bf16.msra.mxu0 %v5370_v20 }
0x1914   :  { %2142 = vmatprep.subr.bf16.mxu0 %v5298_v27 }
0x19d9   :  { %v1872_v25 = vpop.f32.mrb[56].mxu0 }
0x19da   :  { %v1879_v55 = vadd.f32 %v1872_v25, %v1615_v22  ;;  %v1874_v26 = vpop.f32.mrb[57].mxu0 }
0x19db   :  { %v1880_v13 = vadd.f32 %v1874_v26, %v1617_v43  ;;  %v1876_v44 = vpop.f32.mrb[58].mxu0 }
0x19dc   :  { %4414 = vtanh.f32 %v1879_v55  ;;  %v1877_v5 = vpop.f32.mrb[59].mxu0  ;;  %v1882_v53 = vmul.f32 0.5, %v1879_v55 }
0x19dd   :  { %4416 = vtanh.f32 %v1410_v51  ;;  %v1621_v51 = vadd.f32 %v5472_v14, %v5426_v4 }
0x19de   :  { %4418 = vtanh.f32 %v1882_v53 }
0x19e6   :  { %v4415_v46 = vpop.eup %4414 }
0x19e7   :  { %1892 = vrot.lane.b32.xlu1 %v4415_v46, %s4588_s6  ;;  %v4417_v30 = vpop.eup %4416 }
0x19e8   :  { %v4419_v60 = vpop.eup %4418  ;;  %v1416_v38 = vmul.f32 0.5, %v4417_v30 }
0x19e9   :  { %v1886_v29 = vmul.f32 0.5, %v4419_v60 }
0x19ea   :  { %v1419_v45 = vadd.f32 0.5, %v1416_v38 }
0x19eb   :  { %1432 = vrot.lane.b32.xlu1 %v1427_v63, %s4587_s3  ;;  %v1888_v35 = vadd.f32 0.5, %v1886_v29  ;;  %v1619_v63 = vadd.f32 %v5470_v11, %v5422_v59 }
0x19ec   :  { %v1421_v33 = vmul.f32 %v1419_v45, %v5281_v56  ;;  %v1883_v56 = vmul.f32 0.5, %v1880_v13 }
0x1a59   :  { %v1893_v57 = vpop.permute.xlu1 %1892 }
0x1a5a   :  { %v1895_v58 = vmul.f32 %v1893_v57, %v1888_v35 }
0x1a5c   :  { %1897 = vrot.lane.b32.xlu0 %v1895_v58, %s4588_s6 }
0x1a5d   :  { %v1433_v49 = vpop.permute.xlu1 %1432 }
0x1a5e   :  { %v1434_v2 = vsel %vm381_vm2, %v1431_v48, %v1433_v49  ;;  %v1438_v40 = vadd.f32 %v1433_v49, %v1421_v33 }
0x1a5f   :  { %v1437_v31 = vadd.f32 %v1434_v2, %v1420_v32 }
0x1a60   :  { %4420 = vtanh.f32 %v1438_v40 }
0x1a61   :  { %4422 = vtanh.f32 %v1437_v31 }
0x1a62   :  { %4424 = vtanh.f32 %v1883_v56 }
0x1a6a   :  { %v4421_v21 = vpop.eup %4420 }
0x1a6b   :  { %v4423_v50 = vpop.eup %4422  ;;  %1445 = vrot.lane.b32.xlu0 %v4421_v21, %s4587_s3 }
0x1a6c   :  { %1443 = vrot.lane.b32.xlu1 %v4423_v50, %s4587_s3  ;;  %v4425_v41 = vpop.eup %4424 }
0x1a6d   :  { %v1887_v6 = vmul.f32 0.5, %v4425_v41 }
0x1a6f   :  { %1494 = vrot.lane.b32.xlu0 %v1473_v36, %s4587_s3  ;;  %v1889_v34 = vadd.f32 0.5, %v1887_v6 }
0x1a71   :  { %v1890_v39 = vmul.f32 %v1889_v34, %v5458_v28 }
0x1ace   :  { %v1898_v47 = vpop.permute.xlu0 %1897 }
0x1acf   :  { %v5500_v24 = vadd.f32 %v1898_v47, %v1890_v39 }
0x1ad1   :  { %4426 = vtanh.f32 %v5500_v24 }
0x1adb   :  { %v4427_v7 = vpop.eup %4426 }
0x1adc   :  { %1903 = vrot.lane.b32.xlu1 %v4427_v7, %s4588_s6 }
0x1add   :  { %v1446_v9 = vpop.permute.xlu0 %1445 }
0x1ade   :  { %v1444_v17 = vpop.permute.xlu1 %1443 }
0x1adf   :  { %v1447_v42 = vsel %vm381_vm2, %v1444_v17, %v1446_v9 }
0x1ae0   :  { %v5505_v62 = vmul.f32 %v1447_v42, %v1419_v45 }
0x1ae1   :  { %v1495_v19 = vpop.permute.xlu0 %1494 }
0x1ae2   :  { %3762 = vmatmul.mubr.msk.bf16.gmra.mrb[48].mxu1 %vm381_vm2, %v1495_v19  ;;  %v1474_v28 = vpack.c.bf16 %v5505_v62, %v5302_v61 }
0x1ae3   :  { %1632 = vmatprep.mubr.bf16.mxu1 %v4584_v1 }
0x1ae4   :  { %1496 = vrot.lane.b32.xlu1 %v1474_v28, %s4587_s3 }
0x1b4e   :  { %v1904_v22 = vpop.permute.xlu1 %1903 }
0x1b4f   :  { %v5512_v43 = vmul.f32 %v1904_v22, %v1889_v34 }
0x1b51   :  { %v1907_v25 = vpack.c.bf16 %v5512_v43, %v5512_v43 }
0x1b53   :  { %1909 = vrot.lane.b32.xlu0 %v1907_v25, %s4588_s6 }
0x1b56   :  { %v1497_v55 = vpop.permute.xlu1 %1496 }
0x1b57   :  { %3763 = vmatmul.mubr.msk.bf16.gmra.mrb[52].mxu1 %vm381_vm2, %v1497_v55 }
0x1b58   :  { %1946 = vmatprep.mubr.bf16.mxu1 %v4584_v1 }
0x1bb5   :  { %v5519_v26 = vpop.f32.mrb[48].mxu1 }
0x1bb6   :  { %v5521_v61 = vpop.f32.mrb[49].mxu1  ;;  %v1625_v34 = vadd.f32 %v5519_v26, %v5422_v59 }
0x1bb7   :  { %v5523_v13 = vpop.f32.mrb[50].mxu1  ;;  %v1627_v39 = vadd.f32 %v5521_v61, %v5426_v4 }
0x1bb8   :  { %v5525_v44 = vpop.f32.mrb[51].mxu1 }
0x1bc5   :  { %v1910_v5 = vpop.permute.xlu0 %1909 }
0x1bc6   :  { %3774 = vmatmul.mubr.msk.bf16.vlgmr.msra.gmra.mrb[56].mxu1 %vm1683_vm3, %v1910_v5 }
0x1bc7   :  { %2067 = vmatpush1.bf16.msra.mxu1 %v5313_v54  ;;  %2098 = vmatprep.mubr.bf16.mxu1 %v4584_v1 }
0x1bc8   :  { %2068 = vmatprep.subr.bf16.mxu1 %v5321_v23 }
0x1bcb   :  { %2069 = vmatpush1.bf16.msra.mxu1 %v5332_v10 }
0x1bcc   :  { %2070 = vmatprep.subr.bf16.mxu1 %v5341_v12 }
0x1bcf   :  { %2071 = vmatpush1.bf16.msra.mxu1 %v5352_v16 }
0x1bd0   :  { %2072 = vmatprep.subr.bf16.mxu1 %v5361_v18 }
0x1bd3   :  { %2073 = vmatpush1.bf16.msra.mxu1 %v5370_v20 }
0x1bd4   :  { %2218 = vmatprep.subr.bf16.mxu1 %v5298_v27 }
0x1c2a   :  { %v5537_v0 = vpop.f32.mrb[52].mxu1 }
0x1c2b   :  { %v5539_v15 = vpop.f32.mrb[53].mxu1 }
0x1c2c   :  { %v5541_v46 = vpop.f32.mrb[54].mxu1 }
0x1c2d   :  { %v5543_v52 = vpop.f32.mrb[55].mxu1 }
0x1c99   :  { %v1948_v53 = vpop.f32.mrb[56].mxu1 }
0x1c9a   :  { %v1955_v30 = vadd.f32 %v1948_v53, %v1619_v63  ;;  %v1950_v60 = vpop.f32.mrb[57].mxu1 }
0x1c9b   :  { %v1956_v38 = vadd.f32 %v1950_v60, %v1621_v51  ;;  %v1952_v29 = vpop.f32.mrb[58].mxu1 }
0x1c9c   :  { %4428 = vtanh.f32 %v1955_v30  ;;  %v1953_v27 = vpop.f32.mrb[59].mxu1  ;;  %v1958_v35 = vmul.f32 0.5, %v1955_v30 }
0x1c9d   :  { %v1959_v14 = vmul.f32 0.5, %v1956_v38 }
0x1c9e   :  { %4430 = vtanh.f32 %v1958_v35 }
0x1c9f   :  { %4432 = vtanh.f32 %v1959_v14 }
0x1ca6   :  { %v4429_v45 = vpop.eup %4428 }
0x1ca7   :  { %1968 = vrot.lane.b32.xlu1 %v4429_v45, %s4588_s6 }
0x1ca8   :  { %v4431_v57 = vpop.eup %4430 }
0x1ca9   :  { %v1962_v58 = vmul.f32 0.5, %v4431_v57  ;;  %v4433_v32 = vpop.eup %4432 }
0x1caa   :  { %v1963_v49 = vmul.f32 0.5, %v4433_v32 }
0x1cab   :  { %v1964_v33 = vadd.f32 0.5, %v1962_v58  ;;  %v1629_v58 = vadd.f32 %v5523_v13, %v5422_v59 }
0x1cac   :  { %v1965_v2 = vadd.f32 0.5, %v1963_v49 }
0x1cae   :  { %v1966_v40 = vmul.f32 %v1965_v2, %v5500_v24 }
0x1d19   :  { %v1969_v48 = vpop.permute.xlu1 %1968 }
0x1d1a   :  { %v1971_v11 = vmul.f32 %v1969_v48, %v1964_v33 }
0x1d1c   :  { %1973 = vrot.lane.b32.xlu0 %v1971_v11, %s4588_s6 }
0x1d8e   :  { %v1974_v31 = vpop.permute.xlu0 %1973 }
0x1d8f   :  { %v1976_v21 = vadd.f32 %v1974_v31, %v1966_v40 }
0x1d91   :  { %4434 = vtanh.f32 %v1976_v21 }
0x1d9b   :  { %v4435_v50 = vpop.eup %4434 }
0x1d9c   :  { %1979 = vrot.lane.b32.xlu1 %v4435_v50, %s4588_s6 }
0x1e0e   :  { %v1980_v36 = vpop.permute.xlu1 %1979 }
0x1e0f   :  { %v5553_v56 = vmul.f32 %v1980_v36, %v1965_v2 }
0x1e11   :  { %v1983_v41 = vpack.c.bf16 %v5553_v56, %v5553_v56 }
0x1e13   :  { %1985 = vrot.lane.b32.xlu0 %v1983_v41, %s4588_s6 }
0x1e85   :  { %v1986_v6 = vpop.permute.xlu0 %1985 }
0x1e86   :  { %3775 = vmatmul.mubr.msk.bf16.vlgmr.msra.gmra.mrb[60].mxu0 %vm1683_vm3, %v1986_v6 }
0x1e87   :  { %2143 = vmatpush1.bf16.msra.mxu0 %v5313_v54  ;;  %2174 = vmatprep.mubr.bf16.mxu0 %v4584_v1 }
0x1e88   :  { %2144 = vmatprep.subr.bf16.mxu0 %v5321_v23 }
0x1e8b   :  { %2145 = vmatpush1.bf16.msra.mxu0 %v5332_v10 }
0x1e8c   :  { %2146 = vmatprep.subr.bf16.mxu0 %v5341_v12 }
0x1e8f   :  { %2147 = vmatpush1.bf16.msra.mxu0 %v5352_v16 }
0x1e90   :  { %2148 = vmatprep.subr.bf16.mxu0 %v5361_v18 }
0x1e93   :  { %2149 = vmatpush1.bf16.msra.mxu0 %v5370_v20 }
0x1f59   :  { %v2024_v47 = vpop.f32.mrb[60].mxu0 }
0x1f5a   :  { %v2031_v24 = vadd.f32 %v2024_v47, %v1625_v34  ;;  %v2026_v7 = vpop.f32.mrb[61].mxu0 }
0x1f5b   :  { %v2032_v9 = vadd.f32 %v2026_v7, %v1627_v39  ;;  %v2028_v17 = vpop.f32.mrb[62].mxu0  ;;  %v1637_v7 = vadd.f32 %v5539_v15, %v5426_v4 }
0x1f5c   :  { %4436 = vtanh.f32 %v2031_v24  ;;  %v2029_v42 = vpop.f32.mrb[63].mxu0  ;;  %v2034_v28 = vmul.f32 0.5, %v2031_v24  ;;  %v1635_v24 = vadd.f32 %v5537_v0, %v5422_v59 }
0x1f5d   :  { %v2035_v61 = vmul.f32 0.5, %v2032_v9 }
0x1f5e   :  { %4438 = vtanh.f32 %v2034_v28 }
0x1f5f   :  { %4440 = vtanh.f32 %v2035_v61 }
0x1f66   :  { %v4437_v19 = vpop.eup %4436 }
0x1f67   :  { %2044 = vrot.lane.b32.xlu1 %v4437_v19, %s4588_s6 }
0x1f68   :  { %v4439_v22 = vpop.eup %4438 }
0x1f69   :  { %v2038_v25 = vmul.f32 0.5, %v4439_v22  ;;  %v4441_v63 = vpop.eup %4440 }
0x1f6a   :  { %v2039_v51 = vmul.f32 0.5, %v4441_v63 }
0x1f6b   :  { %v2040_v55 = vadd.f32 0.5, %v2038_v25 }
0x1f6c   :  { %v2041_v53 = vadd.f32 0.5, %v2039_v51 }
0x1f6e   :  { %v2042_v30 = vmul.f32 %v2041_v53, %v1976_v21 }
0x1fd9   :  { %v2045_v5 = vpop.permute.xlu1 %2044 }
0x1fda   :  { %v2047_v26 = vmul.f32 %v2045_v5, %v2040_v55 }
0x1fdc   :  { %2049 = vrot.lane.b32.xlu0 %v2047_v26, %s4588_s6 }
0x204e   :  { %v2050_v60 = vpop.permute.xlu0 %2049 }
0x204f   :  { %v2052_v38 = vadd.f32 %v2050_v60, %v2042_v30 }
0x2051   :  { %4442 = vtanh.f32 %v2052_v38 }
0x205b   :  { %v4443_v29 = vpop.eup %4442 }
0x205c   :  { %2055 = vrot.lane.b32.xlu1 %v4443_v29, %s4588_s6 }
0x20ce   :  { %v2056_v27 = vpop.permute.xlu1 %2055 }
0x20cf   :  { %v5574_v45 = vmul.f32 %v2056_v27, %v2041_v53  ;;  %v4298_v27 = vld [vmem:[%s5986_s7] sm:$0xff]  }
0x20d0   :  { %4074 = vmatprep.subr.bf16.mxu0 %v4298_v27 }
0x20d1   :  { %v2059_v35 = vpack.c.bf16 %v5574_v45, %v5574_v45 }
0x20d3   :  { %2061 = vrot.lane.b32.xlu0 %v2059_v35, %s4588_s6  ;;  %v4299_v35 = vld [vmem:[%s5986_s7 + $0x8] sm:$0xff]  }
0x2145   :  { %v2062_v57 = vpop.permute.xlu0 %2061 }
0x2146   :  { %3776 = vmatmul.mubr.msk.bf16.vlgmr.msra.gmra.mrb[60].mxu1 %vm1683_vm3, %v2062_v57 }
0x2147   :  { %2219 = vmatpush1.bf16.msra.mxu1 %v5313_v54  ;;  %2250 = vmatprep.mubr.bf16.mxu1 %v4584_v1  ;;  %v1631_v54 = vadd.f32 %v5525_v44, %v5426_v4 }
0x2148   :  { %2220 = vmatprep.subr.bf16.mxu1 %v5321_v23 }
0x214b   :  { %2221 = vmatpush1.bf16.msra.mxu1 %v5332_v10 }
0x214c   :  { %2222 = vmatprep.subr.bf16.mxu1 %v5341_v12 }
0x214f   :  { %2223 = vmatpush1.bf16.msra.mxu1 %v5352_v16 }
0x2150   :  { %2224 = vmatprep.subr.bf16.mxu1 %v5361_v18 }
0x2153   :  { %2225 = vmatpush1.bf16.msra.mxu1 %v5370_v20 }
0x2154   :  { %4090 = vmatprep.subr.bf16.mxu1 %v4585_v8 }
0x2219   :  { %v2100_v33 = vpop.f32.mrb[60].mxu1 }
0x221a   :  { %v2107_v23 = vadd.f32 %v2100_v33, %v1629_v58  ;;  %v2102_v48 = vpop.f32.mrb[61].mxu1  ;;  %v4300_v58 = vld [vmem:[%s5986_s7 + $0x10] sm:$0xff]   ;;  %v4301_v33 = vld [vmem:[%s5986_s7 + $0x18] sm:$0xff]  }
0x221b   :  { %v2108_v10 = vadd.f32 %v2102_v48, %v1631_v54  ;;  %v2104_v11 = vpop.f32.mrb[62].mxu1  ;;  %v2300_v54 = vpack.c.bf16 %v5465_v37, %v5433_v3  ;;  %v2301_v37 = vpack.c.bf16 %v5553_v56, %v5512_v43  ;;  %v1639_v56 = vadd.f32 %v5541_v46, %v5422_v59 }
0x221c   :  { %4444 = vtanh.f32 %v2107_v23  ;;  %v2105_v12 = vpop.f32.mrb[63].mxu1  ;;  %v2110_v18 = vmul.f32 0.5, %v2107_v23  ;;  %v5640_v11 = vld [vmem:[%s5987_s8] sm:$0xff]  }
0x221d   :  { %v2111_v44 = vmul.f32 0.5, %v2108_v10 }
0x221e   :  { %4446 = vtanh.f32 %v2110_v18  ;;  %v1641_v18 = vadd.f32 %v5543_v52, %v5426_v4 }
0x221f   :  { %4448 = vtanh.f32 %v2111_v44 }
0x2226   :  { %v4445_v16 = vpop.eup %4444 }
0x2227   :  { %2120 = vrot.lane.b32.xlu1 %v4445_v16, %s4588_s6  ;;  %v5647_v16 = vld [vmem:[%s5987_s8 + $0x8] sm:$0xff]  }
0x2228   :  { %v4447_v20 = vpop.eup %4446 }
0x2229   :  { %v2114_v14 = vmul.f32 0.5, %v4447_v20  ;;  %v4449_v2 = vpop.eup %4448 }
0x222a   :  { %v2115_v40 = vmul.f32 0.5, %v4449_v2  ;;  %v5677_v2 = vld [vmem:[%s5988_s9] ss:$0 sm:$0xff] }
0x222b   :  { %v2116_v32 = vadd.f32 0.5, %v2114_v14 }
0x222c   :  { %v2117_v31 = vadd.f32 0.5, %v2115_v40 }
0x222e   :  { %v2118_v21 = vmul.f32 %v2117_v31, %v2052_v38 }
0x2299   :  { %v2121_v49 = vpop.permute.xlu1 %2120 }
0x229a   :  { %v2123_v13 = vmul.f32 %v2121_v49, %v2116_v32 }
0x229c   :  { %2125 = vrot.lane.b32.xlu0 %v2123_v13, %s4588_s6 }
0x230e   :  { %v2126_v50 = vpop.permute.xlu0 %2125 }
0x230f   :  { %v2128_v36 = vadd.f32 %v2126_v50, %v2118_v21 }
0x2311   :  { %4450 = vtanh.f32 %v2128_v36 }
0x231b   :  { %v4451_v41 = vpop.eup %4450 }
0x231c   :  { %2131 = vrot.lane.b32.xlu1 %v4451_v41, %s4588_s6 }
0x238e   :  { %v2132_v6 = vpop.permute.xlu1 %2131 }
0x238f   :  { %v5596_v34 = vmul.f32 %v2132_v6, %v2117_v31 }
0x2391   :  { %v2135_v39 = vpack.c.bf16 %v5596_v34, %v5596_v34 }
0x2393   :  { %2137 = vrot.lane.b32.xlu0 %v2135_v39, %s4588_s6 }
0x2405   :  { %v2138_v47 = vpop.permute.xlu0 %2137 }
0x2406   :  { %3777 = vmatmul.mubr.msk.bf16.vlgmr.msra.gmra.mrb[64].mxu0 %vm1683_vm3, %v2138_v47 }
0x2407   :  { %4075 = vmatpush3.bf16.msra.mxu0 %v4298_v27 }
0x2408   :  { %4076 = vmatprep.subr.bf16.mxu0 %v4299_v35 }
0x240b   :  { %4077 = vmatpush3.bf16.msra.mxu0 %v4299_v35 }
0x240c   :  { %4078 = vmatprep.subr.bf16.mxu0 %v4300_v58 }
0x240f   :  { %4079 = vmatpush3.bf16.msra.mxu0 %v4300_v58 }
0x2410   :  { %4080 = vmatprep.subr.bf16.mxu0 %v4301_v33 }
0x2413   :  { %4081 = vmatpush3.bf16.msra.mxu0 %v4301_v33 }
0x2414   :  { %4114 = vmatprep.subr.bf16.mxu0 %v4585_v8 }
0x24d9   :  { %v2176_v9 = vpop.f32.mrb[64].mxu0 }
0x24da   :  { %v2183_v17 = vadd.f32 %v2176_v9, %v1635_v24  ;;  %v2178_v42 = vpop.f32.mrb[65].mxu0 }
0x24db   :  { %v2184_v19 = vadd.f32 %v2178_v42, %v1637_v7  ;;  %v2180_v28 = vpop.f32.mrb[66].mxu0 }
0x24dc   :  { %4452 = vtanh.f32 %v2183_v17  ;;  %v2181_v22 = vpop.f32.mrb[67].mxu0  ;;  %v2186_v55 = vmul.f32 0.5, %v2183_v17 }
0x24dd   :  { %v2187_v15 = vmul.f32 0.5, %v2184_v19 }
0x24de   :  { %4454 = vtanh.f32 %v2186_v55 }
0x24df   :  { %4456 = vtanh.f32 %v2187_v15 }
0x24e6   :  { %v4453_v25 = vpop.eup %4452 }
0x24e7   :  { %2196 = vrot.lane.b32.xlu1 %v4453_v25, %s4588_s6 }
0x24e8   :  { %v4455_v5 = vpop.eup %4454 }
0x24e9   :  { %v2190_v26 = vmul.f32 0.5, %v4455_v5  ;;  %v4457_v51 = vpop.eup %4456 }
0x24ea   :  { %v2191_v53 = vmul.f32 0.5, %v4457_v51 }
0x24eb   :  { %v2192_v61 = vadd.f32 0.5, %v2190_v26 }
0x24ec   :  { %v2193_v30 = vadd.f32 0.5, %v2191_v53 }
0x24ee   :  { %v2194_v60 = vmul.f32 %v2193_v30, %v2128_v36 }
0x2559   :  { %v2197_v63 = vpop.permute.xlu1 %2196 }
0x255a   :  { %v2199_v0 = vmul.f32 %v2197_v63, %v2192_v61 }
0x255c   :  { %2201 = vrot.lane.b32.xlu0 %v2199_v0, %s4588_s6 }
0x25ce   :  { %v2202_v38 = vpop.permute.xlu0 %2201 }
0x25cf   :  { %v5608_v29 = vadd.f32 %v2202_v38, %v2194_v60 }
0x25d1   :  { %4458 = vtanh.f32 %v5608_v29 }
0x25db   :  { %v4459_v57 = vpop.eup %4458 }
0x25dc   :  { %2207 = vrot.lane.b32.xlu1 %v4459_v57, %s4588_s6 }
0x25e0   :  { %2314 = vrot.lane.b32.xlu1 %v2300_v54, %s4588_s6 }
0x264e   :  { %v2208_v23 = vpop.permute.xlu1 %2207 }
0x264f   :  { %v5628_v48 = vmul.f32 %v2208_v23, %v2193_v30 }
0x2651   :  { %v2211_v10 = vpack.c.bf16 %v5628_v48, %v5628_v48 }
0x2652   :  { %v2315_v3 = vpop.permute.xlu1 %2314 }
0x2653   :  { %2213 = vrot.lane.b32.xlu0 %v2211_v10, %s4588_s6  ;;  %4082 = vmatprep.mubr.msk.bf16.mxu0 %vm1683_vm3, %v2315_v3 }
0x2657   :  { %2316 = vrot.lane.b32.xlu0 %v2301_v37, %s4588_s6 }
0x26c5   :  { %v2214_v12 = vpop.permute.xlu0 %2213 }
0x26c6   :  { %3778 = vmatmul.mubr.msk.bf16.vlgmr.msra.gmra.mrb[64].mxu1 %vm1683_vm3, %v2214_v12 }
0x26c7   :  { %4091 = vmatpush3.bf16.msra.mxu1 %v5640_v11  ;;  %4094 = vmatprep.mubr.msk.bf16.mxu1 %vm4586_vm1, %v4585_v8 }
0x26c8   :  { %4092 = vmatprep.subr.bf16.mxu1 %v4585_v8 }
0x26c9   :  { %v2317_v43 = vpop.permute.xlu0 %2316 }
0x26ca   :  { %4083 = vmatmul.mubr.msk.bf16.vlgmr.msra.gmra.mrb[68].mxu0 %vm1683_vm3, %v2317_v43 }
0x26cb   :  { %4093 = vmatpush3.bf16.msra.mxu1 %v5647_v16  ;;  %4115 = vmatpush3.bf16.msra.mxu0 %v5640_v11 }
0x26cc   :  { %4098 = vmatprep.subr.bf16.mxu1 %v4585_v8  ;;  %4116 = vmatprep.subr.bf16.mxu0 %v4585_v8 }
0x26ce   :  { %4095 = vmatmul.mubr.bf16.vlgmr.msra.gmra.mrb[68].mxu1 %v4584_v1 }
0x26cf   :  { %4099 = vmatpush3.bf16.msra.mxu1 %v5640_v11  ;;  %4102 = vmatprep.mubr.msk.bf16.mxu1 %vm4586_vm1, %v4585_v8 }
0x26d0   :  { %4100 = vmatprep.subr.bf16.mxu1 %v4585_v8  ;;  %4117 = vmatpush3.bf16.msra.mxu0 %v5647_v16 }
0x26d1   :  { %4130 = vmatprep.subr.bf16.mxu0 %v4585_v8 }
0x26d3   :  { %4101 = vmatpush3.bf16.msra.mxu1 %v5647_v16 }
0x26d4   :  { %4106 = vmatprep.subr.bf16.mxu1 %v4585_v8 }
0x2799   :  { %v2252_v20 = vpop.f32.mrb[64].mxu1 }
0x279a   :  { %v5670_v14 = vadd.f32 %v2252_v20, %v1639_v56  ;;  %v2254_v32 = vpop.f32.mrb[65].mxu1 }
0x279b   :  { %v5672_v49 = vadd.f32 %v2254_v32, %v1641_v18  ;;  %v2256_v13 = vpop.f32.mrb[66].mxu1 }
0x279c   :  { %v2257_v44 = vpop.f32.mrb[67].mxu1  ;;  %v2262_v37 = vmul.f32 0.5, %v5670_v14 }
0x279d   :  { %v5679_v40 = vpop.f32.mrb[68].mxu0 }
0x279e   :  { %v2392_v31 = vpop.f32.mrb[69].mxu0 }
0x279f   :  { %v2393_v59 = vadd.f32 %v5677_v2, %v2392_v31  ;;  %v5682_v46 = vpop.f32.mrb[70].mxu0  ;;  %v2263_v31 = vmul.f32 0.5, %v5672_v49 }
0x27a0   :  { %v2395_v4 = vpop.f32.mrb[71].mxu0 }
0x27a1   :  { %v2472_v52 = vpop.f32.mrb[68].mxu1  ;;  %v2396_v61 = vadd.f32 %v5677_v2, %v2395_v4 }
0x27a2   :  { %v2478_v21 = vadd.f32 %v2472_v52, %v2393_v59  ;;  %v4096_v50 = vpop.f32.mrb[69].mxu1 }
0x27a3   :  { %v2475_v36 = vpop.f32.mrb[70].mxu1 }
0x27a4   :  { %4460 = vtanh.f32 %v2478_v21  ;;  %v4097_v41 = vpop.f32.mrb[71].mxu1  ;;  %v2480_v39 = vmul.f32 0.5, %v2478_v21 }
0x27a6   :  { %4462 = vtanh.f32 %v2480_v39  ;;  %v2401_v39 = vadd.f32 %v5679_v40, %v5677_v2 }
0x27ae   :  { %v4461_v6 = vpop.eup %4460 }
0x27af   :  { %2486 = vrot.lane.b32.xlu1 %v4461_v6, %s4589_s30 }
0x27b0   :  { %v4463_v47 = vpop.eup %4462 }
0x27b1   :  { %v2482_v24 = vmul.f32 0.5, %v4463_v47 }
0x27b3   :  { %v2483_v7 = vadd.f32 0.5, %v2482_v24 }
0x27b5   :  { %v2484_v42 = vmul.f32 0.0, %v2483_v7 }
0x2821   :  { %v2487_v9 = vpop.permute.xlu1 %2486 }
0x2822   :  { %v2489_v17 = vmul.f32 %v2487_v9, %v2483_v7 }
0x2824   :  { %2491 = vrot.lane.b32.xlu0 %v2489_v17, %s4589_s30 }
0x2896   :  { %v2492_v19 = vpop.permute.xlu0 %2491 }
0x2897   :  { %v2494_v28 = vadd.f32 %v2492_v19, %v2484_v42 }
0x2899   :  { %4464 = vtanh.f32 %v2494_v28 }
0x28a3   :  { %v4465_v22 = vpop.eup %4464 }
0x28a4   :  { %2497 = vrot.lane.b32.xlu1 %v4465_v22, %s4589_s30 }
0x2916   :  { %v2498_v25 = vpop.permute.xlu1 %2497 }
0x2917   :  { %v5687_v55 = vmul.f32 %v2498_v25, %v2483_v7 }
0x2919   :  { %v2501_v5 = vpack.c.bf16 %v5687_v55, %v5687_v55 }
0x291b   :  { %2503 = vrot.lane.b32.xlu0 %v2501_v5, %s4589_s30 }
0x298d   :  { %v2504_v26 = vpop.permute.xlu0 %2503 }
0x298e   :  { %4103 = vmatmul.mubr.msk.bf16.vlgmr.msra.gmra.mrb[72].mxu1 %vm2435_vm4, %v2504_v26 }
0x298f   :  { %4107 = vmatpush3.bf16.msra.mxu1 %v5640_v11  ;;  %4110 = vmatprep.mubr.msk.bf16.mxu1 %vm4586_vm1, %v4585_v8 }
0x2990   :  { %4108 = vmatprep.subr.bf16.mxu1 %v4585_v8 }
0x2993   :  { %4109 = vmatpush3.bf16.msra.mxu1 %v5647_v16 }
0x2994   :  { %4122 = vmatprep.subr.bf16.mxu1 %v4585_v8 }
0x2a61   :  { %v2542_v63 = vpop.f32.mrb[72].mxu1 }
0x2a62   :  { %v2548_v0 = vadd.f32 %v2542_v63, %v2396_v61  ;;  %v4104_v15 = vpop.f32.mrb[73].mxu1 }
0x2a63   :  { %v2545_v51 = vpop.f32.mrb[74].mxu1 }
0x2a64   :  { %4466 = vtanh.f32 %v2548_v0  ;;  %v4105_v53 = vpop.f32.mrb[75].mxu1  ;;  %v2550_v60 = vmul.f32 0.5, %v2548_v0 }
0x2a66   :  { %4468 = vtanh.f32 %v2550_v60 }
0x2a6e   :  { %v4467_v30 = vpop.eup %4466 }
0x2a6f   :  { %2556 = vrot.lane.b32.xlu1 %v4467_v30, %s4589_s30 }
0x2a70   :  { %v4469_v38 = vpop.eup %4468 }
0x2a71   :  { %v2552_v27 = vmul.f32 0.5, %v4469_v38 }
0x2a73   :  { %v2553_v35 = vadd.f32 0.5, %v2552_v27 }
0x2a75   :  { %v2554_v54 = vmul.f32 %v2553_v35, %v2494_v28 }
0x2ae1   :  { %v2557_v57 = vpop.permute.xlu1 %2556 }
0x2ae2   :  { %v2559_v58 = vmul.f32 %v2557_v57, %v2553_v35  ;;  %v2404_v57 = vadd.f32 %v5682_v46, %v5677_v2 }
0x2ae4   :  { %2561 = vrot.lane.b32.xlu0 %v2559_v58, %s4589_s30 }
0x2b56   :  { %v2562_v33 = vpop.permute.xlu0 %2561 }
0x2b57   :  { %v2564_v23 = vadd.f32 %v2562_v33, %v2554_v54 }
0x2b59   :  { %4470 = vtanh.f32 %v2564_v23 }
0x2b5a   :  { %4472 = vtanh.f32 %v5670_v14 }
0x2b5b   :  { %4474 = vtanh.f32 %v2262_v37 }
0x2b5c   :  { %4476 = vtanh.f32 %v2263_v31 }
0x2b63   :  { %v4471_v10 = vpop.eup %4470 }
0x2b64   :  { %2567 = vrot.lane.b32.xlu1 %v4471_v10, %s4589_s30  ;;  %v4473_v3 = vpop.eup %4472 }
0x2b65   :  { %v4475_v12 = vpop.eup %4474 }
0x2b66   :  { %v2266_v43 = vmul.f32 0.5, %v4475_v12  ;;  %v4477_v14 = vpop.eup %4476 }
0x2b67   :  { %v2267_v59 = vmul.f32 0.5, %v4477_v14 }
0x2b68   :  { %2272 = vrot.lane.b32.xlu1 %v4473_v3, %s4588_s6  ;;  %v2268_v32 = vadd.f32 0.5, %v2266_v43 }
0x2b69   :  { %v2269_v4 = vadd.f32 0.5, %v2267_v59 }
0x2b6b   :  { %v2270_v21 = vmul.f32 %v2269_v4, %v5608_v29  ;;  %v2302_v29 = vpack.c.bf16 %v5596_v34, %v5574_v45 }
0x2bd6   :  { %v2568_v56 = vpop.permute.xlu1 %2567 }
0x2bd7   :  { %v5706_v18 = vmul.f32 %v2568_v56, %v2553_v35 }
0x2bd9   :  { %v2571_v20 = vpack.c.bf16 %v5706_v18, %v5706_v18 }
0x2bda   :  { %v2273_v13 = vpop.permute.xlu1 %2272 }
0x2bdb   :  { %v2275_v44 = vmul.f32 %v2273_v13, %v2268_v32  ;;  %2573 = vrot.lane.b32.xlu0 %v2571_v20, %s4589_s30 }
0x2bdd   :  { %2277 = vrot.lane.b32.xlu1 %v2275_v44, %s4588_s6 }
0x2c4d   :  { %v2574_v52 = vpop.permute.xlu0 %2573 }
0x2c4e   :  { %4111 = vmatmul.mubr.msk.bf16.vlgmr.msra.gmra.mrb[76].mxu1 %vm2435_vm4, %v2574_v52 }
0x2c4f   :  { %v2278_v50 = vpop.permute.xlu1 %2277  ;;  %4123 = vmatpush3.bf16.msra.mxu1 %v5640_v11  ;;  %4126 = vmatprep.mubr.msk.bf16.mxu1 %vm4586_vm1, %v4585_v8 }
0x2c50   :  { %v2280_v36 = vadd.f32 %v2278_v50, %v2270_v21  ;;  %4124 = vmatprep.subr.bf16.mxu1 %v4585_v8 }
0x2c52   :  { %4478 = vtanh.f32 %v2280_v36 }
0x2c53   :  { %4125 = vmatpush3.bf16.msra.mxu1 %v5647_v16 }
0x2c54   :  { %4138 = vmatprep.subr.bf16.mxu1 %v4585_v8 }
0x2c5c   :  { %v4479_v49 = vpop.eup %4478 }
0x2c5d   :  { %2283 = vrot.lane.b32.xlu1 %v4479_v49, %s4588_s6 }
0x2c61   :  { %2318 = vrot.lane.b32.xlu1 %v2302_v29, %s4588_s6 }
0x2ccf   :  { %v2284_v41 = vpop.permute.xlu1 %2283 }
0x2cd0   :  { %v5730_v61 = vmul.f32 %v2284_v41, %v2269_v4 }
0x2cd2   :  { %v2303_v0 = vpack.c.bf16 %v5730_v61, %v5628_v48 }
0x2cd3   :  { %v2319_v6 = vpop.permute.xlu1 %2318 }
0x2cd4   :  { %4086 = vmatprep.mubr.msk.bf16.mxu0 %vm1683_vm3, %v2319_v6 }
0x2d21   :  { %v2612_v47 = vpop.f32.mrb[76].mxu1 }
0x2d22   :  { %v2618_v24 = vadd.f32 %v2612_v47, %v2401_v39  ;;  %v4112_v7 = vpop.f32.mrb[77].mxu1 }
0x2d23   :  { %v2615_v9 = vpop.f32.mrb[78].mxu1 }
0x2d24   :  { %4480 = vtanh.f32 %v2618_v24  ;;  %v4113_v17 = vpop.f32.mrb[79].mxu1  ;;  %v2620_v19 = vmul.f32 0.5, %v2618_v24 }
0x2d26   :  { %4482 = vtanh.f32 %v2620_v19 }
0x2d2e   :  { %v4481_v42 = vpop.eup %4480 }
0x2d2f   :  { %2626 = vrot.lane.b32.xlu0 %v4481_v42, %s4589_s30 }
0x2d30   :  { %v4483_v45 = vpop.eup %4482 }
0x2d31   :  { %v2622_v34 = vmul.f32 0.5, %v4483_v45 }
0x2d33   :  { %v2623_v28 = vadd.f32 0.5, %v2622_v34 }
0x2d35   :  { %v2624_v5 = vmul.f32 %v2623_v28, %v2564_v23 }
0x2da1   :  { %v2627_v22 = vpop.permute.xlu0 %2626 }
0x2da2   :  { %v2629_v25 = vmul.f32 %v2627_v22, %v2623_v28 }
0x2da4   :  { %2631 = vrot.lane.b32.xlu0 %v2629_v25, %s4589_s30 }
0x2e16   :  { %v2632_v40 = vpop.permute.xlu0 %2631 }
0x2e17   :  { %v2634_v26 = vadd.f32 %v2632_v40, %v2624_v5 }
0x2e19   :  { %4484 = vtanh.f32 %v2634_v26 }
0x2e23   :  { %v4485_v63 = vpop.eup %4484 }
0x2e24   :  { %2637 = vrot.lane.b32.xlu0 %v4485_v63, %s4589_s30 }
0x2e28   :  { %2320 = vrot.lane.b32.xlu0 %v2303_v0, %s4588_s6 }
0x2e96   :  { %v2638_v15 = vpop.permute.xlu0 %2637 }
0x2e97   :  { %v5736_v51 = vmul.f32 %v2638_v15, %v2623_v28 }
0x2e99   :  { %v2641_v53 = vpack.c.bf16 %v5736_v51, %v5736_v51 }
0x2e9a   :  { %v2321_v30 = vpop.permute.xlu0 %2320 }
0x2e9b   :  { %2643 = vrot.lane.b32.xlu1 %v2641_v53, %s4589_s30  ;;  %4087 = vmatmul.mubr.msk.bf16.gmra.mrb[72].mxu0 %vm1683_vm3, %v2321_v30 }
0x2e9c   :  { %4118 = vmatprep.mubr.msk.bf16.mxu0 %vm4586_vm1, %v4585_v8 }
0x2f0d   :  { %v2644_v60 = vpop.permute.xlu1 %2643 }
0x2f0e   :  { %4119 = vmatmul.mubr.msk.bf16.vlgmr.msra.gmra.mrb[76].mxu0 %vm2435_vm4, %v2644_v60 }
0x2f0f   :  { %4131 = vmatpush3.bf16.msra.mxu0 %v5640_v11  ;;  %4134 = vmatprep.mubr.msk.bf16.mxu0 %vm4586_vm1, %v4585_v8 }
0x2f10   :  { %4132 = vmatprep.subr.bf16.mxu0 %v4585_v8 }
0x2f13   :  { %4133 = vmatpush3.bf16.msra.mxu0 %v5647_v16 }
0x2f14   :  { %4146 = vmatprep.subr.bf16.mxu0 %v4585_v8 }
0x2f6e   :  { %v5751_v48 = vpop.f32.mrb[72].mxu0 }
0x2f6f   :  { %v2408_v38 = vpop.f32.mrb[73].mxu0 }
0x2f70   :  { %v5753_v27 = vpop.f32.mrb[74].mxu0  ;;  %v2409_v21 = vadd.f32 %v5677_v2, %v2408_v38 }
0x2f71   :  { %v5755_v35 = vpop.f32.mrb[75].mxu0 }
0x2f72   :  { %v2412_v40 = vadd.f32 %v5677_v2, %v5755_v35 }
0x2fe1   :  { %v2682_v58 = vpop.f32.mrb[76].mxu0 }
0x2fe2   :  { %v2688_v54 = vadd.f32 %v2682_v58, %v2404_v57  ;;  %v4120_v33 = vpop.f32.mrb[77].mxu0 }
0x2fe3   :  { %v2685_v23 = vpop.f32.mrb[78].mxu0 }
0x2fe4   :  { %4486 = vtanh.f32 %v2688_v54  ;;  %v4121_v10 = vpop.f32.mrb[79].mxu0  ;;  %v2690_v37 = vmul.f32 0.5, %v2688_v54 }
0x2fe6   :  { %4488 = vtanh.f32 %v2690_v37 }
0x2fee   :  { %v4487_v3 = vpop.eup %4486 }
0x2fef   :  { %2696 = vrot.lane.b32.xlu0 %v4487_v3, %s4589_s30 }
0x2ff0   :  { %v4489_v12 = vpop.eup %4488 }
0x2ff1   :  { %v2692_v43 = vmul.f32 0.5, %v4489_v12 }
0x2ff3   :  { %v2693_v56 = vadd.f32 0.5, %v2692_v43  ;;  %v2417_v43 = vadd.f32 %v5751_v48, %v5677_v2 }
0x2ff5   :  { %v2694_v13 = vmul.f32 %v2693_v56, %v2634_v26 }
0x3061   :  { %v2697_v20 = vpop.permute.xlu0 %2696 }
0x3062   :  { %v2699_v32 = vmul.f32 %v2697_v20, %v2693_v56 }
0x3064   :  { %2701 = vrot.lane.b32.xlu1 %v2699_v32, %s4589_s30 }
0x30d6   :  { %v2702_v46 = vpop.permute.xlu1 %2701 }
0x30d7   :  { %v2704_v44 = vadd.f32 %v2702_v46, %v2694_v13 }
0x30d9   :  { %4490 = vtanh.f32 %v2704_v44 }
0x30e3   :  { %v4491_v31 = vpop.eup %4490 }
0x30e4   :  { %2707 = vrot.lane.b32.xlu0 %v4491_v31, %s4589_s30 }
0x3156   :  { %v2708_v14 = vpop.permute.xlu0 %2707 }
0x3157   :  { %v5762_v59 = vmul.f32 %v2708_v14, %v2693_v56 }
0x3159   :  { %v2711_v4 = vpack.c.bf16 %v5762_v59, %v5762_v59 }
0x315b   :  { %2713 = vrot.lane.b32.xlu1 %v2711_v4, %s4589_s30 }
0x31cd   :  { %v2714_v52 = vpop.permute.xlu1 %2713 }
0x31ce   :  { %4127 = vmatmul.mubr.msk.bf16.vlgmr.msra.gmra.mrb[80].mxu1 %vm2435_vm4, %v2714_v52 }
0x31cf   :  { %4139 = vmatpush3.bf16.msra.mxu1 %v5640_v11  ;;  %4142 = vmatprep.mubr.msk.bf16.mxu1 %vm4586_vm1, %v4585_v8 }
0x31d0   :  { %4140 = vmatprep.subr.bf16.mxu1 %v4585_v8 }
0x31d3   :  { %4141 = vmatpush3.bf16.msra.mxu1 %v5647_v16 }
0x32a1   :  { %v2752_v50 = vpop.f32.mrb[80].mxu1 }
0x32a2   :  { %v2758_v36 = vadd.f32 %v2752_v50, %v2409_v21  ;;  %v4128_v49 = vpop.f32.mrb[81].mxu1 }
0x32a3   :  { %v2755_v29 = vpop.f32.mrb[82].mxu1 }
0x32a4   :  { %4492 = vtanh.f32 %v2758_v36  ;;  %v4129_v41 = vpop.f32.mrb[83].mxu1  ;;  %v2760_v39 = vmul.f32 0.5, %v2758_v36  ;;  %v4304_v29 = vld [vmem:[%s5989_s10] sm:$0xff]  }
0x32a5   :  { %4154 = vmatprep.subr.bf16.mxu1 %v4304_v29 }
0x32a6   :  { %4494 = vtanh.f32 %v2760_v39  ;;  %v4305_v39 = vld [vmem:[%s5989_s10 + $0x8] sm:$0xff]  }
0x32ae   :  { %v4493_v6 = vpop.eup %4492 }
0x32af   :  { %2766 = vrot.lane.b32.xlu0 %v4493_v6, %s4589_s30  ;;  %v3000_v6 = vpack.c.bf16 %v5706_v18, %v5687_v55  ;;  %v3001_v55 = vpack.c.bf16 %v5762_v59, %v5736_v51  ;;  %v5830_v18 = vld [vmem:[%s5990_s11] sm:$0xff]   ;;  %v2420_v59 = vadd.f32 %v5753_v27, %v5677_v2 }
0x32b0   :  { %v4495_v47 = vpop.eup %4494 }
0x32b1   :  { %v2762_v24 = vmul.f32 0.5, %v4495_v47 }
0x32b3   :  { %v2763_v7 = vadd.f32 0.5, %v2762_v24 }
0x32b5   :  { %v2764_v42 = vmul.f32 %v2763_v7, %v2704_v44 }
0x3321   :  { %v2767_v9 = vpop.permute.xlu0 %2766 }
0x3322   :  { %v2769_v17 = vmul.f32 %v2767_v9, %v2763_v7 }
0x3324   :  { %2771 = vrot.lane.b32.xlu1 %v2769_v17, %s4589_s30 }
0x3396   :  { %v2772_v19 = vpop.permute.xlu1 %2771 }
0x3397   :  { %v2774_v45 = vadd.f32 %v2772_v19, %v2764_v42  ;;  %v5837_v42 = vld [vmem:[%s5990_s11 + $0x8] sm:$0xff]  }
0x3399   :  { %4496 = vtanh.f32 %v2774_v45 }
0x33a3   :  { %v4497_v34 = vpop.eup %4496 }
0x33a4   :  { %2777 = vrot.lane.b32.xlu0 %v4497_v34, %s4589_s30 }
0x3416   :  { %v2778_v28 = vpop.permute.xlu0 %2777 }
0x3417   :  { %v5777_v22 = vmul.f32 %v2778_v28, %v2763_v7 }
0x3419   :  { %v2781_v25 = vpack.c.bf16 %v5777_v22, %v5777_v22 }
0x341b   :  { %2783 = vrot.lane.b32.xlu1 %v2781_v25, %s4589_s30  ;;  %v5861_v25 = vld [vmem:[%s5991_s12] ss:$0 sm:$0xff] }
0x348d   :  { %v2784_v5 = vpop.permute.xlu1 %2783 }
0x348e   :  { %4135 = vmatmul.mubr.msk.bf16.vlgmr.msra.gmra.mrb[80].mxu0 %vm2435_vm4, %v2784_v5 }
0x348f   :  { %4147 = vmatpush3.bf16.msra.mxu0 %v5640_v11  ;;  %4150 = vmatprep.mubr.msk.bf16.mxu0 %vm4586_vm1, %v4585_v8 }
0x3490   :  { %4148 = vmatprep.subr.bf16.mxu0 %v4585_v8 }
0x3493   :  { %4149 = vmatpush3.bf16.msra.mxu0 %v5647_v16 }
0x3494   :  { %4166 = vmatprep.subr.bf16.mxu0 %v4585_v8 }
0x3561   :  { %v2822_v26 = vpop.f32.mrb[80].mxu0 }
0x3562   :  { %v2828_v63 = vadd.f32 %v2822_v26, %v2412_v40  ;;  %v4136_v0 = vpop.f32.mrb[81].mxu0 }
0x3563   :  { %v2825_v15 = vpop.f32.mrb[82].mxu0 }
0x3564   :  { %4498 = vtanh.f32 %v2828_v63  ;;  %v4137_v53 = vpop.f32.mrb[83].mxu0  ;;  %v2830_v11 = vmul.f32 0.5, %v2828_v63 }
0x3566   :  { %4500 = vtanh.f32 %v2830_v11 }
0x356e   :  { %v4499_v30 = vpop.eup %4498 }
0x356f   :  { %2836 = vrot.lane.b32.xlu0 %v4499_v30, %s4589_s30 }
0x3570   :  { %v4501_v60 = vpop.eup %4500 }
0x3571   :  { %v2832_v38 = vmul.f32 0.5, %v4501_v60 }
0x3573   :  { %v2833_v57 = vadd.f32 0.5, %v2832_v38 }
0x3575   :  { %v2834_v54 = vmul.f32 %v2833_v57, %v2774_v45 }
0x35e1   :  { %v2837_v16 = vpop.permute.xlu0 %2836 }
0x35e2   :  { %v2839_v58 = vmul.f32 %v2837_v16, %v2833_v57 }
0x35e4   :  { %2841 = vrot.lane.b32.xlu1 %v2839_v58, %s4589_s30 }
0x3656   :  { %v2842_v35 = vpop.permute.xlu1 %2841 }
0x3657   :  { %v2844_v33 = vadd.f32 %v2842_v35, %v2834_v54 }
0x3659   :  { %4502 = vtanh.f32 %v2844_v33 }
0x3663   :  { %v4503_v23 = vpop.eup %4502 }
0x3664   :  { %2847 = vrot.lane.b32.xlu0 %v4503_v23, %s4589_s30 }
0x36d6   :  { %v2848_v10 = vpop.permute.xlu0 %2847 }
0x36d7   :  { %v5794_v3 = vmul.f32 %v2848_v10, %v2833_v57 }
0x36d9   :  { %v2851_v37 = vpack.c.bf16 %v5794_v3, %v5794_v3 }
0x36db   :  { %2853 = vrot.lane.b32.xlu1 %v2851_v37, %s4589_s30 }
0x374d   :  { %v2854_v12 = vpop.permute.xlu1 %2853 }
0x374e   :  { %4143 = vmatmul.mubr.msk.bf16.vlgmr.msra.gmra.mrb[84].mxu1 %vm2435_vm4, %v2854_v12 }
0x374f   :  { %4155 = vmatpush3.bf16.msra.mxu1 %v4304_v29 }
0x3750   :  { %4156 = vmatprep.subr.bf16.mxu1 %v4305_v39 }
0x3753   :  { %4157 = vmatpush3.bf16.msra.mxu1 %v4305_v39 }
0x3754   :  { %4182 = vmatprep.subr.bf16.mxu1 %v4585_v8 }
0x3821   :  { %v2892_v56 = vpop.f32.mrb[84].mxu1 }
0x3822   :  { %v2898_v20 = vadd.f32 %v2892_v56, %v2417_v43  ;;  %v4144_v32 = vpop.f32.mrb[85].mxu1 }
0x3823   :  { %v2895_v13 = vpop.f32.mrb[86].mxu1 }
0x3824   :  { %4504 = vtanh.f32 %v2898_v20  ;;  %v4145_v46 = vpop.f32.mrb[87].mxu1  ;;  %v2900_v31 = vmul.f32 0.5, %v2898_v20 }
0x3826   :  { %4506 = vtanh.f32 %v2900_v31 }
0x382e   :  { %v4505_v44 = vpop.eup %4504 }
0x382f   :  { %2906 = vrot.lane.b32.xlu0 %v4505_v44, %s4589_s30 }
0x3830   :  { %v4507_v14 = vpop.eup %4506 }
0x3831   :  { %v2902_v4 = vmul.f32 0.5, %v4507_v14 }
0x3833   :  { %v2903_v52 = vadd.f32 0.5, %v2902_v4 }
0x3835   :  { %v2904_v36 = vmul.f32 %v2903_v52, %v2844_v33 }
0x38a1   :  { %v2907_v21 = vpop.permute.xlu0 %2906 }
0x38a2   :  { %v2909_v50 = vmul.f32 %v2907_v21, %v2903_v52 }
0x38a4   :  { %2911 = vrot.lane.b32.xlu1 %v2909_v50, %s4589_s30 }
0x3916   :  { %v2912_v48 = vpop.permute.xlu1 %2911 }
0x3917   :  { %v5804_v49 = vadd.f32 %v2912_v48, %v2904_v36  ;;  %v3002_v36 = vpack.c.bf16 %v5794_v3, %v5777_v22 }
0x3919   :  { %4508 = vtanh.f32 %v5804_v49 }
0x3923   :  { %v4509_v41 = vpop.eup %4508 }
0x3924   :  { %2917 = vrot.lane.b32.xlu0 %v4509_v41, %s4589_s30 }
0x3928   :  { %3014 = vrot.lane.b32.xlu0 %v3000_v6, %s4589_s30 }
0x3996   :  { %v2918_v47 = vpop.permute.xlu0 %2917 }
0x3997   :  { %v5818_v24 = vmul.f32 %v2918_v47, %v2903_v52 }
0x3999   :  { %v2921_v7 = vpack.c.bf16 %v5818_v24, %v5818_v24 }
0x399a   :  { %v3015_v9 = vpop.permute.xlu0 %3014 }
0x399b   :  { %2923 = vrot.lane.b32.xlu1 %v2921_v7, %s4589_s30  ;;  %4158 = vmatprep.mubr.msk.bf16.mxu1 %vm2435_vm4, %v3015_v9 }
0x399f   :  { %3016 = vrot.lane.b32.xlu1 %v3001_v55, %s4589_s30 }
0x3a0d   :  { %v2924_v17 = vpop.permute.xlu1 %2923 }
0x3a0e   :  { %4151 = vmatmul.mubr.msk.bf16.vlgmr.msra.gmra.mrb[84].mxu0 %vm2435_vm4, %v2924_v17 }
0x3a0f   :  { %4167 = vmatpush3.bf16.msra.mxu0 %v5830_v18  ;;  %4170 = vmatprep.mubr.msk.bf16.mxu0 %vm4586_vm1, %v4585_v8 }
0x3a10   :  { %4168 = vmatprep.subr.bf16.mxu0 %v4585_v8 }
0x3a11   :  { %v3017_v51 = vpop.permute.xlu1 %3016 }
0x3a12   :  { %4159 = vmatmul.mubr.msk.bf16.vlgmr.msra.gmra.mrb[88].mxu1 %vm2435_vm4, %v3017_v51 }
0x3a13   :  { %4169 = vmatpush3.bf16.msra.mxu0 %v5837_v42  ;;  %4183 = vmatpush3.bf16.msra.mxu1 %v5830_v18 }
0x3a14   :  { %4174 = vmatprep.subr.bf16.mxu0 %v4585_v8  ;;  %4184 = vmatprep.subr.bf16.mxu1 %v4585_v8 }
0x3a16   :  { %4171 = vmatmul.mubr.bf16.vlgmr.msra.gmra.mrb[88].mxu0 %v4584_v1 }
0x3a17   :  { %4175 = vmatpush3.bf16.msra.mxu0 %v5830_v18  ;;  %4178 = vmatprep.mubr.msk.bf16.mxu0 %vm4586_vm1, %v4585_v8 }
0x3a18   :  { %4176 = vmatprep.subr.bf16.mxu0 %v4585_v8  ;;  %4185 = vmatpush3.bf16.msra.mxu1 %v5837_v42 }
0x3a19   :  { %4198 = vmatprep.subr.bf16.mxu1 %v4585_v8 }
0x3a1b   :  { %4177 = vmatpush3.bf16.msra.mxu0 %v5837_v42 }
0x3a1c   :  { %4190 = vmatprep.subr.bf16.mxu0 %v4585_v8 }
0x3ae1   :  { %v2962_v19 = vpop.f32.mrb[84].mxu0 }
0x3ae2   :  { %v2968_v1 = vadd.f32 %v2962_v19, %v2420_v59  ;;  %v4152_v45 = vpop.f32.mrb[85].mxu0 }
0x3ae3   :  { %v2965_v34 = vpop.f32.mrb[86].mxu0 }
0x3ae4   :  { %v4153_v28 = vpop.f32.mrb[87].mxu0  ;;  %v2970_v12 = vmul.f32 0.5, %v2968_v1 }
0x3ae5   :  { %v5863_v5 = vpop.f32.mrb[88].mxu1 }
0x3ae6   :  { %v3080_v40 = vpop.f32.mrb[89].mxu1 }
0x3ae7   :  { %v3081_v26 = vadd.f32 %v5861_v25, %v3080_v40  ;;  %v5866_v63 = vpop.f32.mrb[90].mxu1 }
0x3ae8   :  { %v3083_v0 = vpop.f32.mrb[91].mxu1 }
0x3ae9   :  { %v3157_v15 = vpop.f32.mrb[88].mxu0  ;;  %v3084_v29 = vadd.f32 %v5861_v25, %v3083_v0 }
0x3aea   :  { %v3163_v2 = vadd.f32 %v3157_v15, %v3081_v26  ;;  %v4172_v27 = vpop.f32.mrb[89].mxu0 }
0x3aeb   :  { %v3160_v53 = vpop.f32.mrb[90].mxu0 }
0x3aec   :  { %4510 = vtanh.f32 %v3163_v2  ;;  %v4173_v30 = vpop.f32.mrb[91].mxu0  ;;  %v3165_v60 = vmul.f32 0.5, %v3163_v2 }
0x3aee   :  { %4512 = vtanh.f32 %v3165_v60  ;;  %v3089_v60 = vadd.f32 %v5863_v5, %v5861_v25 }
0x3af6   :  { %v4511_v11 = vpop.eup %4510 }
0x3af7   :  { %3171 = vrot.lane.b32.xlu0 %v4511_v11, %s4589_s30 }
0x3af8   :  { %v4513_v38 = vpop.eup %4512 }
0x3af9   :  { %v3167_v57 = vmul.f32 0.5, %v4513_v38 }
0x3afb   :  { %v3168_v16 = vadd.f32 0.5, %v3167_v57 }
0x3afd   :  { %v3169_v35 = vmul.f32 0.0, %v3168_v16 }
0x3b69   :  { %v3172_v58 = vpop.permute.xlu0 %3171 }
0x3b6a   :  { %v3174_v54 = vmul.f32 %v3172_v58, %v3168_v16 }
0x3b6c   :  { %3176 = vrot.lane.b32.xlu1 %v3174_v54, %s4589_s30 }
0x3bde   :  { %v3177_v33 = vpop.permute.xlu1 %3176 }
0x3bdf   :  { %v3179_v23 = vadd.f32 %v3177_v33, %v3169_v35 }
0x3be1   :  { %4514 = vtanh.f32 %v3179_v23 }
0x3be2   :  { %4516 = vtanh.f32 %v2968_v1 }
0x3be3   :  { %4518 = vtanh.f32 %v2970_v12 }
0x3beb   :  { %v4515_v10 = vpop.eup %4514 }
0x3bec   :  { %3182 = vrot.lane.b32.xlu0 %v4515_v10, %s4589_s30  ;;  %v4517_v37 = vpop.eup %4516 }
0x3bed   :  { %v4519_v43 = vpop.eup %4518 }
0x3bee   :  { %v2972_v56 = vmul.f32 0.5, %v4519_v43 }
0x3bf0   :  { %2976 = vrot.lane.b32.xlu0 %v4517_v37, %s4589_s30  ;;  %v2973_v46 = vadd.f32 0.5, %v2972_v56 }
0x3bf2   :  { %v2974_v4 = vmul.f32 %v2973_v46, %v5804_v49 }
0x3c5e   :  { %v3183_v20 = vpop.permute.xlu0 %3182 }
0x3c5f   :  { %v3185_v32 = vmul.f32 %v3183_v20, %v3168_v16 }
0x3c61   :  { %v3186_v13 = vpack.c.bf16 %v3185_v32, %v3185_v32 }
0x3c62   :  { %v2977_v44 = vpop.permute.xlu0 %2976 }
0x3c63   :  { %v2979_v31 = vmul.f32 %v2977_v44, %v2973_v46  ;;  %3188 = vrot.lane.b32.xlu1 %v3186_v13, %s4589_s30 }
0x3c65   :  { %2981 = vrot.lane.b32.xlu0 %v2979_v31, %s4589_s30 }
0x3cd5   :  { %v3189_v14 = vpop.permute.xlu1 %3188 }
0x3cd6   :  { %4179 = vmatmul.mubr.msk.bf16.vlgmr.msra.gmra.mrb[92].mxu0 %vm2435_vm4, %v3189_v14  ;;  %v3092_v14 = vadd.f32 %v5866_v63, %v5861_v25 }
0x3cd7   :  { %v2982_v52 = vpop.permute.xlu0 %2981  ;;  %4191 = vmatpush3.bf16.msra.mxu0 %v5830_v18  ;;  %4194 = vmatprep.mubr.msk.bf16.mxu0 %vm4586_vm1, %v4585_v8 }
0x3cd8   :  { %v2984_v21 = vadd.f32 %v2982_v52, %v2974_v4  ;;  %4192 = vmatprep.subr.bf16.mxu0 %v4585_v8 }
0x3cda   :  { %4520 = vtanh.f32 %v2984_v21 }
0x3cdb   :  { %4193 = vmatpush3.bf16.msra.mxu0 %v5837_v42 }
0x3cdc   :  { %4206 = vmatprep.subr.bf16.mxu0 %v4585_v8 }
0x3ce4   :  { %v4521_v50 = vpop.eup %4520 }
0x3ce5   :  { %2987 = vrot.lane.b32.xlu0 %v4521_v50, %s4589_s30 }
0x3ce9   :  { %3018 = vrot.lane.b32.xlu0 %v3002_v36, %s4589_s30 }
0x3d57   :  { %v2988_v48 = vpop.permute.xlu0 %2987 }
0x3d58   :  { %v2990_v34 = vmul.f32 %v2988_v48, %v2973_v46 }
0x3d5a   :  { %v3003_v40 = vpack.c.bf16 %v2990_v34, %v5818_v24 }
0x3d5b   :  { %v3019_v49 = vpop.permute.xlu0 %3018 }
0x3d5c   :  { %4162 = vmatprep.mubr.msk.bf16.mxu1 %vm2435_vm4, %v3019_v49 }
0x3da9   :  { %v3227_v41 = vpop.f32.mrb[92].mxu0 }
0x3daa   :  { %v3233_v6 = vadd.f32 %v3227_v41, %v3084_v29  ;;  %v4180_v39 = vpop.f32.mrb[93].mxu0 }
0x3dab   :  { %v3230_v47 = vpop.f32.mrb[94].mxu0 }
0x3dac   :  { %4522 = vtanh.f32 %v3233_v6  ;;  %v4181_v7 = vpop.f32.mrb[95].mxu0  ;;  %v3235_v55 = vmul.f32 0.5, %v3233_v6 }
0x3dae   :  { %4524 = vtanh.f32 %v3235_v55 }
0x3db6   :  { %v4523_v9 = vpop.eup %4522 }
0x3db7   :  { %3241 = vrot.lane.b32.xlu1 %v4523_v9, %s4589_s30 }
0x3db8   :  { %v4525_v22 = vpop.eup %4524 }
0x3db9   :  { %v3237_v3 = vmul.f32 0.5, %v4525_v22 }
0x3dbb   :  { %v3238_v17 = vadd.f32 0.5, %v3237_v3 }
0x3dbd   :  { %v3239_v19 = vmul.f32 %v3238_v17, %v3179_v23 }
0x3e29   :  { %v3242_v51 = vpop.permute.xlu1 %3241 }
0x3e2a   :  { %v3244_v59 = vmul.f32 %v3242_v51, %v3238_v17 }
0x3e2c   :  { %3246 = vrot.lane.b32.xlu1 %v3244_v59, %s4589_s30 }
0x3e9e   :  { %v3247_v1 = vpop.permute.xlu1 %3246 }
0x3e9f   :  { %v3249_v45 = vadd.f32 %v3247_v1, %v3239_v19 }
0x3ea1   :  { %4526 = vtanh.f32 %v3249_v45 }
0x3eab   :  { %v4527_v28 = vpop.eup %4526 }
0x3eac   :  { %3252 = vrot.lane.b32.xlu1 %v4527_v28, %s4589_s30 }
0x3eb0   :  { %3020 = vrot.lane.b32.xlu1 %v3003_v40, %s4589_s30 }
0x3f1e   :  { %v3253_v26 = vpop.permute.xlu1 %3252 }
0x3f1f   :  { %v3255_v0 = vmul.f32 %v3253_v26, %v3238_v17 }
0x3f21   :  { %v3256_v15 = vpack.c.bf16 %v3255_v0, %v3255_v0 }
0x3f22   :  { %v3021_v2 = vpop.permute.xlu1 %3020 }
0x3f23   :  { %3258 = vrot.lane.b32.xlu0 %v3256_v15, %s4589_s30  ;;  %4163 = vmatmul.mubr.msk.bf16.gmra.mrb[92].mxu1 %vm2435_vm4, %v3021_v2 }
0x3f24   :  { %4186 = vmatprep.mubr.msk.bf16.mxu1 %vm4586_vm1, %v4585_v8 }
0x3f95   :  { %v3259_v27 = vpop.permute.xlu0 %3258 }
0x3f96   :  { %4187 = vmatmul.mubr.msk.bf16.vlgmr.msra.gmra.mrb[96].mxu1 %vm2435_vm4, %v3259_v27 }
0x3f97   :  { %4199 = vmatpush3.bf16.msra.mxu1 %v5830_v18  ;;  %4202 = vmatprep.mubr.msk.bf16.mxu1 %vm4586_vm1, %v4585_v8 }
0x3f98   :  { %4200 = vmatprep.subr.bf16.mxu1 %v4585_v8 }
0x3f9b   :  { %4201 = vmatpush3.bf16.msra.mxu1 %v5837_v42 }
0x3f9c   :  { %4214 = vmatprep.subr.bf16.mxu1 %v4585_v8 }
0x3ff6   :  { %v5904_v24 = vpop.f32.mrb[92].mxu1 }
0x3ff7   :  { %v5906_v53 = vpop.f32.mrb[93].mxu1 }
0x3ff8   :  { %v5908_v30 = vpop.f32.mrb[94].mxu1  ;;  %v3097_v59 = vadd.f32 %v5861_v25, %v5906_v53 }
0x3ff9   :  { %v5910_v11 = vpop.f32.mrb[95].mxu1 }
0x4069   :  { %v3297_v38 = vpop.f32.mrb[96].mxu1 }
0x406a   :  { %v3303_v57 = vadd.f32 %v3297_v38, %v3089_v60  ;;  %v4188_v16 = vpop.f32.mrb[97].mxu1 }
0x406b   :  { %v3300_v58 = vpop.f32.mrb[98].mxu1 }
0x406c   :  { %4528 = vtanh.f32 %v3303_v57  ;;  %v4189_v54 = vpop.f32.mrb[99].mxu1  ;;  %v3305_v33 = vmul.f32 0.5, %v3303_v57 }
0x406e   :  { %4530 = vtanh.f32 %v3305_v33 }
0x4076   :  { %v4529_v35 = vpop.eup %4528 }
0x4077   :  { %3311 = vrot.lane.b32.xlu1 %v4529_v35, %s4589_s30 }
0x4078   :  { %v4531_v23 = vpop.eup %4530 }
0x4079   :  { %v3307_v10 = vmul.f32 0.5, %v4531_v23  ;;  %v3100_v23 = vadd.f32 %v5861_v25, %v5910_v11 }
0x407b   :  { %v3308_v37 = vadd.f32 0.5, %v3307_v10 }
0x407d   :  { %v3309_v56 = vmul.f32 %v3308_v37, %v3249_v45 }
0x40e9   :  { %v3312_v12 = vpop.permute.xlu1 %3311 }
0x40ea   :  { %v3314_v43 = vmul.f32 %v3312_v12, %v3308_v37 }
0x40ec   :  { %3316 = vrot.lane.b32.xlu0 %v3314_v43, %s4589_s30 }
0x415e   :  { %v3317_v5 = vpop.permute.xlu0 %3316 }
0x415f   :  { %v3319_v20 = vadd.f32 %v3317_v5, %v3309_v56 }
0x4161   :  { %4532 = vtanh.f32 %v3319_v20 }
0x416b   :  { %v4533_v32 = vpop.eup %4532 }
0x416c   :  { %3322 = vrot.lane.b32.xlu1 %v4533_v32, %s4589_s30 }
0x41de   :  { %v3323_v13 = vpop.permute.xlu1 %3322 }
0x41df   :  { %v3325_v46 = vmul.f32 %v3323_v13, %v3308_v37 }
0x41e1   :  { %v3326_v44 = vpack.c.bf16 %v3325_v46, %v3325_v46 }
0x41e3   :  { %3328 = vrot.lane.b32.xlu0 %v3326_v44, %s4589_s30 }
0x4255   :  { %v3329_v31 = vpop.permute.xlu0 %3328 }
0x4256   :  { %4195 = vmatmul.mubr.msk.bf16.vlgmr.msra.gmra.mrb[96].mxu0 %vm2435_vm4, %v3329_v31 }
0x4257   :  { %4207 = vmatpush3.bf16.msra.mxu0 %v5830_v18  ;;  %4210 = vmatprep.mubr.msk.bf16.mxu0 %vm4586_vm1, %v4585_v8 }
0x4258   :  { %4208 = vmatprep.subr.bf16.mxu0 %v4585_v8 }
0x425b   :  { %4209 = vmatpush3.bf16.msra.mxu0 %v5837_v42 }
0x425c   :  { %4222 = vmatprep.subr.bf16.mxu0 %v4585_v8 }
0x4329   :  { %v3367_v4 = vpop.f32.mrb[96].mxu0 }
0x432a   :  { %v3373_v52 = vadd.f32 %v3367_v4, %v3092_v14  ;;  %v4196_v21 = vpop.f32.mrb[97].mxu0 }
0x432b   :  { %v3370_v50 = vpop.f32.mrb[98].mxu0 }
0x432c   :  { %4534 = vtanh.f32 %v3373_v52  ;;  %v4197_v36 = vpop.f32.mrb[99].mxu0  ;;  %v3375_v49 = vmul.f32 0.5, %v3373_v52  ;;  %v3105_v50 = vadd.f32 %v5904_v24, %v5861_v25 }
0x432e   :  { %4536 = vtanh.f32 %v3375_v49 }
0x4336   :  { %v4535_v48 = vpop.eup %4534 }
0x4337   :  { %3381 = vrot.lane.b32.xlu1 %v4535_v48, %s4589_s30 }
0x4338   :  { %v4537_v29 = vpop.eup %4536 }
0x4339   :  { %v3377_v41 = vmul.f32 0.5, %v4537_v29 }
0x433b   :  { %v3378_v6 = vadd.f32 0.5, %v3377_v41 }
0x433d   :  { %v3379_v7 = vmul.f32 %v3378_v6, %v3319_v20 }
0x43a9   :  { %v3382_v39 = vpop.permute.xlu1 %3381 }
0x43aa   :  { %v3384_v47 = vmul.f32 %v3382_v39, %v3378_v6 }
0x43ac   :  { %3386 = vrot.lane.b32.xlu0 %v3384_v47, %s4589_s30 }
0x441e   :  { %v3387_v63 = vpop.permute.xlu0 %3386 }
0x441f   :  { %v3389_v9 = vadd.f32 %v3387_v63, %v3379_v7 }
0x4421   :  { %4538 = vtanh.f32 %v3389_v9 }
0x442b   :  { %v4539_v55 = vpop.eup %4538 }
0x442c   :  { %3392 = vrot.lane.b32.xlu1 %v4539_v55, %s4589_s30 }
0x449e   :  { %v3393_v22 = vpop.permute.xlu1 %3392 }
0x449f   :  { %v3395_v3 = vmul.f32 %v3393_v22, %v3378_v6 }
0x44a1   :  { %v3396_v17 = vpack.c.bf16 %v3395_v3, %v3395_v3 }
0x44a3   :  { %3398 = vrot.lane.b32.xlu0 %v3396_v17, %s4589_s30 }
0x4515   :  { %v3399_v51 = vpop.permute.xlu0 %3398 }
0x4516   :  { %4203 = vmatmul.mubr.msk.bf16.vlgmr.msra.gmra.mrb[100].mxu1 %vm2435_vm4, %v3399_v51 }
0x4517   :  { %4215 = vmatpush3.bf16.msra.mxu1 %v5830_v18  ;;  %4218 = vmatprep.mubr.msk.bf16.mxu1 %vm4586_vm1, %v4585_v8 }
0x4518   :  { %4216 = vmatprep.subr.bf16.mxu1 %v4585_v8 }
0x451b   :  { %4217 = vmatpush3.bf16.msra.mxu1 %v5837_v42 }
0x45e9   :  { %v3437_v19 = vpop.f32.mrb[100].mxu1 }
0x45ea   :  { %v3443_v1 = vadd.f32 %v3437_v19, %v3097_v59  ;;  %v4204_v45 = vpop.f32.mrb[101].mxu1 }
0x45eb   :  { %v3440_v34 = vpop.f32.mrb[102].mxu1  ;;  %v3108_v45 = vadd.f32 %v5908_v30, %v5861_v25 }
0x45ec   :  { %4540 = vtanh.f32 %v3443_v1  ;;  %v4205_v28 = vpop.f32.mrb[103].mxu1  ;;  %v3445_v26 = vmul.f32 0.5, %v3443_v1 }
0x45ee   :  { %4542 = vtanh.f32 %v3445_v26 }
0x45f6   :  { %v4541_v40 = vpop.eup %4540 }
0x45f7   :  { %3451 = vrot.lane.b32.xlu1 %v4541_v40, %s4589_s30 }
0x45f8   :  { %v4543_v0 = vpop.eup %4542 }
0x45f9   :  { %v3447_v15 = vmul.f32 0.5, %v4543_v0 }
0x45fb   :  { %v3448_v2 = vadd.f32 0.5, %v3447_v15 }
0x45fd   :  { %v3449_v38 = vmul.f32 %v3448_v2, %v3389_v9 }
0x4669   :  { %v3452_v27 = vpop.permute.xlu1 %3451 }
0x466a   :  { %v3454_v60 = vmul.f32 %v3452_v27, %v3448_v2 }
0x466c   :  { %3456 = vrot.lane.b32.xlu0 %v3454_v60, %s4589_s30 }
0x46de   :  { %v3457_v53 = vpop.permute.xlu0 %3456 }
0x46df   :  { %v3459_v57 = vadd.f32 %v3457_v53, %v3449_v38 }
0x46e1   :  { %4544 = vtanh.f32 %v3459_v57 }
0x46eb   :  { %v4545_v16 = vpop.eup %4544 }
0x46ec   :  { %3462 = vrot.lane.b32.xlu1 %v4545_v16, %s4589_s30 }
0x475e   :  { %v3463_v58 = vpop.permute.xlu1 %3462 }
0x475f   :  { %v3465_v54 = vmul.f32 %v3463_v58, %v3448_v2 }
0x4761   :  { %v3466_v35 = vpack.c.bf16 %v3465_v54, %v3465_v54 }
0x4763   :  { %3468 = vrot.lane.b32.xlu0 %v3466_v35, %s4589_s30 }
0x47d5   :  { %v3469_v33 = vpop.permute.xlu0 %3468 }
0x47d6   :  { %4211 = vmatmul.mubr.msk.bf16.vlgmr.msra.gmra.mrb[100].mxu0 %vm2435_vm4, %v3469_v33 }
0x47d7   :  { %4223 = vmatpush3.bf16.msra.mxu0 %v5830_v18  ;;  %4226 = vmatprep.mubr.msk.bf16.mxu0 %vm4586_vm1, %v4585_v8 }
0x47d8   :  { %4224 = vmatprep.subr.bf16.mxu0 %v4585_v8 }
0x47db   :  { %4225 = vmatpush3.bf16.msra.mxu0 %v5837_v42 }
0x48a9   :  { %v3507_v10 = vpop.f32.mrb[100].mxu0 }
0x48aa   :  { %v3513_v37 = vadd.f32 %v3507_v10, %v3100_v23  ;;  %v4212_v12 = vpop.f32.mrb[101].mxu0 }
0x48ab   :  { %v3510_v43 = vpop.f32.mrb[102].mxu0 }
0x48ac   :  { %4546 = vtanh.f32 %v3513_v37  ;;  %v4213_v56 = vpop.f32.mrb[103].mxu0  ;;  %v3515_v18 = vmul.f32 0.5, %v3513_v37 }
0x48ae   :  { %4548 = vtanh.f32 %v3515_v18 }
0x48b6   :  { %v4547_v5 = vpop.eup %4546 }
0x48b7   :  { %3521 = vrot.lane.b32.xlu1 %v4547_v5, %s4589_s30 }
0x48b8   :  { %v4549_v20 = vpop.eup %4548 }
0x48b9   :  { %v3517_v32 = vmul.f32 0.5, %v4549_v20 }
0x48bb   :  { %v3518_v13 = vadd.f32 0.5, %v3517_v32 }
0x48bd   :  { %v3519_v42 = vmul.f32 %v3518_v13, %v3459_v57 }
0x4929   :  { %v3522_v8 = vpop.permute.xlu1 %3521 }
0x492a   :  { %v3524_v46 = vmul.f32 %v3522_v8, %v3518_v13 }
0x492c   :  { %3526 = vrot.lane.b32.xlu0 %v3524_v46, %s4589_s30 }
0x499e   :  { %v3527_v11 = vpop.permute.xlu0 %3526 }
0x499f   :  { %v3529_v44 = vadd.f32 %v3527_v11, %v3519_v42 }
0x49a1   :  { %4550 = vtanh.f32 %v3529_v44 }
0x49ab   :  { %v4551_v31 = vpop.eup %4550 }
0x49ac   :  { %3532 = vrot.lane.b32.xlu1 %v4551_v31, %s4589_s30 }
0x4a1e   :  { %v3533_v14 = vpop.permute.xlu1 %3532 }
0x4a1f   :  { %v3535_v4 = vmul.f32 %v3533_v14, %v3518_v13 }
0x4a21   :  { %v3536_v52 = vpack.c.bf16 %v3535_v4, %v3535_v4 }
0x4a23   :  { %3538 = vrot.lane.b32.xlu0 %v3536_v52, %s4589_s30 }
0x4a95   :  { %v3539_v21 = vpop.permute.xlu0 %3538 }
0x4a96   :  { %4219 = vmatmul.mubr.msk.bf16.vlgmr.msra.gmra.mrb[104].mxu1 %vm2435_vm4, %v3539_v21 }
0x4b69   :  { %v3577_v36 = vpop.f32.mrb[104].mxu1 }
0x4b6a   :  { %v3583_v48 = vadd.f32 %v3577_v36, %v3105_v50  ;;  %v4220_v49 = vpop.f32.mrb[105].mxu1 }
0x4b6b   :  { %v3580_v29 = vpop.f32.mrb[106].mxu1 }
0x4b6c   :  { %4552 = vtanh.f32 %v3583_v48  ;;  %v4221_v41 = vpop.f32.mrb[107].mxu1  ;;  %v3585_v39 = vmul.f32 0.5, %v3583_v48 }
0x4b6e   :  { %4554 = vtanh.f32 %v3585_v39 }
0x4b76   :  { %v4553_v6 = vpop.eup %4552 }
0x4b77   :  { %3591 = vrot.lane.b32.xlu1 %v4553_v6, %s4589_s30 }
0x4b78   :  { %v4555_v47 = vpop.eup %4554 }
0x4b79   :  { %v3587_v7 = vmul.f32 0.5, %v4555_v47 }
0x4b7b   :  { %v3588_v63 = vadd.f32 0.5, %v3587_v7 }
0x4b7d   :  { %v3589_v22 = vmul.f32 %v3588_v63, %v3529_v44 }
0x4be9   :  { %v3592_v9 = vpop.permute.xlu1 %3591 }
0x4bea   :  { %v3594_v55 = vmul.f32 %v3592_v9, %v3588_v63 }
0x4bec   :  { %3596 = vrot.lane.b32.xlu0 %v3594_v55, %s4589_s30 }
0x4c5e   :  { %v3597_v24 = vpop.permute.xlu0 %3596 }
0x4c5f   :  { %v3599_v3 = vadd.f32 %v3597_v24, %v3589_v22 }
0x4c61   :  { %4556 = vtanh.f32 %v3599_v3 }
0x4c6b   :  { %v4557_v17 = vpop.eup %4556 }
0x4c6c   :  { %3602 = vrot.lane.b32.xlu1 %v4557_v17, %s4589_s30 }
0x4cde   :  { %v3603_v51 = vpop.permute.xlu1 %3602 }
0x4cdf   :  { %v3605_v59 = vmul.f32 %v3603_v51, %v3588_v63 }
0x4ce1   :  { %v3606_v19 = vpack.c.bf16 %v3605_v59, %v3605_v59 }
0x4ce3   :  { %3608 = vrot.lane.b32.xlu0 %v3606_v19, %s4589_s30 }
0x4d55   :  { %v3609_v1 = vpop.permute.xlu0 %3608 }
0x4d56   :  { %4227 = vmatmul.mubr.msk.bf16.vlgmr.msra.gmra.mrb[104].mxu0 %vm2435_vm4, %v3609_v1 }
0x4e29   :  { %v3647_v34 = vpop.f32.mrb[104].mxu0 }
0x4e2a   :  { %v3653_v28 = vadd.f32 %v3647_v34, %v3108_v45  ;;  %v4228_v40 = vpop.f32.mrb[105].mxu0 }
0x4e2b   :  { %v3650_v26 = vpop.f32.mrb[106].mxu0 }
0x4e2c   :  { %4558 = vtanh.f32 %v3653_v28  ;;  %v4229_v0 = vpop.f32.mrb[107].mxu0  ;;  %v3655_v2 = vmul.f32 0.5, %v3653_v28 }
0x4e2e   :  { %4560 = vtanh.f32 %v3655_v2 }
0x4e36   :  { %v4559_v15 = vpop.eup %4558 }
0x4e37   :  { %3661 = vrot.lane.b32.xlu1 %v4559_v15, %s4589_s30 }
0x4e38   :  { %v4561_v27 = vpop.eup %4560 }
0x4e39   :  { %v3657_v60 = vmul.f32 0.5, %v4561_v27 }
0x4e3b   :  { %v3658_v38 = vadd.f32 0.5, %v3657_v60 }
0x4e3d   :  { %v3659_v25 = vmul.f32 %v3658_v38, %v3599_v3 }
0x4ea9   :  { %v3662_v53 = vpop.permute.xlu1 %3661 }
0x4eaa   :  { %v3664_v57 = vmul.f32 %v3662_v53, %v3658_v38 }
0x4eac   :  { %3666 = vrot.lane.b32.xlu0 %v3664_v57, %s4589_s30 }
0x4eb0   :  { %3677 = vrot.lane.b32.xlu0 %v5505_v62, %s4587_s3 }
0x4f1e   :  { %v3667_v30 = vpop.permute.xlu0 %3666 }
0x4f1f   :  { %v3669_v16 = vadd.f32 %v3667_v30, %v3659_v25 }
0x4f21   :  { %4562 = vtanh.f32 %v3669_v16 }
0x4f22   :  { %v3678_v33 = vpop.permute.xlu0 %3677 }
0x4f2b   :  { %v4563_v58 = vpop.eup %4562 }
0x4f2c   :  { %3672 = vrot.lane.b32.xlu1 %v4563_v58, %s4589_s30 }
0x4f30   :  { %3681 = vrot.lane.b32.xlu1 %v5730_v61, %s4587_s3 }
0x4f9e   :  { %v3673_v54 = vpop.permute.xlu1 %3672 }
0x4f9f   :  { %v3675_v35 = vmul.f32 %v3673_v54, %v3658_v38 }
0x4fa1   :  { %3685 = vrot.lane.b32.xlu0 %v3675_v35, %s4587_s3 }
0x4fa2   :  { %v3682_v23 = vpop.permute.xlu1 %3681 }
0x4fa3   :  { %v3688_v10 = vsel %vm2435_vm4, %v3678_v33, %v3682_v23 }
0x5013   :  { %v3686_v37 = vpop.permute.xlu0 %3685 }
0x5014   :  { %v3689_v62 = vsel %vm1683_vm3, %v3688_v10, %v3686_v37 }
0x5015   :  { %v3690_v12 = vsel %vm381_vm2, %v3689_v62, 0.0 }
0x5016   :  { %v3691_v43 = vmul.f32 0.5, %v3690_v12 }
0x5018   :  { %4564 = vtanh.f32 %v3691_v43 }
0x5022   :  { %v4565_v56 = vpop.eup %4564 }
0x5023   :  { %v3693_v5 = vmul.f32 0.5, %v4565_v56 }
0x5025   :  { %v3694_v18 = vadd.f32 0.5, %v3693_v5 }
0x5027   :  { %v3695_v20 = vmul.f32 %v3694_v18, %v3690_v12 }
0x5029   :  { %3696 = vst [vmem:[%s5992_s13] sm:$0xff] %v3695_v20 }

</bundles_post_ra>
